<compile_context>
chip_gen: v7x
topology: tpu7x:2x2x1
jax: 0.10.0
libtpu: 0.0.40
codegen_flags: <defaults>
</compile_context>

<pallas_src>
import jax
import jax.numpy as jnp
from jax import lax
from jax.experimental import pallas as pl
from jax.experimental.pallas import tpu as pltpu


def _sigmoid(x):
    # one EUP op (tanh) per gate instead of exp + reciprocal
    return 0.5 * (jnp.tanh(0.5 * x) + 1.0)


def _make_kernel(T, BT, unroll):
    def kernel(emb_ref,                          # (T*BT, Hp) bf16, tile-major
               e_wih_ref, e_whh_ref, e_b_ref,    # (Hp,4Hp) bf16, (Hp,4Hp) bf16, (1,4Hp) f32
               d_wih_ref, d_whh_ref, d_b_ref,    # decoder, same shapes
               fc_w_ref, fc_b_ref,               # (Hp,Op) bf16, (1,Op) f32
               out_ref,                          # (T*BT, Op) f32
               gx_sc,                            # (T*BT, 4Hp) f32 (shared enc/dec)
               hs_sc,                            # (T*BT, Hp) f32  (h_t stash for FC)
               h_sc, c_sc):                      # (BT, Hp) f32 carry
        Hp = emb_ref.shape[-1]

        emb = emb_ref[...]                       # bf16 (T*BT, Hp)
        e_whh = e_whh_ref[...]
        d_whh = d_whh_ref[...]

        def cell(gates, c):
            # PyTorch gate order [i, f, g, o]; each gate owns an Hp-lane slab,
            # so these are aligned full-tile lane slices.
            i = _sigmoid(gates[:, 0 * Hp:1 * Hp])
            f = _sigmoid(gates[:, 1 * Hp:2 * Hp])
            g = jnp.tanh(gates[:, 2 * Hp:3 * Hp])
            o = _sigmoid(gates[:, 3 * Hp:4 * Hp])
            c_new = f * c + i * g
            h_new = o * jnp.tanh(c_new)
            return h_new, c_new

        def run_lstm(wih_ref, b_ref, whh):
            # hoisted input projection: ONE (T*BT,Hp)@(Hp,4Hp) bf16 MXU matmul
            gx_sc[...] = (jnp.dot(emb, wih_ref[...],
                                  preferred_element_type=jnp.float32)
                          + b_ref[...])

            def step(t, carry):
                start = pl.multiple_of(t * BT, BT)
                gates = (gx_sc[pl.ds(start, BT), :]
                         + jnp.dot(h_sc[...].astype(jnp.bfloat16), whh,
                                   preferred_element_type=jnp.float32))
                h_new, c_new = cell(gates, c_sc[...])
                h_sc[...] = h_new
                c_sc[...] = c_new
                hs_sc[pl.ds(start, BT), :] = h_new
                return carry

            lax.fori_loop(0, T, step, 0, unroll=unroll)

        # ---- encoder: zero initial state ----
        h_sc[...] = jnp.zeros_like(h_sc)
        c_sc[...] = jnp.zeros_like(c_sc)
        run_lstm(e_wih_ref, e_b_ref, e_whh)

        # ---- decoder: initial state = encoder final state; reuses gx/hs scratch ----
        run_lstm(d_wih_ref, d_b_ref, d_whh)

        # ---- batched output projection: one bf16 matmul + one lane-dense store ----
        out_ref[...] = (jnp.dot(hs_sc[...].astype(jnp.bfloat16), fc_w_ref[...],
                                preferred_element_type=jnp.float32)
                        + fc_b_ref[...])

    return kernel


def _round_up(x, m):
    return ((x + m - 1) // m) * m


def _pad_gate_weight(w, H, Hp):
    # (in_dim=H, 4H) -> (Hp, 4*Hp): each gate gets its own Hp-lane slab; zero
    # padding applied AFTER the bf16 cast keeps padded h/c lanes exactly 0.
    w4 = w.astype(jnp.bfloat16).reshape(H, 4, H)
    wp = jnp.zeros((Hp, 4, Hp), jnp.bfloat16).at[:H, :, :H].set(w4)
    return wp.reshape(Hp, 4 * Hp)


def _pad_gate_bias(b, H, Hp):
    b4 = b.astype(jnp.float32).reshape(1, 4, H)
    bp = jnp.zeros((1, 4, Hp), jnp.float32).at[:, :, :H].set(b4)
    return bp.reshape(1, 4 * Hp)


def seq2seq_forward(x_tokens, params):
    """x_tokens: (B, T) int32.  Returns (B, T, O) float32."""
    emb_table = params["embedding"]                  # (V, H)
    B, T = x_tokens.shape
    V, H = emb_table.shape
    O = params["fc_w"].shape[1]

    Hp = _round_up(H, 128)                           # lane-align hidden
    Op = _round_up(O, 128)                           # lane-dense output stores
    # Fat batch tile: fill MXU rows (256 on v6e/v7x) but never exceed the batch.
    BT = min(_round_up(B, 8), 256)
    Bp = _round_up(B, BT)
    num_bt = Bp // BT
    TB = T * BT

    # ---- pad params (after bf16 cast) to (8,128)-aligned shapes ----
    emb_p = jnp.zeros((V, Hp), jnp.bfloat16).at[:, :H].set(
        emb_table.astype(jnp.bfloat16))
    e_wih = _pad_gate_weight(params["enc_wih"], H, Hp)
    e_whh = _pad_gate_weight(params["enc_whh"], H, Hp)
    e_b = _pad_gate_bias(params["enc_b"], H, Hp)
    d_wih = _pad_gate_weight(params["dec_wih"], H, Hp)
    d_whh = _pad_gate_weight(params["dec_whh"], H, Hp)
    d_b = _pad_gate_bias(params["dec_b"], H, Hp)
    fc_w = jnp.zeros((Hp, Op), jnp.bfloat16).at[:H, :O].set(
        params["fc_w"].astype(jnp.bfloat16))
    fc_b = jnp.zeros((1, Op), jnp.float32).at[:, :O].set(params["fc_b"])

    # ---- glue: gather embeddings in batch-tile-major (num_bt, T*BT, Hp) ----
    # TODO(synk): gather in-kernel via scalar-prefetched token ids to skip this
    # HBM round trip of the Hp-padded activations.
    x_p = jnp.zeros((Bp, T), x_tokens.dtype).at[:B].set(x_tokens)
    x_tiles = jnp.transpose(x_p.reshape(num_bt, BT, T), (0, 2, 1))   # (nb, T, BT)
    emb_tiles = jnp.take(emb_p, x_tiles.reshape(num_bt, TB), axis=0)  # (nb, TB, Hp)

    # explicit scoped-VMEM budget: (double-buffered) weights + pipelined io
    # blocks + scratches, with 2x headroom.
    w_bytes = 2 * (4 * Hp * 4 * Hp * 2 + Hp * Op * 2 + (2 * 4 * Hp + Op) * 4)
    io_bytes = 2 * TB * Hp * 2 + 2 * TB * Op * 4
    sc_bytes = TB * 4 * Hp * 4 + TB * Hp * 4 + 2 * BT * Hp * 4
    vmem_limit = int(min(100 * 1024 * 1024,
                         max(2 * (w_bytes + io_bytes + sc_bytes),
                             16 * 1024 * 1024)))

    kernel = _make_kernel(T, BT, unroll=max(1, min(T, 8)))
    wspec = lambda shape: pl.BlockSpec(shape, lambda b: (0, 0))

    out_tiles = pl.pallas_call(
        kernel,
        out_shape=jax.ShapeDtypeStruct((num_bt, TB, Op), jnp.float32),
        grid_spec=pltpu.PrefetchScalarGridSpec(
            num_scalar_prefetch=0,
            grid=(num_bt,),
            in_specs=[
                pl.BlockSpec((None, TB, Hp), lambda b: (b, 0, 0)),   # emb tile
                wspec((Hp, 4 * Hp)), wspec((Hp, 4 * Hp)), wspec((1, 4 * Hp)),
                wspec((Hp, 4 * Hp)), wspec((Hp, 4 * Hp)), wspec((1, 4 * Hp)),
                wspec((Hp, Op)), wspec((1, Op)),
            ],
            out_specs=pl.BlockSpec((None, TB, Op), lambda b: (b, 0, 0)),
            scratch_shapes=[
                pltpu.VMEM((TB, 4 * Hp), jnp.float32),   # gx (shared enc/dec)
                pltpu.VMEM((TB, Hp), jnp.float32),       # h_t stash for batched FC
                pltpu.VMEM((BT, Hp), jnp.float32),       # h carry
                pltpu.VMEM((BT, Hp), jnp.float32),       # c carry
            ],
        ),
        compiler_params=pltpu.CompilerParams(
            # TODO(synk): on v7x verify both TensorCores pick up batch tiles;
            # switch to pltpu.CORE_PARALLEL / core_map if one sits idle.
            dimension_semantics=("parallel",),
            vmem_limit_bytes=vmem_limit,
        ),
    )(emb_tiles, e_wih, e_whh, e_b, d_wih, d_whh, d_b, fc_w, fc_b)

    # (num_bt, T*BT, Op) -> (Bp, T, Op), strip padding -> (B, T, O)
    out = jnp.transpose(out_tiles.reshape(num_bt, T, BT, Op), (0, 2, 1, 3))
    return out.reshape(Bp, T, Op)[:B, :, :O]


def make_params(key, vocab, hidden, out_size):
    ks = jax.random.split(key, 10)
    scale = 1.0 / jnp.sqrt(hidden)
    u = lambda k, shape: jax.random.uniform(k, shape, jnp.float32, -scale, scale)
    return {
        "embedding": jax.random.normal(ks[0], (vocab, hidden), jnp.float32),
        # weights stored transposed (in_dim, 4H) so the kernel does x @ W
        "enc_wih": u(ks[1], (hidden, 4 * hidden)),
        "enc_whh": u(ks[2], (hidden, 4 * hidden)),
        "enc_b":   u(ks[3], (1, 4 * hidden)),   # b_ih + b_hh combined
        "dec_wih": u(ks[4], (hidden, 4 * hidden)),
        "dec_whh": u(ks[5], (hidden, 4 * hidden)),
        "dec_b":   u(ks[6], (1, 4 * hidden)),
        "fc_w":    u(ks[7], (hidden, out_size)),
        "fc_b":    u(ks[8], (1, out_size)),
    }


def reference_forward(x_tokens, params):
    """Pure-JAX f32 reference reproducing PyTorch semantics (for verification)."""
    H = params["embedding"].shape[1]
    emb = jnp.take(params["embedding"], x_tokens, axis=0)   # (B, T, H)

    def lstm(emb_btH, wih, whh, b, h0, c0):
        def step(carry, x_t):
            h, c = carry
            gates = x_t @ wih + h @ whh + b
            i = jax.nn.sigmoid(gates[:, 0 * H:1 * H])
            f = jax.nn.sigmoid(gates[:, 1 * H:2 * H])
            g = jnp.tanh(gates[:, 2 * H:3 * H])
            o = jax.nn.sigmoid(gates[:, 3 * H:4 * H])
            c = f * c + i * g
            h = o * jnp.tanh(c)
            return (h, c), h
        (h, c), hs = lax.scan(step, (h0, c0), jnp.transpose(emb_btH, (1, 0, 2)))
        return jnp.transpose(hs, (1, 0, 2)), h, c

    B = x_tokens.shape[0]
    z = jnp.zeros((B, H), jnp.float32)
    _, h_enc, c_enc = lstm(emb, params["enc_wih"], params["enc_whh"],
                           params["enc_b"][0], z, z)
    dec_out, _, _ = lstm(emb, params["dec_wih"], params["dec_whh"],
                         params["dec_b"][0], h_enc, c_enc)
    return dec_out @ params["fc_w"] + params["fc_b"][0]


if __name__ == "__main__":
    B, T = 2, 8
    VOCAB, HIDDEN, OUT = 16, 32, 16

    key = jax.random.PRNGKey(0)
    k_params, k_tokens = jax.random.split(key)
    params = make_params(k_params, VOCAB, HIDDEN, OUT)
    x = jax.random.randint(k_tokens, (B, T), 0, VOCAB, dtype=jnp.int32)

    out = seq2seq_forward(x, params)
    out = jax.block_until_ready(out)

    ref = reference_forward(x, params)
    assert out.shape == (B, T, OUT)
    # matmuls run in bf16 (f32 accumulation), so tolerance is bf16-scale
    assert jnp.allclose(out, ref, atol=6e-2, rtol=6e-2), float(
        jnp.max(jnp.abs(out - ref)))

    print("KERNEL_OK")
</pallas_src>

<mosaic_0001>
module attributes {stable_mosaic.version = 11 : i64} {
  func.func @kernel(%arg0: i32, %arg1: memref<1x64x128xbf16, #tpu.memory_space<vmem>>, %arg2: memref<128x512xbf16, #tpu.memory_space<vmem>>, %arg3: memref<128x512xbf16, #tpu.memory_space<vmem>>, %arg4: memref<1x512xf32, #tpu.memory_space<vmem>>, %arg5: memref<128x512xbf16, #tpu.memory_space<vmem>>, %arg6: memref<128x512xbf16, #tpu.memory_space<vmem>>, %arg7: memref<1x512xf32, #tpu.memory_space<vmem>>, %arg8: memref<128x128xbf16, #tpu.memory_space<vmem>>, %arg9: memref<1x128xf32, #tpu.memory_space<vmem>>, %arg10: memref<1x64x128xf32, #tpu.memory_space<vmem>>, %arg11: memref<64x512xf32, #tpu.memory_space<vmem>>, %arg12: memref<64x128xf32, #tpu.memory_space<vmem>>, %arg13: memref<8x128xf32, #tpu.memory_space<vmem>>, %arg14: memref<8x128xf32, #tpu.memory_space<vmem>>) attributes {dimension_semantics = [#tpu.dimension_semantics<parallel>], iteration_bounds = array<i64: 1>, scalar_prefetch = 0 : i64, scratch_operands = 4 : i64, tpu.core_type = #tpu.core_type<tc>, window_params = [{transform_indices = @transform_0, window_bounds = array<i64: 1, 64, 128>}, {pipeline_mode = #tpu.pipeline_mode<synchronous>, transform_indices = @transform_1, window_bounds = array<i64: 128, 512>}, {pipeline_mode = #tpu.pipeline_mode<synchronous>, transform_indices = @transform_2, window_bounds = array<i64: 128, 512>}, {pipeline_mode = #tpu.pipeline_mode<synchronous>, transform_indices = @transform_3, window_bounds = array<i64: 1, 512>}, {pipeline_mode = #tpu.pipeline_mode<synchronous>, transform_indices = @transform_4, window_bounds = array<i64: 128, 512>}, {pipeline_mode = #tpu.pipeline_mode<synchronous>, transform_indices = @transform_5, window_bounds = array<i64: 128, 512>}, {pipeline_mode = #tpu.pipeline_mode<synchronous>, transform_indices = @transform_6, window_bounds = array<i64: 1, 512>}, {pipeline_mode = #tpu.pipeline_mode<synchronous>, transform_indices = @transform_7, window_bounds = array<i64: 128, 128>}, {pipeline_mode = #tpu.pipeline_mode<synchronous>, transform_indices = @transform_8, window_bounds = array<i64: 1, 128>}, {transform_indices = @transform_9, window_bounds = array<i64: 1, 64, 128>}]} {
    %c0 = arith.constant 0 : index
    %c0_0 = arith.constant 0 : index
    %c0_1 = arith.constant 0 : index
    %0 = vector.load %arg1[%c0, %c0_0, %c0_1] : memref<1x64x128xbf16, #tpu.memory_space<vmem>>, vector<1x64x128xbf16>
    %1 = vector.shape_cast %0 : vector<1x64x128xbf16> to vector<64x128xbf16>
    %c0_2 = arith.constant 0 : index
    %c0_3 = arith.constant 0 : index
    %2 = vector.load %arg3[%c0_2, %c0_3] : memref<128x512xbf16, #tpu.memory_space<vmem>>, vector<128x512xbf16>
    %c0_4 = arith.constant 0 : index
    %c0_5 = arith.constant 0 : index
    %3 = vector.load %arg6[%c0_4, %c0_5] : memref<128x512xbf16, #tpu.memory_space<vmem>>, vector<128x512xbf16>
    %cst = arith.constant 0.000000e+00 : f32
    %4 = vector.broadcast %cst : f32 to vector<8x128xf32>
    %c0_6 = arith.constant 0 : index
    %c0_7 = arith.constant 0 : index
    %5 = vector.load %arg13[%c0_6, %c0_7] : memref<8x128xf32, #tpu.memory_space<vmem>>, vector<8x128xf32>
    tpu.vector_store %arg13[%c0_6, %c0_7], %4 {strides = array<i32>} : memref<8x128xf32, #tpu.memory_space<vmem>>, vector<8x128xf32>,
    %cst_8 = arith.constant 0.000000e+00 : f32
    %6 = vector.broadcast %cst_8 : f32 to vector<8x128xf32>
    %c0_9 = arith.constant 0 : index
    %c0_10 = arith.constant 0 : index
    %7 = vector.load %arg14[%c0_9, %c0_10] : memref<8x128xf32, #tpu.memory_space<vmem>>, vector<8x128xf32>
    tpu.vector_store %arg14[%c0_9, %c0_10], %6 {strides = array<i32>} : memref<8x128xf32, #tpu.memory_space<vmem>>, vector<8x128xf32>,
    %c0_11 = arith.constant 0 : index
    %c0_12 = arith.constant 0 : index
    %8 = vector.load %arg2[%c0_11, %c0_12] : memref<128x512xbf16, #tpu.memory_space<vmem>>, vector<128x512xbf16>
    %cst_13 = arith.constant dense<0.000000e+00> : vector<64x512xf32>
    %9 = tpu.matmul %1, %8, %cst_13 {dimension_numbers = #tpu.dot_dimension_numbers<[1], [0], [0], [1], [0, 0, 1, 1], [], []>} : vector<64x128xbf16>, vector<128x512xbf16>, vector<64x512xf32> -> vector<64x512xf32>
    %c0_14 = arith.constant 0 : index
    %c0_15 = arith.constant 0 : index
    %10 = vector.load %arg4[%c0_14, %c0_15] : memref<1x512xf32, #tpu.memory_space<vmem>>, vector<1x512xf32>
    %11 = vector.broadcast %10 : vector<1x512xf32> to vector<64x512xf32>
    %12 = arith.addf %9, %11 : vector<64x512xf32>
    %c0_16 = arith.constant 0 : index
    %c0_17 = arith.constant 0 : index
    %13 = vector.load %arg11[%c0_16, %c0_17] : memref<64x512xf32, #tpu.memory_space<vmem>>, vector<64x512xf32>
    tpu.vector_store %arg11[%c0_16, %c0_17], %12 {strides = array<i32>} : memref<64x512xf32, #tpu.memory_space<vmem>>, vector<64x512xf32>,
    %c0_i32 = arith.constant 0 : i32
    %c8_i32 = arith.constant 8 : i32
    %14 = arith.muli %c0_i32, %c8_i32 : i32
    %15 = tpu.assume_multiple %14, 8 : i32
    %16 = arith.index_cast %15 : i32 to index
    %c0_18 = arith.constant 0 : index
    %17 = vector.load %arg11[%16, %c0_18] : memref<64x512xf32, #tpu.memory_space<vmem>>, vector<8x512xf32>
    %c0_19 = arith.constant 0 : index
    %c0_20 = arith.constant 0 : index
    %18 = vector.load %arg13[%c0_19, %c0_20] : memref<8x128xf32, #tpu.memory_space<vmem>>, vector<8x128xf32>
    %19 = arith.truncf %18 : vector<8x128xf32> to vector<8x128xbf16>
    %cst_21 = arith.constant dense<0.000000e+00> : vector<8x512xf32>
    %20 = tpu.matmul %19, %2, %cst_21 {dimension_numbers = #tpu.dot_dimension_numbers<[1], [0], [0], [1], [0, 0, 1, 1], [], []>} : vector<8x128xbf16>, vector<128x512xbf16>, vector<8x512xf32> -> vector<8x512xf32>
    %21 = arith.addf %17, %20 : vector<8x512xf32>
    %c0_22 = arith.constant 0 : index
    %c0_23 = arith.constant 0 : index
    %22 = vector.load %arg14[%c0_22, %c0_23] : memref<8x128xf32, #tpu.memory_space<vmem>>, vector<8x128xf32>
    %23 = vector.extract_strided_slice %21 {offsets = [0, 0], sizes = [8, 128], strides = [1, 1]} : vector<8x512xf32> to vector<8x128xf32>
    %cst_24 = arith.constant 5.000000e-01 : f32
    %24 = vector.broadcast %cst_24 : f32 to vector<8x128xf32>
    %25 = arith.mulf %24, %23 : vector<8x128xf32>
    %26 = math.tanh %25 : vector<8x128xf32>
    %cst_25 = arith.constant 1.000000e+00 : f32
    %27 = vector.broadcast %cst_25 : f32 to vector<8x128xf32>
    %28 = arith.addf %26, %27 : vector<8x128xf32>
    %cst_26 = arith.constant 5.000000e-01 : f32
    %29 = vector.broadcast %cst_26 : f32 to vector<8x128xf32>
    %30 = arith.mulf %29, %28 : vector<8x128xf32>
    %31 = vector.extract_strided_slice %21 {offsets = [0, 128], sizes = [8, 128], strides = [1, 1]} : vector<8x512xf32> to vector<8x128xf32>
    %cst_27 = arith.constant 5.000000e-01 : f32
    %32 = vector.broadcast %cst_27 : f32 to vector<8x128xf32>
    %33 = arith.mulf %32, %31 : vector<8x128xf32>
    %34 = math.tanh %33 : vector<8x128xf32>
    %cst_28 = arith.constant 1.000000e+00 : f32
    %35 = vector.broadcast %cst_28 : f32 to vector<8x128xf32>
    %36 = arith.addf %34, %35 : vector<8x128xf32>
    %cst_29 = arith.constant 5.000000e-01 : f32
    %37 = vector.broadcast %cst_29 : f32 to vector<8x128xf32>
    %38 = arith.mulf %37, %36 : vector<8x128xf32>
    %39 = vector.extract_strided_slice %21 {offsets = [0, 256], sizes = [8, 128], strides = [1, 1]} : vector<8x512xf32> to vector<8x128xf32>
    %40 = math.tanh %39 : vector<8x128xf32>
    %41 = vector.extract_strided_slice %21 {offsets = [0, 384], sizes = [8, 128], strides = [1, 1]} : vector<8x512xf32> to vector<8x128xf32>
    %cst_30 = arith.constant 5.000000e-01 : f32
    %42 = vector.broadcast %cst_30 : f32 to vector<8x128xf32>
    %43 = arith.mulf %42, %41 : vector<8x128xf32>
    %44 = math.tanh %43 : vector<8x128xf32>
    %cst_31 = arith.constant 1.000000e+00 : f32
    %45 = vector.broadcast %cst_31 : f32 to vector<8x128xf32>
    %46 = arith.addf %44, %45 : vector<8x128xf32>
    %cst_32 = arith.constant 5.000000e-01 : f32
    %47 = vector.broadcast %cst_32 : f32 to vector<8x128xf32>
    %48 = arith.mulf %47, %46 : vector<8x128xf32>
    %49 = arith.mulf %38, %22 : vector<8x128xf32>
    %50 = arith.mulf %30, %40 : vector<8x128xf32>
    %51 = arith.addf %49, %50 : vector<8x128xf32>
    %52 = math.tanh %51 : vector<8x128xf32>
    %53 = arith.mulf %48, %52 : vector<8x128xf32>
    %c0_33 = arith.constant 0 : index
    %c0_34 = arith.constant 0 : index
    %54 = vector.load %arg13[%c0_33, %c0_34] : memref<8x128xf32, #tpu.memory_space<vmem>>, vector<8x128xf32>
    tpu.vector_store %arg13[%c0_33, %c0_34], %53 {strides = array<i32>} : memref<8x128xf32, #tpu.memory_space<vmem>>, vector<8x128xf32>,
    %c0_35 = arith.constant 0 : index
    %c0_36 = arith.constant 0 : index
    %55 = vector.load %arg14[%c0_35, %c0_36] : memref<8x128xf32, #tpu.memory_space<vmem>>, vector<8x128xf32>
    tpu.vector_store %arg14[%c0_35, %c0_36], %51 {strides = array<i32>} : memref<8x128xf32, #tpu.memory_space<vmem>>, vector<8x128xf32>,
    %56 = arith.index_cast %15 : i32 to index
    %c0_37 = arith.constant 0 : index
    %57 = vector.load %arg12[%56, %c0_37] : memref<64x128xf32, #tpu.memory_space<vmem>>, vector<8x128xf32>
    tpu.vector_store %arg12[%56, %c0_37], %53 {strides = array<i32>} : memref<64x128xf32, #tpu.memory_space<vmem>>, vector<8x128xf32>,
    %c1_i32 = arith.constant 1 : i32
    %c8_i32_38 = arith.constant 8 : i32
    %58 = arith.muli %c1_i32, %c8_i32_38 : i32
    %59 = tpu.assume_multiple %58, 8 : i32
    %60 = arith.index_cast %59 : i32 to index
    %c0_39 = arith.constant 0 : index
    %61 = vector.load %arg11[%60, %c0_39] : memref<64x512xf32, #tpu.memory_space<vmem>>, vector<8x512xf32>
    %c0_40 = arith.constant 0 : index
    %c0_41 = arith.constant 0 : index
    %62 = vector.load %arg13[%c0_40, %c0_41] : memref<8x128xf32, #tpu.memory_space<vmem>>, vector<8x128xf32>
    %63 = arith.truncf %62 : vector<8x128xf32> to vector<8x128xbf16>
    %cst_42 = arith.constant dense<0.000000e+00> : vector<8x512xf32>
    %64 = tpu.matmul %63, %2, %cst_42 {dimension_numbers = #tpu.dot_dimension_numbers<[1], [0], [0], [1], [0, 0, 1, 1], [], []>} : vector<8x128xbf16>, vector<128x512xbf16>, vector<8x512xf32> -> vector<8x512xf32>
    %65 = arith.addf %61, %64 : vector<8x512xf32>
    %c0_43 = arith.constant 0 : index
    %c0_44 = arith.constant 0 : index
    %66 = vector.load %arg14[%c0_43, %c0_44] : memref<8x128xf32, #tpu.memory_space<vmem>>, vector<8x128xf32>
    %67 = vector.extract_strided_slice %65 {offsets = [0, 0], sizes = [8, 128], strides = [1, 1]} : vector<8x512xf32> to vector<8x128xf32>
    %cst_45 = arith.constant 5.000000e-01 : f32
    %68 = vector.broadcast %cst_45 : f32 to vector<8x128xf32>
    %69 = arith.mulf %68, %67 : vector<8x128xf32>
    %70 = math.tanh %69 : vector<8x128xf32>
    %cst_46 = arith.constant 1.000000e+00 : f32
    %71 = vector.broadcast %cst_46 : f32 to vector<8x128xf32>
    %72 = arith.addf %70, %71 : vector<8x128xf32>
    %cst_47 = arith.constant 5.000000e-01 : f32
    %73 = vector.broadcast %cst_47 : f32 to vector<8x128xf32>
    %74 = arith.mulf %73, %72 : vector<8x128xf32>
    %75 = vector.extract_strided_slice %65 {offsets = [0, 128], sizes = [8, 128], strides = [1, 1]} : vector<8x512xf32> to vector<8x128xf32>
    %cst_48 = arith.constant 5.000000e-01 : f32
    %76 = vector.broadcast %cst_48 : f32 to vector<8x128xf32>
    %77 = arith.mulf %76, %75 : vector<8x128xf32>
    %78 = math.tanh %77 : vector<8x128xf32>
    %cst_49 = arith.constant 1.000000e+00 : f32
    %79 = vector.broadcast %cst_49 : f32 to vector<8x128xf32>
    %80 = arith.addf %78, %79 : vector<8x128xf32>
    %cst_50 = arith.constant 5.000000e-01 : f32
    %81 = vector.broadcast %cst_50 : f32 to vector<8x128xf32>
    %82 = arith.mulf %81, %80 : vector<8x128xf32>
    %83 = vector.extract_strided_slice %65 {offsets = [0, 256], sizes = [8, 128], strides = [1, 1]} : vector<8x512xf32> to vector<8x128xf32>
    %84 = math.tanh %83 : vector<8x128xf32>
    %85 = vector.extract_strided_slice %65 {offsets = [0, 384], sizes = [8, 128], strides = [1, 1]} : vector<8x512xf32> to vector<8x128xf32>
    %cst_51 = arith.constant 5.000000e-01 : f32
    %86 = vector.broadcast %cst_51 : f32 to vector<8x128xf32>
    %87 = arith.mulf %86, %85 : vector<8x128xf32>
    %88 = math.tanh %87 : vector<8x128xf32>
    %cst_52 = arith.constant 1.000000e+00 : f32
    %89 = vector.broadcast %cst_52 : f32 to vector<8x128xf32>
    %90 = arith.addf %88, %89 : vector<8x128xf32>
    %cst_53 = arith.constant 5.000000e-01 : f32
    %91 = vector.broadcast %cst_53 : f32 to vector<8x128xf32>
    %92 = arith.mulf %91, %90 : vector<8x128xf32>
    %93 = arith.mulf %82, %66 : vector<8x128xf32>
    %94 = arith.mulf %74, %84 : vector<8x128xf32>
    %95 = arith.addf %93, %94 : vector<8x128xf32>
    %96 = math.tanh %95 : vector<8x128xf32>
    %97 = arith.mulf %92, %96 : vector<8x128xf32>
    %c0_54 = arith.constant 0 : index
    %c0_55 = arith.constant 0 : index
    %98 = vector.load %arg13[%c0_54, %c0_55] : memref<8x128xf32, #tpu.memory_space<vmem>>, vector<8x128xf32>
    tpu.vector_store %arg13[%c0_54, %c0_55], %97 {strides = array<i32>} : memref<8x128xf32, #tpu.memory_space<vmem>>, vector<8x128xf32>,
    %c0_56 = arith.constant 0 : index
    %c0_57 = arith.constant 0 : index
    %99 = vector.load %arg14[%c0_56, %c0_57] : memref<8x128xf32, #tpu.memory_space<vmem>>, vector<8x128xf32>
    tpu.vector_store %arg14[%c0_56, %c0_57], %95 {strides = array<i32>} : memref<8x128xf32, #tpu.memory_space<vmem>>, vector<8x128xf32>,
    %100 = arith.index_cast %59 : i32 to index
    %c0_58 = arith.constant 0 : index
    %101 = vector.load %arg12[%100, %c0_58] : memref<64x128xf32, #tpu.memory_space<vmem>>, vector<8x128xf32>
    tpu.vector_store %arg12[%100, %c0_58], %97 {strides = array<i32>} : memref<64x128xf32, #tpu.memory_space<vmem>>, vector<8x128xf32>,
    %c2_i32 = arith.constant 2 : i32
    %c8_i32_59 = arith.constant 8 : i32
    %102 = arith.muli %c2_i32, %c8_i32_59 : i32
    %103 = tpu.assume_multiple %102, 8 : i32
    %104 = arith.index_cast %103 : i32 to index
    %c0_60 = arith.constant 0 : index
    %105 = vector.load %arg11[%104, %c0_60] : memref<64x512xf32, #tpu.memory_space<vmem>>, vector<8x512xf32>
    %c0_61 = arith.constant 0 : index
    %c0_62 = arith.constant 0 : index
    %106 = vector.load %arg13[%c0_61, %c0_62] : memref<8x128xf32, #tpu.memory_space<vmem>>, vector<8x128xf32>
    %107 = arith.truncf %106 : vector<8x128xf32> to vector<8x128xbf16>
    %cst_63 = arith.constant dense<0.000000e+00> : vector<8x512xf32>
    %108 = tpu.matmul %107, %2, %cst_63 {dimension_numbers = #tpu.dot_dimension_numbers<[1], [0], [0], [1], [0, 0, 1, 1], [], []>} : vector<8x128xbf16>, vector<128x512xbf16>, vector<8x512xf32> -> vector<8x512xf32>
    %109 = arith.addf %105, %108 : vector<8x512xf32>
    %c0_64 = arith.constant 0 : index
    %c0_65 = arith.constant 0 : index
    %110 = vector.load %arg14[%c0_64, %c0_65] : memref<8x128xf32, #tpu.memory_space<vmem>>, vector<8x128xf32>
    %111 = vector.extract_strided_slice %109 {offsets = [0, 0], sizes = [8, 128], strides = [1, 1]} : vector<8x512xf32> to vector<8x128xf32>
    %cst_66 = arith.constant 5.000000e-01 : f32
    %112 = vector.broadcast %cst_66 : f32 to vector<8x128xf32>
    %113 = arith.mulf %112, %111 : vector<8x128xf32>
    %114 = math.tanh %113 : vector<8x128xf32>
    %cst_67 = arith.constant 1.000000e+00 : f32
    %115 = vector.broadcast %cst_67 : f32 to vector<8x128xf32>
    %116 = arith.addf %114, %115 : vector<8x128xf32>
    %cst_68 = arith.constant 5.000000e-01 : f32
    %117 = vector.broadcast %cst_68 : f32 to vector<8x128xf32>
    %118 = arith.mulf %117, %116 : vector<8x128xf32>
    %119 = vector.extract_strided_slice %109 {offsets = [0, 128], sizes = [8, 128], strides = [1, 1]} : vector<8x512xf32> to vector<8x128xf32>
    %cst_69 = arith.constant 5.000000e-01 : f32
    %120 = vector.broadcast %cst_69 : f32 to vector<8x128xf32>
    %121 = arith.mulf %120, %119 : vector<8x128xf32>
    %122 = math.tanh %121 : vector<8x128xf32>
    %cst_70 = arith.constant 1.000000e+00 : f32
    %123 = vector.broadcast %cst_70 : f32 to vector<8x128xf32>
    %124 = arith.addf %122, %123 : vector<8x128xf32>
    %cst_71 = arith.constant 5.000000e-01 : f32
    %125 = vector.broadcast %cst_71 : f32 to vector<8x128xf32>
    %126 = arith.mulf %125, %124 : vector<8x128xf32>
    %127 = vector.extract_strided_slice %109 {offsets = [0, 256], sizes = [8, 128], strides = [1, 1]} : vector<8x512xf32> to vector<8x128xf32>
    %128 = math.tanh %127 : vector<8x128xf32>
    %129 = vector.extract_strided_slice %109 {offsets = [0, 384], sizes = [8, 128], strides = [1, 1]} : vector<8x512xf32> to vector<8x128xf32>
    %cst_72 = arith.constant 5.000000e-01 : f32
    %130 = vector.broadcast %cst_72 : f32 to vector<8x128xf32>
    %131 = arith.mulf %130, %129 : vector<8x128xf32>
    %132 = math.tanh %131 : vector<8x128xf32>
    %cst_73 = arith.constant 1.000000e+00 : f32
    %133 = vector.broadcast %cst_73 : f32 to vector<8x128xf32>
    %134 = arith.addf %132, %133 : vector<8x128xf32>
    %cst_74 = arith.constant 5.000000e-01 : f32
    %135 = vector.broadcast %cst_74 : f32 to vector<8x128xf32>
    %136 = arith.mulf %135, %134 : vector<8x128xf32>
    %137 = arith.mulf %126, %110 : vector<8x128xf32>
    %138 = arith.mulf %118, %128 : vector<8x128xf32>
    %139 = arith.addf %137, %138 : vector<8x128xf32>
    %140 = math.tanh %139 : vector<8x128xf32>
    %141 = arith.mulf %136, %140 : vector<8x128xf32>
    %c0_75 = arith.constant 0 : index
    %c0_76 = arith.constant 0 : index
    %142 = vector.load %arg13[%c0_75, %c0_76] : memref<8x128xf32, #tpu.memory_space<vmem>>, vector<8x128xf32>
    tpu.vector_store %arg13[%c0_75, %c0_76], %141 {strides = array<i32>} : memref<8x128xf32, #tpu.memory_space<vmem>>, vector<8x128xf32>,
    %c0_77 = arith.constant 0 : index
    %c0_78 = arith.constant 0 : index
    %143 = vector.load %arg14[%c0_77, %c0_78] : memref<8x128xf32, #tpu.memory_space<vmem>>, vector<8x128xf32>
    tpu.vector_store %arg14[%c0_77, %c0_78], %139 {strides = array<i32>} : memref<8x128xf32, #tpu.memory_space<vmem>>, vector<8x128xf32>,
    %144 = arith.index_cast %103 : i32 to index
    %c0_79 = arith.constant 0 : index
    %145 = vector.load %arg12[%144, %c0_79] : memref<64x128xf32, #tpu.memory_space<vmem>>, vector<8x128xf32>
    tpu.vector_store %arg12[%144, %c0_79], %141 {strides = array<i32>} : memref<64x128xf32, #tpu.memory_space<vmem>>, vector<8x128xf32>,
    %c3_i32 = arith.constant 3 : i32
    %c8_i32_80 = arith.constant 8 : i32
    %146 = arith.muli %c3_i32, %c8_i32_80 : i32
    %147 = tpu.assume_multiple %146, 8 : i32
    %148 = arith.index_cast %147 : i32 to index
    %c0_81 = arith.constant 0 : index
    %149 = vector.load %arg11[%148, %c0_81] : memref<64x512xf32, #tpu.memory_space<vmem>>, vector<8x512xf32>
    %c0_82 = arith.constant 0 : index
    %c0_83 = arith.constant 0 : index
    %150 = vector.load %arg13[%c0_82, %c0_83] : memref<8x128xf32, #tpu.memory_space<vmem>>, vector<8x128xf32>
    %151 = arith.truncf %150 : vector<8x128xf32> to vector<8x128xbf16>
    %cst_84 = arith.constant dense<0.000000e+00> : vector<8x512xf32>
    %152 = tpu.matmul %151, %2, %cst_84 {dimension_numbers = #tpu.dot_dimension_numbers<[1], [0], [0], [1], [0, 0, 1, 1], [], []>} : vector<8x128xbf16>, vector<128x512xbf16>, vector<8x512xf32> -> vector<8x512xf32>
    %153 = arith.addf %149, %152 : vector<8x512xf32>
    %c0_85 = arith.constant 0 : index
    %c0_86 = arith.constant 0 : index
    %154 = vector.load %arg14[%c0_85, %c0_86] : memref<8x128xf32, #tpu.memory_space<vmem>>, vector<8x128xf32>
    %155 = vector.extract_strided_slice %153 {offsets = [0, 0], sizes = [8, 128], strides = [1, 1]} : vector<8x512xf32> to vector<8x128xf32>
    %cst_87 = arith.constant 5.000000e-01 : f32
    %156 = vector.broadcast %cst_87 : f32 to vector<8x128xf32>
    %157 = arith.mulf %156, %155 : vector<8x128xf32>
    %158 = math.tanh %157 : vector<8x128xf32>
    %cst_88 = arith.constant 1.000000e+00 : f32
    %159 = vector.broadcast %cst_88 : f32 to vector<8x128xf32>
    %160 = arith.addf %158, %159 : vector<8x128xf32>
    %cst_89 = arith.constant 5.000000e-01 : f32
    %161 = vector.broadcast %cst_89 : f32 to vector<8x128xf32>
    %162 = arith.mulf %161, %160 : vector<8x128xf32>
    %163 = vector.extract_strided_slice %153 {offsets = [0, 128], sizes = [8, 128], strides = [1, 1]} : vector<8x512xf32> to vector<8x128xf32>
    %cst_90 = arith.constant 5.000000e-01 : f32
    %164 = vector.broadcast %cst_90 : f32 to vector<8x128xf32>
    %165 = arith.mulf %164, %163 : vector<8x128xf32>
    %166 = math.tanh %165 : vector<8x128xf32>
    %cst_91 = arith.constant 1.000000e+00 : f32
    %167 = vector.broadcast %cst_91 : f32 to vector<8x128xf32>
    %168 = arith.addf %166, %167 : vector<8x128xf32>
    %cst_92 = arith.constant 5.000000e-01 : f32
    %169 = vector.broadcast %cst_92 : f32 to vector<8x128xf32>
    %170 = arith.mulf %169, %168 : vector<8x128xf32>
    %171 = vector.extract_strided_slice %153 {offsets = [0, 256], sizes = [8, 128], strides = [1, 1]} : vector<8x512xf32> to vector<8x128xf32>
    %172 = math.tanh %171 : vector<8x128xf32>
    %173 = vector.extract_strided_slice %153 {offsets = [0, 384], sizes = [8, 128], strides = [1, 1]} : vector<8x512xf32> to vector<8x128xf32>
    %cst_93 = arith.constant 5.000000e-01 : f32
    %174 = vector.broadcast %cst_93 : f32 to vector<8x128xf32>
    %175 = arith.mulf %174, %173 : vector<8x128xf32>
    %176 = math.tanh %175 : vector<8x128xf32>
    %cst_94 = arith.constant 1.000000e+00 : f32
    %177 = vector.broadcast %cst_94 : f32 to vector<8x128xf32>
    %178 = arith.addf %176, %177 : vector<8x128xf32>
    %cst_95 = arith.constant 5.000000e-01 : f32
    %179 = vector.broadcast %cst_95 : f32 to vector<8x128xf32>
    %180 = arith.mulf %179, %178 : vector<8x128xf32>
    %181 = arith.mulf %170, %154 : vector<8x128xf32>
    %182 = arith.mulf %162, %172 : vector<8x128xf32>
    %183 = arith.addf %181, %182 : vector<8x128xf32>
    %184 = math.tanh %183 : vector<8x128xf32>
    %185 = arith.mulf %180, %184 : vector<8x128xf32>
    %c0_96 = arith.constant 0 : index
    %c0_97 = arith.constant 0 : index
    %186 = vector.load %arg13[%c0_96, %c0_97] : memref<8x128xf32, #tpu.memory_space<vmem>>, vector<8x128xf32>
    tpu.vector_store %arg13[%c0_96, %c0_97], %185 {strides = array<i32>} : memref<8x128xf32, #tpu.memory_space<vmem>>, vector<8x128xf32>,
    %c0_98 = arith.constant 0 : index
    %c0_99 = arith.constant 0 : index
    %187 = vector.load %arg14[%c0_98, %c0_99] : memref<8x128xf32, #tpu.memory_space<vmem>>, vector<8x128xf32>
    tpu.vector_store %arg14[%c0_98, %c0_99], %183 {strides = array<i32>} : memref<8x128xf32, #tpu.memory_space<vmem>>, vector<8x128xf32>,
    %188 = arith.index_cast %147 : i32 to index
    %c0_100 = arith.constant 0 : index
    %189 = vector.load %arg12[%188, %c0_100] : memref<64x128xf32, #tpu.memory_space<vmem>>, vector<8x128xf32>
    tpu.vector_store %arg12[%188, %c0_100], %185 {strides = array<i32>} : memref<64x128xf32, #tpu.memory_space<vmem>>, vector<8x128xf32>,
    %c4_i32 = arith.constant 4 : i32
    %c8_i32_101 = arith.constant 8 : i32
    %190 = arith.muli %c4_i32, %c8_i32_101 : i32
    %191 = tpu.assume_multiple %190, 8 : i32
    %192 = arith.index_cast %191 : i32 to index
    %c0_102 = arith.constant 0 : index
    %193 = vector.load %arg11[%192, %c0_102] : memref<64x512xf32, #tpu.memory_space<vmem>>, vector<8x512xf32>
    %c0_103 = arith.constant 0 : index
    %c0_104 = arith.constant 0 : index
    %194 = vector.load %arg13[%c0_103, %c0_104] : memref<8x128xf32, #tpu.memory_space<vmem>>, vector<8x128xf32>
    %195 = arith.truncf %194 : vector<8x128xf32> to vector<8x128xbf16>
    %cst_105 = arith.constant dense<0.000000e+00> : vector<8x512xf32>
    %196 = tpu.matmul %195, %2, %cst_105 {dimension_numbers = #tpu.dot_dimension_numbers<[1], [0], [0], [1], [0, 0, 1, 1], [], []>} : vector<8x128xbf16>, vector<128x512xbf16>, vector<8x512xf32> -> vector<8x512xf32>
    %197 = arith.addf %193, %196 : vector<8x512xf32>
    %c0_106 = arith.constant 0 : index
    %c0_107 = arith.constant 0 : index
    %198 = vector.load %arg14[%c0_106, %c0_107] : memref<8x128xf32, #tpu.memory_space<vmem>>, vector<8x128xf32>
    %199 = vector.extract_strided_slice %197 {offsets = [0, 0], sizes = [8, 128], strides = [1, 1]} : vector<8x512xf32> to vector<8x128xf32>
    %cst_108 = arith.constant 5.000000e-01 : f32
    %200 = vector.broadcast %cst_108 : f32 to vector<8x128xf32>
    %201 = arith.mulf %200, %199 : vector<8x128xf32>
    %202 = math.tanh %201 : vector<8x128xf32>
    %cst_109 = arith.constant 1.000000e+00 : f32
    %203 = vector.broadcast %cst_109 : f32 to vector<8x128xf32>
    %204 = arith.addf %202, %203 : vector<8x128xf32>
    %cst_110 = arith.constant 5.000000e-01 : f32
    %205 = vector.broadcast %cst_110 : f32 to vector<8x128xf32>
    %206 = arith.mulf %205, %204 : vector<8x128xf32>
    %207 = vector.extract_strided_slice %197 {offsets = [0, 128], sizes = [8, 128], strides = [1, 1]} : vector<8x512xf32> to vector<8x128xf32>
    %cst_111 = arith.constant 5.000000e-01 : f32
    %208 = vector.broadcast %cst_111 : f32 to vector<8x128xf32>
    %209 = arith.mulf %208, %207 : vector<8x128xf32>
    %210 = math.tanh %209 : vector<8x128xf32>
    %cst_112 = arith.constant 1.000000e+00 : f32
    %211 = vector.broadcast %cst_112 : f32 to vector<8x128xf32>
    %212 = arith.addf %210, %211 : vector<8x128xf32>
    %cst_113 = arith.constant 5.000000e-01 : f32
    %213 = vector.broadcast %cst_113 : f32 to vector<8x128xf32>
    %214 = arith.mulf %213, %212 : vector<8x128xf32>
    %215 = vector.extract_strided_slice %197 {offsets = [0, 256], sizes = [8, 128], strides = [1, 1]} : vector<8x512xf32> to vector<8x128xf32>
    %216 = math.tanh %215 : vector<8x128xf32>
    %217 = vector.extract_strided_slice %197 {offsets = [0, 384], sizes = [8, 128], strides = [1, 1]} : vector<8x512xf32> to vector<8x128xf32>
    %cst_114 = arith.constant 5.000000e-01 : f32
    %218 = vector.broadcast %cst_114 : f32 to vector<8x128xf32>
    %219 = arith.mulf %218, %217 : vector<8x128xf32>
    %220 = math.tanh %219 : vector<8x128xf32>
    %cst_115 = arith.constant 1.000000e+00 : f32
    %221 = vector.broadcast %cst_115 : f32 to vector<8x128xf32>
    %222 = arith.addf %220, %221 : vector<8x128xf32>
    %cst_116 = arith.constant 5.000000e-01 : f32
    %223 = vector.broadcast %cst_116 : f32 to vector<8x128xf32>
    %224 = arith.mulf %223, %222 : vector<8x128xf32>
    %225 = arith.mulf %214, %198 : vector<8x128xf32>
    %226 = arith.mulf %206, %216 : vector<8x128xf32>
    %227 = arith.addf %225, %226 : vector<8x128xf32>
    %228 = math.tanh %227 : vector<8x128xf32>
    %229 = arith.mulf %224, %228 : vector<8x128xf32>
    %c0_117 = arith.constant 0 : index
    %c0_118 = arith.constant 0 : index
    %230 = vector.load %arg13[%c0_117, %c0_118] : memref<8x128xf32, #tpu.memory_space<vmem>>, vector<8x128xf32>
    tpu.vector_store %arg13[%c0_117, %c0_118], %229 {strides = array<i32>} : memref<8x128xf32, #tpu.memory_space<vmem>>, vector<8x128xf32>,
    %c0_119 = arith.constant 0 : index
    %c0_120 = arith.constant 0 : index
    %231 = vector.load %arg14[%c0_119, %c0_120] : memref<8x128xf32, #tpu.memory_space<vmem>>, vector<8x128xf32>
    tpu.vector_store %arg14[%c0_119, %c0_120], %227 {strides = array<i32>} : memref<8x128xf32, #tpu.memory_space<vmem>>, vector<8x128xf32>,
    %232 = arith.index_cast %191 : i32 to index
    %c0_121 = arith.constant 0 : index
    %233 = vector.load %arg12[%232, %c0_121] : memref<64x128xf32, #tpu.memory_space<vmem>>, vector<8x128xf32>
    tpu.vector_store %arg12[%232, %c0_121], %229 {strides = array<i32>} : memref<64x128xf32, #tpu.memory_space<vmem>>, vector<8x128xf32>,
    %c5_i32 = arith.constant 5 : i32
    %c8_i32_122 = arith.constant 8 : i32
    %234 = arith.muli %c5_i32, %c8_i32_122 : i32
    %235 = tpu.assume_multiple %234, 8 : i32
    %236 = arith.index_cast %235 : i32 to index
    %c0_123 = arith.constant 0 : index
    %237 = vector.load %arg11[%236, %c0_123] : memref<64x512xf32, #tpu.memory_space<vmem>>, vector<8x512xf32>
    %c0_124 = arith.constant 0 : index
    %c0_125 = arith.constant 0 : index
    %238 = vector.load %arg13[%c0_124, %c0_125] : memref<8x128xf32, #tpu.memory_space<vmem>>, vector<8x128xf32>
    %239 = arith.truncf %238 : vector<8x128xf32> to vector<8x128xbf16>
    %cst_126 = arith.constant dense<0.000000e+00> : vector<8x512xf32>
    %240 = tpu.matmul %239, %2, %cst_126 {dimension_numbers = #tpu.dot_dimension_numbers<[1], [0], [0], [1], [0, 0, 1, 1], [], []>} : vector<8x128xbf16>, vector<128x512xbf16>, vector<8x512xf32> -> vector<8x512xf32>
    %241 = arith.addf %237, %240 : vector<8x512xf32>
    %c0_127 = arith.constant 0 : index
    %c0_128 = arith.constant 0 : index
    %242 = vector.load %arg14[%c0_127, %c0_128] : memref<8x128xf32, #tpu.memory_space<vmem>>, vector<8x128xf32>
    %243 = vector.extract_strided_slice %241 {offsets = [0, 0], sizes = [8, 128], strides = [1, 1]} : vector<8x512xf32> to vector<8x128xf32>
    %cst_129 = arith.constant 5.000000e-01 : f32
    %244 = vector.broadcast %cst_129 : f32 to vector<8x128xf32>
    %245 = arith.mulf %244, %243 : vector<8x128xf32>
    %246 = math.tanh %245 : vector<8x128xf32>
    %cst_130 = arith.constant 1.000000e+00 : f32
    %247 = vector.broadcast %cst_130 : f32 to vector<8x128xf32>
    %248 = arith.addf %246, %247 : vector<8x128xf32>
    %cst_131 = arith.constant 5.000000e-01 : f32
    %249 = vector.broadcast %cst_131 : f32 to vector<8x128xf32>
    %250 = arith.mulf %249, %248 : vector<8x128xf32>
    %251 = vector.extract_strided_slice %241 {offsets = [0, 128], sizes = [8, 128], strides = [1, 1]} : vector<8x512xf32> to vector<8x128xf32>
    %cst_132 = arith.constant 5.000000e-01 : f32
    %252 = vector.broadcast %cst_132 : f32 to vector<8x128xf32>
    %253 = arith.mulf %252, %251 : vector<8x128xf32>
    %254 = math.tanh %253 : vector<8x128xf32>
    %cst_133 = arith.constant 1.000000e+00 : f32
    %255 = vector.broadcast %cst_133 : f32 to vector<8x128xf32>
    %256 = arith.addf %254, %255 : vector<8x128xf32>
    %cst_134 = arith.constant 5.000000e-01 : f32
    %257 = vector.broadcast %cst_134 : f32 to vector<8x128xf32>
    %258 = arith.mulf %257, %256 : vector<8x128xf32>
    %259 = vector.extract_strided_slice %241 {offsets = [0, 256], sizes = [8, 128], strides = [1, 1]} : vector<8x512xf32> to vector<8x128xf32>
    %260 = math.tanh %259 : vector<8x128xf32>
    %261 = vector.extract_strided_slice %241 {offsets = [0, 384], sizes = [8, 128], strides = [1, 1]} : vector<8x512xf32> to vector<8x128xf32>
    %cst_135 = arith.constant 5.000000e-01 : f32
    %262 = vector.broadcast %cst_135 : f32 to vector<8x128xf32>
    %263 = arith.mulf %262, %261 : vector<8x128xf32>
    %264 = math.tanh %263 : vector<8x128xf32>
    %cst_136 = arith.constant 1.000000e+00 : f32
    %265 = vector.broadcast %cst_136 : f32 to vector<8x128xf32>
    %266 = arith.addf %264, %265 : vector<8x128xf32>
    %cst_137 = arith.constant 5.000000e-01 : f32
    %267 = vector.broadcast %cst_137 : f32 to vector<8x128xf32>
    %268 = arith.mulf %267, %266 : vector<8x128xf32>
    %269 = arith.mulf %258, %242 : vector<8x128xf32>
    %270 = arith.mulf %250, %260 : vector<8x128xf32>
    %271 = arith.addf %269, %270 : vector<8x128xf32>
    %272 = math.tanh %271 : vector<8x128xf32>
    %273 = arith.mulf %268, %272 : vector<8x128xf32>
    %c0_138 = arith.constant 0 : index
    %c0_139 = arith.constant 0 : index
    %274 = vector.load %arg13[%c0_138, %c0_139] : memref<8x128xf32, #tpu.memory_space<vmem>>, vector<8x128xf32>
    tpu.vector_store %arg13[%c0_138, %c0_139], %273 {strides = array<i32>} : memref<8x128xf32, #tpu.memory_space<vmem>>, vector<8x128xf32>,
    %c0_140 = arith.constant 0 : index
    %c0_141 = arith.constant 0 : index
    %275 = vector.load %arg14[%c0_140, %c0_141] : memref<8x128xf32, #tpu.memory_space<vmem>>, vector<8x128xf32>
    tpu.vector_store %arg14[%c0_140, %c0_141], %271 {strides = array<i32>} : memref<8x128xf32, #tpu.memory_space<vmem>>, vector<8x128xf32>,
    %276 = arith.index_cast %235 : i32 to index
    %c0_142 = arith.constant 0 : index
    %277 = vector.load %arg12[%276, %c0_142] : memref<64x128xf32, #tpu.memory_space<vmem>>, vector<8x128xf32>
    tpu.vector_store %arg12[%276, %c0_142], %273 {strides = array<i32>} : memref<64x128xf32, #tpu.memory_space<vmem>>, vector<8x128xf32>,
    %c6_i32 = arith.constant 6 : i32
    %c8_i32_143 = arith.constant 8 : i32
    %278 = arith.muli %c6_i32, %c8_i32_143 : i32
    %279 = tpu.assume_multiple %278, 8 : i32
    %280 = arith.index_cast %279 : i32 to index
    %c0_144 = arith.constant 0 : index
    %281 = vector.load %arg11[%280, %c0_144] : memref<64x512xf32, #tpu.memory_space<vmem>>, vector<8x512xf32>
    %c0_145 = arith.constant 0 : index
    %c0_146 = arith.constant 0 : index
    %282 = vector.load %arg13[%c0_145, %c0_146] : memref<8x128xf32, #tpu.memory_space<vmem>>, vector<8x128xf32>
    %283 = arith.truncf %282 : vector<8x128xf32> to vector<8x128xbf16>
    %cst_147 = arith.constant dense<0.000000e+00> : vector<8x512xf32>
    %284 = tpu.matmul %283, %2, %cst_147 {dimension_numbers = #tpu.dot_dimension_numbers<[1], [0], [0], [1], [0, 0, 1, 1], [], []>} : vector<8x128xbf16>, vector<128x512xbf16>, vector<8x512xf32> -> vector<8x512xf32>
    %285 = arith.addf %281, %284 : vector<8x512xf32>
    %c0_148 = arith.constant 0 : index
    %c0_149 = arith.constant 0 : index
    %286 = vector.load %arg14[%c0_148, %c0_149] : memref<8x128xf32, #tpu.memory_space<vmem>>, vector<8x128xf32>
    %287 = vector.extract_strided_slice %285 {offsets = [0, 0], sizes = [8, 128], strides = [1, 1]} : vector<8x512xf32> to vector<8x128xf32>
    %cst_150 = arith.constant 5.000000e-01 : f32
    %288 = vector.broadcast %cst_150 : f32 to vector<8x128xf32>
    %289 = arith.mulf %288, %287 : vector<8x128xf32>
    %290 = math.tanh %289 : vector<8x128xf32>
    %cst_151 = arith.constant 1.000000e+00 : f32
    %291 = vector.broadcast %cst_151 : f32 to vector<8x128xf32>
    %292 = arith.addf %290, %291 : vector<8x128xf32>
    %cst_152 = arith.constant 5.000000e-01 : f32
    %293 = vector.broadcast %cst_152 : f32 to vector<8x128xf32>
    %294 = arith.mulf %293, %292 : vector<8x128xf32>
    %295 = vector.extract_strided_slice %285 {offsets = [0, 128], sizes = [8, 128], strides = [1, 1]} : vector<8x512xf32> to vector<8x128xf32>
    %cst_153 = arith.constant 5.000000e-01 : f32
    %296 = vector.broadcast %cst_153 : f32 to vector<8x128xf32>
    %297 = arith.mulf %296, %295 : vector<8x128xf32>
    %298 = math.tanh %297 : vector<8x128xf32>
    %cst_154 = arith.constant 1.000000e+00 : f32
    %299 = vector.broadcast %cst_154 : f32 to vector<8x128xf32>
    %300 = arith.addf %298, %299 : vector<8x128xf32>
    %cst_155 = arith.constant 5.000000e-01 : f32
    %301 = vector.broadcast %cst_155 : f32 to vector<8x128xf32>
    %302 = arith.mulf %301, %300 : vector<8x128xf32>
    %303 = vector.extract_strided_slice %285 {offsets = [0, 256], sizes = [8, 128], strides = [1, 1]} : vector<8x512xf32> to vector<8x128xf32>
    %304 = math.tanh %303 : vector<8x128xf32>
    %305 = vector.extract_strided_slice %285 {offsets = [0, 384], sizes = [8, 128], strides = [1, 1]} : vector<8x512xf32> to vector<8x128xf32>
    %cst_156 = arith.constant 5.000000e-01 : f32
    %306 = vector.broadcast %cst_156 : f32 to vector<8x128xf32>
    %307 = arith.mulf %306, %305 : vector<8x128xf32>
    %308 = math.tanh %307 : vector<8x128xf32>
    %cst_157 = arith.constant 1.000000e+00 : f32
    %309 = vector.broadcast %cst_157 : f32 to vector<8x128xf32>
    %310 = arith.addf %308, %309 : vector<8x128xf32>
    %cst_158 = arith.constant 5.000000e-01 : f32
    %311 = vector.broadcast %cst_158 : f32 to vector<8x128xf32>
    %312 = arith.mulf %311, %310 : vector<8x128xf32>
    %313 = arith.mulf %302, %286 : vector<8x128xf32>
    %314 = arith.mulf %294, %304 : vector<8x128xf32>
    %315 = arith.addf %313, %314 : vector<8x128xf32>
    %316 = math.tanh %315 : vector<8x128xf32>
    %317 = arith.mulf %312, %316 : vector<8x128xf32>
    %c0_159 = arith.constant 0 : index
    %c0_160 = arith.constant 0 : index
    %318 = vector.load %arg13[%c0_159, %c0_160] : memref<8x128xf32, #tpu.memory_space<vmem>>, vector<8x128xf32>
    tpu.vector_store %arg13[%c0_159, %c0_160], %317 {strides = array<i32>} : memref<8x128xf32, #tpu.memory_space<vmem>>, vector<8x128xf32>,
    %c0_161 = arith.constant 0 : index
    %c0_162 = arith.constant 0 : index
    %319 = vector.load %arg14[%c0_161, %c0_162] : memref<8x128xf32, #tpu.memory_space<vmem>>, vector<8x128xf32>
    tpu.vector_store %arg14[%c0_161, %c0_162], %315 {strides = array<i32>} : memref<8x128xf32, #tpu.memory_space<vmem>>, vector<8x128xf32>,
    %320 = arith.index_cast %279 : i32 to index
    %c0_163 = arith.constant 0 : index
    %321 = vector.load %arg12[%320, %c0_163] : memref<64x128xf32, #tpu.memory_space<vmem>>, vector<8x128xf32>
    tpu.vector_store %arg12[%320, %c0_163], %317 {strides = array<i32>} : memref<64x128xf32, #tpu.memory_space<vmem>>, vector<8x128xf32>,
    %c7_i32 = arith.constant 7 : i32
    %c8_i32_164 = arith.constant 8 : i32
    %322 = arith.muli %c7_i32, %c8_i32_164 : i32
    %323 = tpu.assume_multiple %322, 8 : i32
    %324 = arith.index_cast %323 : i32 to index
    %c0_165 = arith.constant 0 : index
    %325 = vector.load %arg11[%324, %c0_165] : memref<64x512xf32, #tpu.memory_space<vmem>>, vector<8x512xf32>
    %c0_166 = arith.constant 0 : index
    %c0_167 = arith.constant 0 : index
    %326 = vector.load %arg13[%c0_166, %c0_167] : memref<8x128xf32, #tpu.memory_space<vmem>>, vector<8x128xf32>
    %327 = arith.truncf %326 : vector<8x128xf32> to vector<8x128xbf16>
    %cst_168 = arith.constant dense<0.000000e+00> : vector<8x512xf32>
    %328 = tpu.matmul %327, %2, %cst_168 {dimension_numbers = #tpu.dot_dimension_numbers<[1], [0], [0], [1], [0, 0, 1, 1], [], []>} : vector<8x128xbf16>, vector<128x512xbf16>, vector<8x512xf32> -> vector<8x512xf32>
    %329 = arith.addf %325, %328 : vector<8x512xf32>
    %c0_169 = arith.constant 0 : index
    %c0_170 = arith.constant 0 : index
    %330 = vector.load %arg14[%c0_169, %c0_170] : memref<8x128xf32, #tpu.memory_space<vmem>>, vector<8x128xf32>
    %331 = vector.extract_strided_slice %329 {offsets = [0, 0], sizes = [8, 128], strides = [1, 1]} : vector<8x512xf32> to vector<8x128xf32>
    %cst_171 = arith.constant 5.000000e-01 : f32
    %332 = vector.broadcast %cst_171 : f32 to vector<8x128xf32>
    %333 = arith.mulf %332, %331 : vector<8x128xf32>
    %334 = math.tanh %333 : vector<8x128xf32>
    %cst_172 = arith.constant 1.000000e+00 : f32
    %335 = vector.broadcast %cst_172 : f32 to vector<8x128xf32>
    %336 = arith.addf %334, %335 : vector<8x128xf32>
    %cst_173 = arith.constant 5.000000e-01 : f32
    %337 = vector.broadcast %cst_173 : f32 to vector<8x128xf32>
    %338 = arith.mulf %337, %336 : vector<8x128xf32>
    %339 = vector.extract_strided_slice %329 {offsets = [0, 128], sizes = [8, 128], strides = [1, 1]} : vector<8x512xf32> to vector<8x128xf32>
    %cst_174 = arith.constant 5.000000e-01 : f32
    %340 = vector.broadcast %cst_174 : f32 to vector<8x128xf32>
    %341 = arith.mulf %340, %339 : vector<8x128xf32>
    %342 = math.tanh %341 : vector<8x128xf32>
    %cst_175 = arith.constant 1.000000e+00 : f32
    %343 = vector.broadcast %cst_175 : f32 to vector<8x128xf32>
    %344 = arith.addf %342, %343 : vector<8x128xf32>
    %cst_176 = arith.constant 5.000000e-01 : f32
    %345 = vector.broadcast %cst_176 : f32 to vector<8x128xf32>
    %346 = arith.mulf %345, %344 : vector<8x128xf32>
    %347 = vector.extract_strided_slice %329 {offsets = [0, 256], sizes = [8, 128], strides = [1, 1]} : vector<8x512xf32> to vector<8x128xf32>
    %348 = math.tanh %347 : vector<8x128xf32>
    %349 = vector.extract_strided_slice %329 {offsets = [0, 384], sizes = [8, 128], strides = [1, 1]} : vector<8x512xf32> to vector<8x128xf32>
    %cst_177 = arith.constant 5.000000e-01 : f32
    %350 = vector.broadcast %cst_177 : f32 to vector<8x128xf32>
    %351 = arith.mulf %350, %349 : vector<8x128xf32>
    %352 = math.tanh %351 : vector<8x128xf32>
    %cst_178 = arith.constant 1.000000e+00 : f32
    %353 = vector.broadcast %cst_178 : f32 to vector<8x128xf32>
    %354 = arith.addf %352, %353 : vector<8x128xf32>
    %cst_179 = arith.constant 5.000000e-01 : f32
    %355 = vector.broadcast %cst_179 : f32 to vector<8x128xf32>
    %356 = arith.mulf %355, %354 : vector<8x128xf32>
    %357 = arith.mulf %346, %330 : vector<8x128xf32>
    %358 = arith.mulf %338, %348 : vector<8x128xf32>
    %359 = arith.addf %357, %358 : vector<8x128xf32>
    %360 = math.tanh %359 : vector<8x128xf32>
    %361 = arith.mulf %356, %360 : vector<8x128xf32>
    %c0_180 = arith.constant 0 : index
    %c0_181 = arith.constant 0 : index
    %362 = vector.load %arg13[%c0_180, %c0_181] : memref<8x128xf32, #tpu.memory_space<vmem>>, vector<8x128xf32>
    tpu.vector_store %arg13[%c0_180, %c0_181], %361 {strides = array<i32>} : memref<8x128xf32, #tpu.memory_space<vmem>>, vector<8x128xf32>,
    %c0_182 = arith.constant 0 : index
    %c0_183 = arith.constant 0 : index
    %363 = vector.load %arg14[%c0_182, %c0_183] : memref<8x128xf32, #tpu.memory_space<vmem>>, vector<8x128xf32>
    tpu.vector_store %arg14[%c0_182, %c0_183], %359 {strides = array<i32>} : memref<8x128xf32, #tpu.memory_space<vmem>>, vector<8x128xf32>,
    %364 = arith.index_cast %323 : i32 to index
    %c0_184 = arith.constant 0 : index
    %365 = vector.load %arg12[%364, %c0_184] : memref<64x128xf32, #tpu.memory_space<vmem>>, vector<8x128xf32>
    tpu.vector_store %arg12[%364, %c0_184], %361 {strides = array<i32>} : memref<64x128xf32, #tpu.memory_space<vmem>>, vector<8x128xf32>,
    %c8_i32_185 = arith.constant 8 : i32
    %c0_186 = arith.constant 0 : index
    %c0_187 = arith.constant 0 : index
    %366 = vector.load %arg5[%c0_186, %c0_187] : memref<128x512xbf16, #tpu.memory_space<vmem>>, vector<128x512xbf16>
    %cst_188 = arith.constant dense<0.000000e+00> : vector<64x512xf32>
    %367 = tpu.matmul %1, %366, %cst_188 {dimension_numbers = #tpu.dot_dimension_numbers<[1], [0], [0], [1], [0, 0, 1, 1], [], []>} : vector<64x128xbf16>, vector<128x512xbf16>, vector<64x512xf32> -> vector<64x512xf32>
    %c0_189 = arith.constant 0 : index
    %c0_190 = arith.constant 0 : index
    %368 = vector.load %arg7[%c0_189, %c0_190] : memref<1x512xf32, #tpu.memory_space<vmem>>, vector<1x512xf32>
    %369 = vector.broadcast %368 : vector<1x512xf32> to vector<64x512xf32>
    %370 = arith.addf %367, %369 : vector<64x512xf32>
    %c0_191 = arith.constant 0 : index
    %c0_192 = arith.constant 0 : index
    %371 = vector.load %arg11[%c0_191, %c0_192] : memref<64x512xf32, #tpu.memory_space<vmem>>, vector<64x512xf32>
    tpu.vector_store %arg11[%c0_191, %c0_192], %370 {strides = array<i32>} : memref<64x512xf32, #tpu.memory_space<vmem>>, vector<64x512xf32>,
    %c0_i32_193 = arith.constant 0 : i32
    %c8_i32_194 = arith.constant 8 : i32
    %372 = arith.muli %c0_i32_193, %c8_i32_194 : i32
    %373 = tpu.assume_multiple %372, 8 : i32
    %374 = arith.index_cast %373 : i32 to index
    %c0_195 = arith.constant 0 : index
    %375 = vector.load %arg11[%374, %c0_195] : memref<64x512xf32, #tpu.memory_space<vmem>>, vector<8x512xf32>
    %c0_196 = arith.constant 0 : index
    %c0_197 = arith.constant 0 : index
    %376 = vector.load %arg13[%c0_196, %c0_197] : memref<8x128xf32, #tpu.memory_space<vmem>>, vector<8x128xf32>
    %377 = arith.truncf %376 : vector<8x128xf32> to vector<8x128xbf16>
    %cst_198 = arith.constant dense<0.000000e+00> : vector<8x512xf32>
    %378 = tpu.matmul %377, %3, %cst_198 {dimension_numbers = #tpu.dot_dimension_numbers<[1], [0], [0], [1], [0, 0, 1, 1], [], []>} : vector<8x128xbf16>, vector<128x512xbf16>, vector<8x512xf32> -> vector<8x512xf32>
    %379 = arith.addf %375, %378 : vector<8x512xf32>
    %c0_199 = arith.constant 0 : index
    %c0_200 = arith.constant 0 : index
    %380 = vector.load %arg14[%c0_199, %c0_200] : memref<8x128xf32, #tpu.memory_space<vmem>>, vector<8x128xf32>
    %381 = vector.extract_strided_slice %379 {offsets = [0, 0], sizes = [8, 128], strides = [1, 1]} : vector<8x512xf32> to vector<8x128xf32>
    %cst_201 = arith.constant 5.000000e-01 : f32
    %382 = vector.broadcast %cst_201 : f32 to vector<8x128xf32>
    %383 = arith.mulf %382, %381 : vector<8x128xf32>
    %384 = math.tanh %383 : vector<8x128xf32>
    %cst_202 = arith.constant 1.000000e+00 : f32
    %385 = vector.broadcast %cst_202 : f32 to vector<8x128xf32>
    %386 = arith.addf %384, %385 : vector<8x128xf32>
    %cst_203 = arith.constant 5.000000e-01 : f32
    %387 = vector.broadcast %cst_203 : f32 to vector<8x128xf32>
    %388 = arith.mulf %387, %386 : vector<8x128xf32>
    %389 = vector.extract_strided_slice %379 {offsets = [0, 128], sizes = [8, 128], strides = [1, 1]} : vector<8x512xf32> to vector<8x128xf32>
    %cst_204 = arith.constant 5.000000e-01 : f32
    %390 = vector.broadcast %cst_204 : f32 to vector<8x128xf32>
    %391 = arith.mulf %390, %389 : vector<8x128xf32>
    %392 = math.tanh %391 : vector<8x128xf32>
    %cst_205 = arith.constant 1.000000e+00 : f32
    %393 = vector.broadcast %cst_205 : f32 to vector<8x128xf32>
    %394 = arith.addf %392, %393 : vector<8x128xf32>
    %cst_206 = arith.constant 5.000000e-01 : f32
    %395 = vector.broadcast %cst_206 : f32 to vector<8x128xf32>
    %396 = arith.mulf %395, %394 : vector<8x128xf32>
    %397 = vector.extract_strided_slice %379 {offsets = [0, 256], sizes = [8, 128], strides = [1, 1]} : vector<8x512xf32> to vector<8x128xf32>
    %398 = math.tanh %397 : vector<8x128xf32>
    %399 = vector.extract_strided_slice %379 {offsets = [0, 384], sizes = [8, 128], strides = [1, 1]} : vector<8x512xf32> to vector<8x128xf32>
    %cst_207 = arith.constant 5.000000e-01 : f32
    %400 = vector.broadcast %cst_207 : f32 to vector<8x128xf32>
    %401 = arith.mulf %400, %399 : vector<8x128xf32>
    %402 = math.tanh %401 : vector<8x128xf32>
    %cst_208 = arith.constant 1.000000e+00 : f32
    %403 = vector.broadcast %cst_208 : f32 to vector<8x128xf32>
    %404 = arith.addf %402, %403 : vector<8x128xf32>
    %cst_209 = arith.constant 5.000000e-01 : f32
    %405 = vector.broadcast %cst_209 : f32 to vector<8x128xf32>
    %406 = arith.mulf %405, %404 : vector<8x128xf32>
    %407 = arith.mulf %396, %380 : vector<8x128xf32>
    %408 = arith.mulf %388, %398 : vector<8x128xf32>
    %409 = arith.addf %407, %408 : vector<8x128xf32>
    %410 = math.tanh %409 : vector<8x128xf32>
    %411 = arith.mulf %406, %410 : vector<8x128xf32>
    %c0_210 = arith.constant 0 : index
    %c0_211 = arith.constant 0 : index
    %412 = vector.load %arg13[%c0_210, %c0_211] : memref<8x128xf32, #tpu.memory_space<vmem>>, vector<8x128xf32>
    tpu.vector_store %arg13[%c0_210, %c0_211], %411 {strides = array<i32>} : memref<8x128xf32, #tpu.memory_space<vmem>>, vector<8x128xf32>,
    %c0_212 = arith.constant 0 : index
    %c0_213 = arith.constant 0 : index
    %413 = vector.load %arg14[%c0_212, %c0_213] : memref<8x128xf32, #tpu.memory_space<vmem>>, vector<8x128xf32>
    tpu.vector_store %arg14[%c0_212, %c0_213], %409 {strides = array<i32>} : memref<8x128xf32, #tpu.memory_space<vmem>>, vector<8x128xf32>,
    %414 = arith.index_cast %373 : i32 to index
    %c0_214 = arith.constant 0 : index
    %415 = vector.load %arg12[%414, %c0_214] : memref<64x128xf32, #tpu.memory_space<vmem>>, vector<8x128xf32>
    tpu.vector_store %arg12[%414, %c0_214], %411 {strides = array<i32>} : memref<64x128xf32, #tpu.memory_space<vmem>>, vector<8x128xf32>,
    %c1_i32_215 = arith.constant 1 : i32
    %c8_i32_216 = arith.constant 8 : i32
    %416 = arith.muli %c1_i32_215, %c8_i32_216 : i32
    %417 = tpu.assume_multiple %416, 8 : i32
    %418 = arith.index_cast %417 : i32 to index
    %c0_217 = arith.constant 0 : index
    %419 = vector.load %arg11[%418, %c0_217] : memref<64x512xf32, #tpu.memory_space<vmem>>, vector<8x512xf32>
    %c0_218 = arith.constant 0 : index
    %c0_219 = arith.constant 0 : index
    %420 = vector.load %arg13[%c0_218, %c0_219] : memref<8x128xf32, #tpu.memory_space<vmem>>, vector<8x128xf32>
    %421 = arith.truncf %420 : vector<8x128xf32> to vector<8x128xbf16>
    %cst_220 = arith.constant dense<0.000000e+00> : vector<8x512xf32>
    %422 = tpu.matmul %421, %3, %cst_220 {dimension_numbers = #tpu.dot_dimension_numbers<[1], [0], [0], [1], [0, 0, 1, 1], [], []>} : vector<8x128xbf16>, vector<128x512xbf16>, vector<8x512xf32> -> vector<8x512xf32>
    %423 = arith.addf %419, %422 : vector<8x512xf32>
    %c0_221 = arith.constant 0 : index
    %c0_222 = arith.constant 0 : index
    %424 = vector.load %arg14[%c0_221, %c0_222] : memref<8x128xf32, #tpu.memory_space<vmem>>, vector<8x128xf32>
    %425 = vector.extract_strided_slice %423 {offsets = [0, 0], sizes = [8, 128], strides = [1, 1]} : vector<8x512xf32> to vector<8x128xf32>
    %cst_223 = arith.constant 5.000000e-01 : f32
    %426 = vector.broadcast %cst_223 : f32 to vector<8x128xf32>
    %427 = arith.mulf %426, %425 : vector<8x128xf32>
    %428 = math.tanh %427 : vector<8x128xf32>
    %cst_224 = arith.constant 1.000000e+00 : f32
    %429 = vector.broadcast %cst_224 : f32 to vector<8x128xf32>
    %430 = arith.addf %428, %429 : vector<8x128xf32>
    %cst_225 = arith.constant 5.000000e-01 : f32
    %431 = vector.broadcast %cst_225 : f32 to vector<8x128xf32>
    %432 = arith.mulf %431, %430 : vector<8x128xf32>
    %433 = vector.extract_strided_slice %423 {offsets = [0, 128], sizes = [8, 128], strides = [1, 1]} : vector<8x512xf32> to vector<8x128xf32>
    %cst_226 = arith.constant 5.000000e-01 : f32
    %434 = vector.broadcast %cst_226 : f32 to vector<8x128xf32>
    %435 = arith.mulf %434, %433 : vector<8x128xf32>
    %436 = math.tanh %435 : vector<8x128xf32>
    %cst_227 = arith.constant 1.000000e+00 : f32
    %437 = vector.broadcast %cst_227 : f32 to vector<8x128xf32>
    %438 = arith.addf %436, %437 : vector<8x128xf32>
    %cst_228 = arith.constant 5.000000e-01 : f32
    %439 = vector.broadcast %cst_228 : f32 to vector<8x128xf32>
    %440 = arith.mulf %439, %438 : vector<8x128xf32>
    %441 = vector.extract_strided_slice %423 {offsets = [0, 256], sizes = [8, 128], strides = [1, 1]} : vector<8x512xf32> to vector<8x128xf32>
    %442 = math.tanh %441 : vector<8x128xf32>
    %443 = vector.extract_strided_slice %423 {offsets = [0, 384], sizes = [8, 128], strides = [1, 1]} : vector<8x512xf32> to vector<8x128xf32>
    %cst_229 = arith.constant 5.000000e-01 : f32
    %444 = vector.broadcast %cst_229 : f32 to vector<8x128xf32>
    %445 = arith.mulf %444, %443 : vector<8x128xf32>
    %446 = math.tanh %445 : vector<8x128xf32>
    %cst_230 = arith.constant 1.000000e+00 : f32
    %447 = vector.broadcast %cst_230 : f32 to vector<8x128xf32>
    %448 = arith.addf %446, %447 : vector<8x128xf32>
    %cst_231 = arith.constant 5.000000e-01 : f32
    %449 = vector.broadcast %cst_231 : f32 to vector<8x128xf32>
    %450 = arith.mulf %449, %448 : vector<8x128xf32>
    %451 = arith.mulf %440, %424 : vector<8x128xf32>
    %452 = arith.mulf %432, %442 : vector<8x128xf32>
    %453 = arith.addf %451, %452 : vector<8x128xf32>
    %454 = math.tanh %453 : vector<8x128xf32>
    %455 = arith.mulf %450, %454 : vector<8x128xf32>
    %c0_232 = arith.constant 0 : index
    %c0_233 = arith.constant 0 : index
    %456 = vector.load %arg13[%c0_232, %c0_233] : memref<8x128xf32, #tpu.memory_space<vmem>>, vector<8x128xf32>
    tpu.vector_store %arg13[%c0_232, %c0_233], %455 {strides = array<i32>} : memref<8x128xf32, #tpu.memory_space<vmem>>, vector<8x128xf32>,
    %c0_234 = arith.constant 0 : index
    %c0_235 = arith.constant 0 : index
    %457 = vector.load %arg14[%c0_234, %c0_235] : memref<8x128xf32, #tpu.memory_space<vmem>>, vector<8x128xf32>
    tpu.vector_store %arg14[%c0_234, %c0_235], %453 {strides = array<i32>} : memref<8x128xf32, #tpu.memory_space<vmem>>, vector<8x128xf32>,
    %458 = arith.index_cast %417 : i32 to index
    %c0_236 = arith.constant 0 : index
    %459 = vector.load %arg12[%458, %c0_236] : memref<64x128xf32, #tpu.memory_space<vmem>>, vector<8x128xf32>
    tpu.vector_store %arg12[%458, %c0_236], %455 {strides = array<i32>} : memref<64x128xf32, #tpu.memory_space<vmem>>, vector<8x128xf32>,
    %c2_i32_237 = arith.constant 2 : i32
    %c8_i32_238 = arith.constant 8 : i32
    %460 = arith.muli %c2_i32_237, %c8_i32_238 : i32
    %461 = tpu.assume_multiple %460, 8 : i32
    %462 = arith.index_cast %461 : i32 to index
    %c0_239 = arith.constant 0 : index
    %463 = vector.load %arg11[%462, %c0_239] : memref<64x512xf32, #tpu.memory_space<vmem>>, vector<8x512xf32>
    %c0_240 = arith.constant 0 : index
    %c0_241 = arith.constant 0 : index
    %464 = vector.load %arg13[%c0_240, %c0_241] : memref<8x128xf32, #tpu.memory_space<vmem>>, vector<8x128xf32>
    %465 = arith.truncf %464 : vector<8x128xf32> to vector<8x128xbf16>
    %cst_242 = arith.constant dense<0.000000e+00> : vector<8x512xf32>
    %466 = tpu.matmul %465, %3, %cst_242 {dimension_numbers = #tpu.dot_dimension_numbers<[1], [0], [0], [1], [0, 0, 1, 1], [], []>} : vector<8x128xbf16>, vector<128x512xbf16>, vector<8x512xf32> -> vector<8x512xf32>
    %467 = arith.addf %463, %466 : vector<8x512xf32>
    %c0_243 = arith.constant 0 : index
    %c0_244 = arith.constant 0 : index
    %468 = vector.load %arg14[%c0_243, %c0_244] : memref<8x128xf32, #tpu.memory_space<vmem>>, vector<8x128xf32>
    %469 = vector.extract_strided_slice %467 {offsets = [0, 0], sizes = [8, 128], strides = [1, 1]} : vector<8x512xf32> to vector<8x128xf32>
    %cst_245 = arith.constant 5.000000e-01 : f32
    %470 = vector.broadcast %cst_245 : f32 to vector<8x128xf32>
    %471 = arith.mulf %470, %469 : vector<8x128xf32>
    %472 = math.tanh %471 : vector<8x128xf32>
    %cst_246 = arith.constant 1.000000e+00 : f32
    %473 = vector.broadcast %cst_246 : f32 to vector<8x128xf32>
    %474 = arith.addf %472, %473 : vector<8x128xf32>
    %cst_247 = arith.constant 5.000000e-01 : f32
    %475 = vector.broadcast %cst_247 : f32 to vector<8x128xf32>
    %476 = arith.mulf %475, %474 : vector<8x128xf32>
    %477 = vector.extract_strided_slice %467 {offsets = [0, 128], sizes = [8, 128], strides = [1, 1]} : vector<8x512xf32> to vector<8x128xf32>
    %cst_248 = arith.constant 5.000000e-01 : f32
    %478 = vector.broadcast %cst_248 : f32 to vector<8x128xf32>
    %479 = arith.mulf %478, %477 : vector<8x128xf32>
    %480 = math.tanh %479 : vector<8x128xf32>
    %cst_249 = arith.constant 1.000000e+00 : f32
    %481 = vector.broadcast %cst_249 : f32 to vector<8x128xf32>
    %482 = arith.addf %480, %481 : vector<8x128xf32>
    %cst_250 = arith.constant 5.000000e-01 : f32
    %483 = vector.broadcast %cst_250 : f32 to vector<8x128xf32>
    %484 = arith.mulf %483, %482 : vector<8x128xf32>
    %485 = vector.extract_strided_slice %467 {offsets = [0, 256], sizes = [8, 128], strides = [1, 1]} : vector<8x512xf32> to vector<8x128xf32>
    %486 = math.tanh %485 : vector<8x128xf32>
    %487 = vector.extract_strided_slice %467 {offsets = [0, 384], sizes = [8, 128], strides = [1, 1]} : vector<8x512xf32> to vector<8x128xf32>
    %cst_251 = arith.constant 5.000000e-01 : f32
    %488 = vector.broadcast %cst_251 : f32 to vector<8x128xf32>
    %489 = arith.mulf %488, %487 : vector<8x128xf32>
    %490 = math.tanh %489 : vector<8x128xf32>
    %cst_252 = arith.constant 1.000000e+00 : f32
    %491 = vector.broadcast %cst_252 : f32 to vector<8x128xf32>
    %492 = arith.addf %490, %491 : vector<8x128xf32>
    %cst_253 = arith.constant 5.000000e-01 : f32
    %493 = vector.broadcast %cst_253 : f32 to vector<8x128xf32>
    %494 = arith.mulf %493, %492 : vector<8x128xf32>
    %495 = arith.mulf %484, %468 : vector<8x128xf32>
    %496 = arith.mulf %476, %486 : vector<8x128xf32>
    %497 = arith.addf %495, %496 : vector<8x128xf32>
    %498 = math.tanh %497 : vector<8x128xf32>
    %499 = arith.mulf %494, %498 : vector<8x128xf32>
    %c0_254 = arith.constant 0 : index
    %c0_255 = arith.constant 0 : index
    %500 = vector.load %arg13[%c0_254, %c0_255] : memref<8x128xf32, #tpu.memory_space<vmem>>, vector<8x128xf32>
    tpu.vector_store %arg13[%c0_254, %c0_255], %499 {strides = array<i32>} : memref<8x128xf32, #tpu.memory_space<vmem>>, vector<8x128xf32>,
    %c0_256 = arith.constant 0 : index
    %c0_257 = arith.constant 0 : index
    %501 = vector.load %arg14[%c0_256, %c0_257] : memref<8x128xf32, #tpu.memory_space<vmem>>, vector<8x128xf32>
    tpu.vector_store %arg14[%c0_256, %c0_257], %497 {strides = array<i32>} : memref<8x128xf32, #tpu.memory_space<vmem>>, vector<8x128xf32>,
    %502 = arith.index_cast %461 : i32 to index
    %c0_258 = arith.constant 0 : index
    %503 = vector.load %arg12[%502, %c0_258] : memref<64x128xf32, #tpu.memory_space<vmem>>, vector<8x128xf32>
    tpu.vector_store %arg12[%502, %c0_258], %499 {strides = array<i32>} : memref<64x128xf32, #tpu.memory_space<vmem>>, vector<8x128xf32>,
    %c3_i32_259 = arith.constant 3 : i32
    %c8_i32_260 = arith.constant 8 : i32
    %504 = arith.muli %c3_i32_259, %c8_i32_260 : i32
    %505 = tpu.assume_multiple %504, 8 : i32
    %506 = arith.index_cast %505 : i32 to index
    %c0_261 = arith.constant 0 : index
    %507 = vector.load %arg11[%506, %c0_261] : memref<64x512xf32, #tpu.memory_space<vmem>>, vector<8x512xf32>
    %c0_262 = arith.constant 0 : index
    %c0_263 = arith.constant 0 : index
    %508 = vector.load %arg13[%c0_262, %c0_263] : memref<8x128xf32, #tpu.memory_space<vmem>>, vector<8x128xf32>
    %509 = arith.truncf %508 : vector<8x128xf32> to vector<8x128xbf16>
    %cst_264 = arith.constant dense<0.000000e+00> : vector<8x512xf32>
    %510 = tpu.matmul %509, %3, %cst_264 {dimension_numbers = #tpu.dot_dimension_numbers<[1], [0], [0], [1], [0, 0, 1, 1], [], []>} : vector<8x128xbf16>, vector<128x512xbf16>, vector<8x512xf32> -> vector<8x512xf32>
    %511 = arith.addf %507, %510 : vector<8x512xf32>
    %c0_265 = arith.constant 0 : index
    %c0_266 = arith.constant 0 : index
    %512 = vector.load %arg14[%c0_265, %c0_266] : memref<8x128xf32, #tpu.memory_space<vmem>>, vector<8x128xf32>
    %513 = vector.extract_strided_slice %511 {offsets = [0, 0], sizes = [8, 128], strides = [1, 1]} : vector<8x512xf32> to vector<8x128xf32>
    %cst_267 = arith.constant 5.000000e-01 : f32
    %514 = vector.broadcast %cst_267 : f32 to vector<8x128xf32>
    %515 = arith.mulf %514, %513 : vector<8x128xf32>
    %516 = math.tanh %515 : vector<8x128xf32>
    %cst_268 = arith.constant 1.000000e+00 : f32
    %517 = vector.broadcast %cst_268 : f32 to vector<8x128xf32>
    %518 = arith.addf %516, %517 : vector<8x128xf32>
    %cst_269 = arith.constant 5.000000e-01 : f32
    %519 = vector.broadcast %cst_269 : f32 to vector<8x128xf32>
    %520 = arith.mulf %519, %518 : vector<8x128xf32>
    %521 = vector.extract_strided_slice %511 {offsets = [0, 128], sizes = [8, 128], strides = [1, 1]} : vector<8x512xf32> to vector<8x128xf32>
    %cst_270 = arith.constant 5.000000e-01 : f32
    %522 = vector.broadcast %cst_270 : f32 to vector<8x128xf32>
    %523 = arith.mulf %522, %521 : vector<8x128xf32>
    %524 = math.tanh %523 : vector<8x128xf32>
    %cst_271 = arith.constant 1.000000e+00 : f32
    %525 = vector.broadcast %cst_271 : f32 to vector<8x128xf32>
    %526 = arith.addf %524, %525 : vector<8x128xf32>
    %cst_272 = arith.constant 5.000000e-01 : f32
    %527 = vector.broadcast %cst_272 : f32 to vector<8x128xf32>
    %528 = arith.mulf %527, %526 : vector<8x128xf32>
    %529 = vector.extract_strided_slice %511 {offsets = [0, 256], sizes = [8, 128], strides = [1, 1]} : vector<8x512xf32> to vector<8x128xf32>
    %530 = math.tanh %529 : vector<8x128xf32>
    %531 = vector.extract_strided_slice %511 {offsets = [0, 384], sizes = [8, 128], strides = [1, 1]} : vector<8x512xf32> to vector<8x128xf32>
    %cst_273 = arith.constant 5.000000e-01 : f32
    %532 = vector.broadcast %cst_273 : f32 to vector<8x128xf32>
    %533 = arith.mulf %532, %531 : vector<8x128xf32>
    %534 = math.tanh %533 : vector<8x128xf32>
    %cst_274 = arith.constant 1.000000e+00 : f32
    %535 = vector.broadcast %cst_274 : f32 to vector<8x128xf32>
    %536 = arith.addf %534, %535 : vector<8x128xf32>
    %cst_275 = arith.constant 5.000000e-01 : f32
    %537 = vector.broadcast %cst_275 : f32 to vector<8x128xf32>
    %538 = arith.mulf %537, %536 : vector<8x128xf32>
    %539 = arith.mulf %528, %512 : vector<8x128xf32>
    %540 = arith.mulf %520, %530 : vector<8x128xf32>
    %541 = arith.addf %539, %540 : vector<8x128xf32>
    %542 = math.tanh %541 : vector<8x128xf32>
    %543 = arith.mulf %538, %542 : vector<8x128xf32>
    %c0_276 = arith.constant 0 : index
    %c0_277 = arith.constant 0 : index
    %544 = vector.load %arg13[%c0_276, %c0_277] : memref<8x128xf32, #tpu.memory_space<vmem>>, vector<8x128xf32>
    tpu.vector_store %arg13[%c0_276, %c0_277], %543 {strides = array<i32>} : memref<8x128xf32, #tpu.memory_space<vmem>>, vector<8x128xf32>,
    %c0_278 = arith.constant 0 : index
    %c0_279 = arith.constant 0 : index
    %545 = vector.load %arg14[%c0_278, %c0_279] : memref<8x128xf32, #tpu.memory_space<vmem>>, vector<8x128xf32>
    tpu.vector_store %arg14[%c0_278, %c0_279], %541 {strides = array<i32>} : memref<8x128xf32, #tpu.memory_space<vmem>>, vector<8x128xf32>,
    %546 = arith.index_cast %505 : i32 to index
    %c0_280 = arith.constant 0 : index
    %547 = vector.load %arg12[%546, %c0_280] : memref<64x128xf32, #tpu.memory_space<vmem>>, vector<8x128xf32>
    tpu.vector_store %arg12[%546, %c0_280], %543 {strides = array<i32>} : memref<64x128xf32, #tpu.memory_space<vmem>>, vector<8x128xf32>,
    %c4_i32_281 = arith.constant 4 : i32
    %c8_i32_282 = arith.constant 8 : i32
    %548 = arith.muli %c4_i32_281, %c8_i32_282 : i32
    %549 = tpu.assume_multiple %548, 8 : i32
    %550 = arith.index_cast %549 : i32 to index
    %c0_283 = arith.constant 0 : index
    %551 = vector.load %arg11[%550, %c0_283] : memref<64x512xf32, #tpu.memory_space<vmem>>, vector<8x512xf32>
    %c0_284 = arith.constant 0 : index
    %c0_285 = arith.constant 0 : index
    %552 = vector.load %arg13[%c0_284, %c0_285] : memref<8x128xf32, #tpu.memory_space<vmem>>, vector<8x128xf32>
    %553 = arith.truncf %552 : vector<8x128xf32> to vector<8x128xbf16>
    %cst_286 = arith.constant dense<0.000000e+00> : vector<8x512xf32>
    %554 = tpu.matmul %553, %3, %cst_286 {dimension_numbers = #tpu.dot_dimension_numbers<[1], [0], [0], [1], [0, 0, 1, 1], [], []>} : vector<8x128xbf16>, vector<128x512xbf16>, vector<8x512xf32> -> vector<8x512xf32>
    %555 = arith.addf %551, %554 : vector<8x512xf32>
    %c0_287 = arith.constant 0 : index
    %c0_288 = arith.constant 0 : index
    %556 = vector.load %arg14[%c0_287, %c0_288] : memref<8x128xf32, #tpu.memory_space<vmem>>, vector<8x128xf32>
    %557 = vector.extract_strided_slice %555 {offsets = [0, 0], sizes = [8, 128], strides = [1, 1]} : vector<8x512xf32> to vector<8x128xf32>
    %cst_289 = arith.constant 5.000000e-01 : f32
    %558 = vector.broadcast %cst_289 : f32 to vector<8x128xf32>
    %559 = arith.mulf %558, %557 : vector<8x128xf32>
    %560 = math.tanh %559 : vector<8x128xf32>
    %cst_290 = arith.constant 1.000000e+00 : f32
    %561 = vector.broadcast %cst_290 : f32 to vector<8x128xf32>
    %562 = arith.addf %560, %561 : vector<8x128xf32>
    %cst_291 = arith.constant 5.000000e-01 : f32
    %563 = vector.broadcast %cst_291 : f32 to vector<8x128xf32>
    %564 = arith.mulf %563, %562 : vector<8x128xf32>
    %565 = vector.extract_strided_slice %555 {offsets = [0, 128], sizes = [8, 128], strides = [1, 1]} : vector<8x512xf32> to vector<8x128xf32>
    %cst_292 = arith.constant 5.000000e-01 : f32
    %566 = vector.broadcast %cst_292 : f32 to vector<8x128xf32>
    %567 = arith.mulf %566, %565 : vector<8x128xf32>
    %568 = math.tanh %567 : vector<8x128xf32>
    %cst_293 = arith.constant 1.000000e+00 : f32
    %569 = vector.broadcast %cst_293 : f32 to vector<8x128xf32>
    %570 = arith.addf %568, %569 : vector<8x128xf32>
    %cst_294 = arith.constant 5.000000e-01 : f32
    %571 = vector.broadcast %cst_294 : f32 to vector<8x128xf32>
    %572 = arith.mulf %571, %570 : vector<8x128xf32>
    %573 = vector.extract_strided_slice %555 {offsets = [0, 256], sizes = [8, 128], strides = [1, 1]} : vector<8x512xf32> to vector<8x128xf32>
    %574 = math.tanh %573 : vector<8x128xf32>
    %575 = vector.extract_strided_slice %555 {offsets = [0, 384], sizes = [8, 128], strides = [1, 1]} : vector<8x512xf32> to vector<8x128xf32>
    %cst_295 = arith.constant 5.000000e-01 : f32
    %576 = vector.broadcast %cst_295 : f32 to vector<8x128xf32>
    %577 = arith.mulf %576, %575 : vector<8x128xf32>
    %578 = math.tanh %577 : vector<8x128xf32>
    %cst_296 = arith.constant 1.000000e+00 : f32
    %579 = vector.broadcast %cst_296 : f32 to vector<8x128xf32>
    %580 = arith.addf %578, %579 : vector<8x128xf32>
    %cst_297 = arith.constant 5.000000e-01 : f32
    %581 = vector.broadcast %cst_297 : f32 to vector<8x128xf32>
    %582 = arith.mulf %581, %580 : vector<8x128xf32>
    %583 = arith.mulf %572, %556 : vector<8x128xf32>
    %584 = arith.mulf %564, %574 : vector<8x128xf32>
    %585 = arith.addf %583, %584 : vector<8x128xf32>
    %586 = math.tanh %585 : vector<8x128xf32>
    %587 = arith.mulf %582, %586 : vector<8x128xf32>
    %c0_298 = arith.constant 0 : index
    %c0_299 = arith.constant 0 : index
    %588 = vector.load %arg13[%c0_298, %c0_299] : memref<8x128xf32, #tpu.memory_space<vmem>>, vector<8x128xf32>
    tpu.vector_store %arg13[%c0_298, %c0_299], %587 {strides = array<i32>} : memref<8x128xf32, #tpu.memory_space<vmem>>, vector<8x128xf32>,
    %c0_300 = arith.constant 0 : index
    %c0_301 = arith.constant 0 : index
    %589 = vector.load %arg14[%c0_300, %c0_301] : memref<8x128xf32, #tpu.memory_space<vmem>>, vector<8x128xf32>
    tpu.vector_store %arg14[%c0_300, %c0_301], %585 {strides = array<i32>} : memref<8x128xf32, #tpu.memory_space<vmem>>, vector<8x128xf32>,
    %590 = arith.index_cast %549 : i32 to index
    %c0_302 = arith.constant 0 : index
    %591 = vector.load %arg12[%590, %c0_302] : memref<64x128xf32, #tpu.memory_space<vmem>>, vector<8x128xf32>
    tpu.vector_store %arg12[%590, %c0_302], %587 {strides = array<i32>} : memref<64x128xf32, #tpu.memory_space<vmem>>, vector<8x128xf32>,
    %c5_i32_303 = arith.constant 5 : i32
    %c8_i32_304 = arith.constant 8 : i32
    %592 = arith.muli %c5_i32_303, %c8_i32_304 : i32
    %593 = tpu.assume_multiple %592, 8 : i32
    %594 = arith.index_cast %593 : i32 to index
    %c0_305 = arith.constant 0 : index
    %595 = vector.load %arg11[%594, %c0_305] : memref<64x512xf32, #tpu.memory_space<vmem>>, vector<8x512xf32>
    %c0_306 = arith.constant 0 : index
    %c0_307 = arith.constant 0 : index
    %596 = vector.load %arg13[%c0_306, %c0_307] : memref<8x128xf32, #tpu.memory_space<vmem>>, vector<8x128xf32>
    %597 = arith.truncf %596 : vector<8x128xf32> to vector<8x128xbf16>
    %cst_308 = arith.constant dense<0.000000e+00> : vector<8x512xf32>
    %598 = tpu.matmul %597, %3, %cst_308 {dimension_numbers = #tpu.dot_dimension_numbers<[1], [0], [0], [1], [0, 0, 1, 1], [], []>} : vector<8x128xbf16>, vector<128x512xbf16>, vector<8x512xf32> -> vector<8x512xf32>
    %599 = arith.addf %595, %598 : vector<8x512xf32>
    %c0_309 = arith.constant 0 : index
    %c0_310 = arith.constant 0 : index
    %600 = vector.load %arg14[%c0_309, %c0_310] : memref<8x128xf32, #tpu.memory_space<vmem>>, vector<8x128xf32>
    %601 = vector.extract_strided_slice %599 {offsets = [0, 0], sizes = [8, 128], strides = [1, 1]} : vector<8x512xf32> to vector<8x128xf32>
    %cst_311 = arith.constant 5.000000e-01 : f32
    %602 = vector.broadcast %cst_311 : f32 to vector<8x128xf32>
    %603 = arith.mulf %602, %601 : vector<8x128xf32>
    %604 = math.tanh %603 : vector<8x128xf32>
    %cst_312 = arith.constant 1.000000e+00 : f32
    %605 = vector.broadcast %cst_312 : f32 to vector<8x128xf32>
    %606 = arith.addf %604, %605 : vector<8x128xf32>
    %cst_313 = arith.constant 5.000000e-01 : f32
    %607 = vector.broadcast %cst_313 : f32 to vector<8x128xf32>
    %608 = arith.mulf %607, %606 : vector<8x128xf32>
    %609 = vector.extract_strided_slice %599 {offsets = [0, 128], sizes = [8, 128], strides = [1, 1]} : vector<8x512xf32> to vector<8x128xf32>
    %cst_314 = arith.constant 5.000000e-01 : f32
    %610 = vector.broadcast %cst_314 : f32 to vector<8x128xf32>
    %611 = arith.mulf %610, %609 : vector<8x128xf32>
    %612 = math.tanh %611 : vector<8x128xf32>
    %cst_315 = arith.constant 1.000000e+00 : f32
    %613 = vector.broadcast %cst_315 : f32 to vector<8x128xf32>
    %614 = arith.addf %612, %613 : vector<8x128xf32>
    %cst_316 = arith.constant 5.000000e-01 : f32
    %615 = vector.broadcast %cst_316 : f32 to vector<8x128xf32>
    %616 = arith.mulf %615, %614 : vector<8x128xf32>
    %617 = vector.extract_strided_slice %599 {offsets = [0, 256], sizes = [8, 128], strides = [1, 1]} : vector<8x512xf32> to vector<8x128xf32>
    %618 = math.tanh %617 : vector<8x128xf32>
    %619 = vector.extract_strided_slice %599 {offsets = [0, 384], sizes = [8, 128], strides = [1, 1]} : vector<8x512xf32> to vector<8x128xf32>
    %cst_317 = arith.constant 5.000000e-01 : f32
    %620 = vector.broadcast %cst_317 : f32 to vector<8x128xf32>
    %621 = arith.mulf %620, %619 : vector<8x128xf32>
    %622 = math.tanh %621 : vector<8x128xf32>
    %cst_318 = arith.constant 1.000000e+00 : f32
    %623 = vector.broadcast %cst_318 : f32 to vector<8x128xf32>
    %624 = arith.addf %622, %623 : vector<8x128xf32>
    %cst_319 = arith.constant 5.000000e-01 : f32
    %625 = vector.broadcast %cst_319 : f32 to vector<8x128xf32>
    %626 = arith.mulf %625, %624 : vector<8x128xf32>
    %627 = arith.mulf %616, %600 : vector<8x128xf32>
    %628 = arith.mulf %608, %618 : vector<8x128xf32>
    %629 = arith.addf %627, %628 : vector<8x128xf32>
    %630 = math.tanh %629 : vector<8x128xf32>
    %631 = arith.mulf %626, %630 : vector<8x128xf32>
    %c0_320 = arith.constant 0 : index
    %c0_321 = arith.constant 0 : index
    %632 = vector.load %arg13[%c0_320, %c0_321] : memref<8x128xf32, #tpu.memory_space<vmem>>, vector<8x128xf32>
    tpu.vector_store %arg13[%c0_320, %c0_321], %631 {strides = array<i32>} : memref<8x128xf32, #tpu.memory_space<vmem>>, vector<8x128xf32>,
    %c0_322 = arith.constant 0 : index
    %c0_323 = arith.constant 0 : index
    %633 = vector.load %arg14[%c0_322, %c0_323] : memref<8x128xf32, #tpu.memory_space<vmem>>, vector<8x128xf32>
    tpu.vector_store %arg14[%c0_322, %c0_323], %629 {strides = array<i32>} : memref<8x128xf32, #tpu.memory_space<vmem>>, vector<8x128xf32>,
    %634 = arith.index_cast %593 : i32 to index
    %c0_324 = arith.constant 0 : index
    %635 = vector.load %arg12[%634, %c0_324] : memref<64x128xf32, #tpu.memory_space<vmem>>, vector<8x128xf32>
    tpu.vector_store %arg12[%634, %c0_324], %631 {strides = array<i32>} : memref<64x128xf32, #tpu.memory_space<vmem>>, vector<8x128xf32>,
    %c6_i32_325 = arith.constant 6 : i32
    %c8_i32_326 = arith.constant 8 : i32
    %636 = arith.muli %c6_i32_325, %c8_i32_326 : i32
    %637 = tpu.assume_multiple %636, 8 : i32
    %638 = arith.index_cast %637 : i32 to index
    %c0_327 = arith.constant 0 : index
    %639 = vector.load %arg11[%638, %c0_327] : memref<64x512xf32, #tpu.memory_space<vmem>>, vector<8x512xf32>
    %c0_328 = arith.constant 0 : index
    %c0_329 = arith.constant 0 : index
    %640 = vector.load %arg13[%c0_328, %c0_329] : memref<8x128xf32, #tpu.memory_space<vmem>>, vector<8x128xf32>
    %641 = arith.truncf %640 : vector<8x128xf32> to vector<8x128xbf16>
    %cst_330 = arith.constant dense<0.000000e+00> : vector<8x512xf32>
    %642 = tpu.matmul %641, %3, %cst_330 {dimension_numbers = #tpu.dot_dimension_numbers<[1], [0], [0], [1], [0, 0, 1, 1], [], []>} : vector<8x128xbf16>, vector<128x512xbf16>, vector<8x512xf32> -> vector<8x512xf32>
    %643 = arith.addf %639, %642 : vector<8x512xf32>
    %c0_331 = arith.constant 0 : index
    %c0_332 = arith.constant 0 : index
    %644 = vector.load %arg14[%c0_331, %c0_332] : memref<8x128xf32, #tpu.memory_space<vmem>>, vector<8x128xf32>
    %645 = vector.extract_strided_slice %643 {offsets = [0, 0], sizes = [8, 128], strides = [1, 1]} : vector<8x512xf32> to vector<8x128xf32>
    %cst_333 = arith.constant 5.000000e-01 : f32
    %646 = vector.broadcast %cst_333 : f32 to vector<8x128xf32>
    %647 = arith.mulf %646, %645 : vector<8x128xf32>
    %648 = math.tanh %647 : vector<8x128xf32>
    %cst_334 = arith.constant 1.000000e+00 : f32
    %649 = vector.broadcast %cst_334 : f32 to vector<8x128xf32>
    %650 = arith.addf %648, %649 : vector<8x128xf32>
    %cst_335 = arith.constant 5.000000e-01 : f32
    %651 = vector.broadcast %cst_335 : f32 to vector<8x128xf32>
    %652 = arith.mulf %651, %650 : vector<8x128xf32>
    %653 = vector.extract_strided_slice %643 {offsets = [0, 128], sizes = [8, 128], strides = [1, 1]} : vector<8x512xf32> to vector<8x128xf32>
    %cst_336 = arith.constant 5.000000e-01 : f32
    %654 = vector.broadcast %cst_336 : f32 to vector<8x128xf32>
    %655 = arith.mulf %654, %653 : vector<8x128xf32>
    %656 = math.tanh %655 : vector<8x128xf32>
    %cst_337 = arith.constant 1.000000e+00 : f32
    %657 = vector.broadcast %cst_337 : f32 to vector<8x128xf32>
    %658 = arith.addf %656, %657 : vector<8x128xf32>
    %cst_338 = arith.constant 5.000000e-01 : f32
    %659 = vector.broadcast %cst_338 : f32 to vector<8x128xf32>
    %660 = arith.mulf %659, %658 : vector<8x128xf32>
    %661 = vector.extract_strided_slice %643 {offsets = [0, 256], sizes = [8, 128], strides = [1, 1]} : vector<8x512xf32> to vector<8x128xf32>
    %662 = math.tanh %661 : vector<8x128xf32>
    %663 = vector.extract_strided_slice %643 {offsets = [0, 384], sizes = [8, 128], strides = [1, 1]} : vector<8x512xf32> to vector<8x128xf32>
    %cst_339 = arith.constant 5.000000e-01 : f32
    %664 = vector.broadcast %cst_339 : f32 to vector<8x128xf32>
    %665 = arith.mulf %664, %663 : vector<8x128xf32>
    %666 = math.tanh %665 : vector<8x128xf32>
    %cst_340 = arith.constant 1.000000e+00 : f32
    %667 = vector.broadcast %cst_340 : f32 to vector<8x128xf32>
    %668 = arith.addf %666, %667 : vector<8x128xf32>
    %cst_341 = arith.constant 5.000000e-01 : f32
    %669 = vector.broadcast %cst_341 : f32 to vector<8x128xf32>
    %670 = arith.mulf %669, %668 : vector<8x128xf32>
    %671 = arith.mulf %660, %644 : vector<8x128xf32>
    %672 = arith.mulf %652, %662 : vector<8x128xf32>
    %673 = arith.addf %671, %672 : vector<8x128xf32>
    %674 = math.tanh %673 : vector<8x128xf32>
    %675 = arith.mulf %670, %674 : vector<8x128xf32>
    %c0_342 = arith.constant 0 : index
    %c0_343 = arith.constant 0 : index
    %676 = vector.load %arg13[%c0_342, %c0_343] : memref<8x128xf32, #tpu.memory_space<vmem>>, vector<8x128xf32>
    tpu.vector_store %arg13[%c0_342, %c0_343], %675 {strides = array<i32>} : memref<8x128xf32, #tpu.memory_space<vmem>>, vector<8x128xf32>,
    %c0_344 = arith.constant 0 : index
    %c0_345 = arith.constant 0 : index
    %677 = vector.load %arg14[%c0_344, %c0_345] : memref<8x128xf32, #tpu.memory_space<vmem>>, vector<8x128xf32>
    tpu.vector_store %arg14[%c0_344, %c0_345], %673 {strides = array<i32>} : memref<8x128xf32, #tpu.memory_space<vmem>>, vector<8x128xf32>,
    %678 = arith.index_cast %637 : i32 to index
    %c0_346 = arith.constant 0 : index
    %679 = vector.load %arg12[%678, %c0_346] : memref<64x128xf32, #tpu.memory_space<vmem>>, vector<8x128xf32>
    tpu.vector_store %arg12[%678, %c0_346], %675 {strides = array<i32>} : memref<64x128xf32, #tpu.memory_space<vmem>>, vector<8x128xf32>,
    %c7_i32_347 = arith.constant 7 : i32
    %c8_i32_348 = arith.constant 8 : i32
    %680 = arith.muli %c7_i32_347, %c8_i32_348 : i32
    %681 = tpu.assume_multiple %680, 8 : i32
    %682 = arith.index_cast %681 : i32 to index
    %c0_349 = arith.constant 0 : index
    %683 = vector.load %arg11[%682, %c0_349] : memref<64x512xf32, #tpu.memory_space<vmem>>, vector<8x512xf32>
    %c0_350 = arith.constant 0 : index
    %c0_351 = arith.constant 0 : index
    %684 = vector.load %arg13[%c0_350, %c0_351] : memref<8x128xf32, #tpu.memory_space<vmem>>, vector<8x128xf32>
    %685 = arith.truncf %684 : vector<8x128xf32> to vector<8x128xbf16>
    %cst_352 = arith.constant dense<0.000000e+00> : vector<8x512xf32>
    %686 = tpu.matmul %685, %3, %cst_352 {dimension_numbers = #tpu.dot_dimension_numbers<[1], [0], [0], [1], [0, 0, 1, 1], [], []>} : vector<8x128xbf16>, vector<128x512xbf16>, vector<8x512xf32> -> vector<8x512xf32>
    %687 = arith.addf %683, %686 : vector<8x512xf32>
    %c0_353 = arith.constant 0 : index
    %c0_354 = arith.constant 0 : index
    %688 = vector.load %arg14[%c0_353, %c0_354] : memref<8x128xf32, #tpu.memory_space<vmem>>, vector<8x128xf32>
    %689 = vector.extract_strided_slice %687 {offsets = [0, 0], sizes = [8, 128], strides = [1, 1]} : vector<8x512xf32> to vector<8x128xf32>
    %cst_355 = arith.constant 5.000000e-01 : f32
    %690 = vector.broadcast %cst_355 : f32 to vector<8x128xf32>
    %691 = arith.mulf %690, %689 : vector<8x128xf32>
    %692 = math.tanh %691 : vector<8x128xf32>
    %cst_356 = arith.constant 1.000000e+00 : f32
    %693 = vector.broadcast %cst_356 : f32 to vector<8x128xf32>
    %694 = arith.addf %692, %693 : vector<8x128xf32>
    %cst_357 = arith.constant 5.000000e-01 : f32
    %695 = vector.broadcast %cst_357 : f32 to vector<8x128xf32>
    %696 = arith.mulf %695, %694 : vector<8x128xf32>
    %697 = vector.extract_strided_slice %687 {offsets = [0, 128], sizes = [8, 128], strides = [1, 1]} : vector<8x512xf32> to vector<8x128xf32>
    %cst_358 = arith.constant 5.000000e-01 : f32
    %698 = vector.broadcast %cst_358 : f32 to vector<8x128xf32>
    %699 = arith.mulf %698, %697 : vector<8x128xf32>
    %700 = math.tanh %699 : vector<8x128xf32>
    %cst_359 = arith.constant 1.000000e+00 : f32
    %701 = vector.broadcast %cst_359 : f32 to vector<8x128xf32>
    %702 = arith.addf %700, %701 : vector<8x128xf32>
    %cst_360 = arith.constant 5.000000e-01 : f32
    %703 = vector.broadcast %cst_360 : f32 to vector<8x128xf32>
    %704 = arith.mulf %703, %702 : vector<8x128xf32>
    %705 = vector.extract_strided_slice %687 {offsets = [0, 256], sizes = [8, 128], strides = [1, 1]} : vector<8x512xf32> to vector<8x128xf32>
    %706 = math.tanh %705 : vector<8x128xf32>
    %707 = vector.extract_strided_slice %687 {offsets = [0, 384], sizes = [8, 128], strides = [1, 1]} : vector<8x512xf32> to vector<8x128xf32>
    %cst_361 = arith.constant 5.000000e-01 : f32
    %708 = vector.broadcast %cst_361 : f32 to vector<8x128xf32>
    %709 = arith.mulf %708, %707 : vector<8x128xf32>
    %710 = math.tanh %709 : vector<8x128xf32>
    %cst_362 = arith.constant 1.000000e+00 : f32
    %711 = vector.broadcast %cst_362 : f32 to vector<8x128xf32>
    %712 = arith.addf %710, %711 : vector<8x128xf32>
    %cst_363 = arith.constant 5.000000e-01 : f32
    %713 = vector.broadcast %cst_363 : f32 to vector<8x128xf32>
    %714 = arith.mulf %713, %712 : vector<8x128xf32>
    %715 = arith.mulf %704, %688 : vector<8x128xf32>
    %716 = arith.mulf %696, %706 : vector<8x128xf32>
    %717 = arith.addf %715, %716 : vector<8x128xf32>
    %718 = math.tanh %717 : vector<8x128xf32>
    %719 = arith.mulf %714, %718 : vector<8x128xf32>
    %c0_364 = arith.constant 0 : index
    %c0_365 = arith.constant 0 : index
    %720 = vector.load %arg13[%c0_364, %c0_365] : memref<8x128xf32, #tpu.memory_space<vmem>>, vector<8x128xf32>
    tpu.vector_store %arg13[%c0_364, %c0_365], %719 {strides = array<i32>} : memref<8x128xf32, #tpu.memory_space<vmem>>, vector<8x128xf32>,
    %c0_366 = arith.constant 0 : index
    %c0_367 = arith.constant 0 : index
    %721 = vector.load %arg14[%c0_366, %c0_367] : memref<8x128xf32, #tpu.memory_space<vmem>>, vector<8x128xf32>
    tpu.vector_store %arg14[%c0_366, %c0_367], %717 {strides = array<i32>} : memref<8x128xf32, #tpu.memory_space<vmem>>, vector<8x128xf32>,
    %722 = arith.index_cast %681 : i32 to index
    %c0_368 = arith.constant 0 : index
    %723 = vector.load %arg12[%722, %c0_368] : memref<64x128xf32, #tpu.memory_space<vmem>>, vector<8x128xf32>
    tpu.vector_store %arg12[%722, %c0_368], %719 {strides = array<i32>} : memref<64x128xf32, #tpu.memory_space<vmem>>, vector<8x128xf32>,
    %c8_i32_369 = arith.constant 8 : i32
    %c0_370 = arith.constant 0 : index
    %c0_371 = arith.constant 0 : index
    %724 = vector.load %arg12[%c0_370, %c0_371] : memref<64x128xf32, #tpu.memory_space<vmem>>, vector<64x128xf32>
    %725 = arith.truncf %724 : vector<64x128xf32> to vector<64x128xbf16>
    %c0_372 = arith.constant 0 : index
    %c0_373 = arith.constant 0 : index
    %726 = vector.load %arg8[%c0_372, %c0_373] : memref<128x128xbf16, #tpu.memory_space<vmem>>, vector<128x128xbf16>
    %cst_374 = arith.constant dense<0.000000e+00> : vector<64x128xf32>
    %727 = tpu.matmul %725, %726, %cst_374 {dimension_numbers = #tpu.dot_dimension_numbers<[1], [0], [0], [1], [0, 0, 1, 1], [], []>} : vector<64x128xbf16>, vector<128x128xbf16>, vector<64x128xf32> -> vector<64x128xf32>
    %c0_375 = arith.constant 0 : index
    %c0_376 = arith.constant 0 : index
    %728 = vector.load %arg9[%c0_375, %c0_376] : memref<1x128xf32, #tpu.memory_space<vmem>>, vector<1x128xf32>
    %729 = vector.broadcast %728 : vector<1x128xf32> to vector<64x128xf32>
    %730 = arith.addf %727, %729 : vector<64x128xf32>
    %c0_377 = arith.constant 0 : index
    %c0_378 = arith.constant 0 : index
    %c0_379 = arith.constant 0 : index
    %731 = vector.load %arg10[%c0_377, %c0_378, %c0_379] : memref<1x64x128xf32, #tpu.memory_space<vmem>>, vector<1x64x128xf32>
    %732 = vector.shape_cast %731 : vector<1x64x128xf32> to vector<64x128xf32>
    %733 = vector.shape_cast %730 : vector<64x128xf32> to vector<1x64x128xf32>
    tpu.vector_store %arg10[%c0_377, %c0_378, %c0_379], %733 {strides = array<i32>} : memref<1x64x128xf32, #tpu.memory_space<vmem>>, vector<1x64x128xf32>,
    return
  }
  func.func @transform_0(%arg0: i32) -> (i32, i32, i32) {
    %c0_i32 = arith.constant 0 : i32
    %c0_i32_0 = arith.constant 0 : i32
    %c0_i32_1 = arith.constant 0 : i32
    return %arg0, %c0_i32, %c0_i32_0 : i32, i32, i32
  }
  func.func @transform_1(%arg0: i32) -> (i32, i32) {
    %c0_i32 = arith.constant 0 : i32
    %c0_i32_0 = arith.constant 0 : i32
    %c0_i32_1 = arith.constant 0 : i32
    return %c0_i32, %c0_i32_0 : i32, i32
  }
  func.func @transform_2(%arg0: i32) -> (i32, i32) {
    %c0_i32 = arith.constant 0 : i32
    %c0_i32_0 = arith.constant 0 : i32
    %c0_i32_1 = arith.constant 0 : i32
    return %c0_i32, %c0_i32_0 : i32, i32
  }
  func.func @transform_3(%arg0: i32) -> (i32, i32) {
    %c0_i32 = arith.constant 0 : i32
    %c0_i32_0 = arith.constant 0 : i32
    %c0_i32_1 = arith.constant 0 : i32
    return %c0_i32, %c0_i32_0 : i32, i32
  }
  func.func @transform_4(%arg0: i32) -> (i32, i32) {
    %c0_i32 = arith.constant 0 : i32
    %c0_i32_0 = arith.constant 0 : i32
    %c0_i32_1 = arith.constant 0 : i32
    return %c0_i32, %c0_i32_0 : i32, i32
  }
  func.func @transform_5(%arg0: i32) -> (i32, i32) {
    %c0_i32 = arith.constant 0 : i32
    %c0_i32_0 = arith.constant 0 : i32
    %c0_i32_1 = arith.constant 0 : i32
    return %c0_i32, %c0_i32_0 : i32, i32
  }
  func.func @transform_6(%arg0: i32) -> (i32, i32) {
    %c0_i32 = arith.constant 0 : i32
    %c0_i32_0 = arith.constant 0 : i32
    %c0_i32_1 = arith.constant 0 : i32
    return %c0_i32, %c0_i32_0 : i32, i32
  }
  func.func @transform_7(%arg0: i32) -> (i32, i32) {
    %c0_i32 = arith.constant 0 : i32
    %c0_i32_0 = arith.constant 0 : i32
    %c0_i32_1 = arith.constant 0 : i32
    return %c0_i32, %c0_i32_0 : i32, i32
  }
  func.func @transform_8(%arg0: i32) -> (i32, i32) {
    %c0_i32 = arith.constant 0 : i32
    %c0_i32_0 = arith.constant 0 : i32
    %c0_i32_1 = arith.constant 0 : i32
    return %c0_i32, %c0_i32_0 : i32, i32
  }
  func.func @transform_9(%arg0: i32) -> (i32, i32, i32) {
    %c0_i32 = arith.constant 0 : i32
    %c0_i32_0 = arith.constant 0 : i32
    %c0_i32_1 = arith.constant 0 : i32
    return %arg0, %c0_i32, %c0_i32_0 : i32, i32, i32
  }
}

</mosaic_0001>

<bundles_post_ra>
// kernel: tpu_custom_call.1
= control target key start
LH: loop header
LB: loop body
LE: loop exit
PB: predicated region body
PF: predicated region fallthrough
CT: control target
= control target key end

     0   :  { %14 = vsyncpa [#allocation7], 0  ;;  %s5387_s0 = inlined_call_operand.hbm [shape: bf16[1,64,128], index: 0, kind: input, shape index: {}]   ;;  %s5388_s1 = inlined_call_operand.hbm [shape: bf16[128,512], index: 1, kind: input, shape index: {}]   ;;  %s5389_s2 = inlined_call_operand.hbm [shape: bf16[128,512], index: 2, kind: input, shape index: {}]   ;;  %s5390_s3 = inlined_call_operand.vmem [shape: f32[1,512], index: 3, kind: input, shape index: {}]   ;;  %s5391_s4 = inlined_call_operand.hbm [shape: bf16[128,512], index: 4, kind: input, shape index: {}]   ;;  %s5392_s5 = inlined_call_operand.hbm [shape: bf16[128,512], index: 5, kind: input, shape index: {}]   ;;  %s5393_s6 = inlined_call_operand.vmem [shape: f32[1,512], index: 6, kind: input, shape index: {}]   ;;  %s5394_s7 = inlined_call_operand.hbm [shape: bf16[128,128], index: 7, kind: input, shape index: {}]   ;;  %s5395_s8 = inlined_call_operand.vmem [shape: f32[1,128], index: 8, kind: input, shape index: {}]   ;;  %s5396_s9 = inlined_call_operand.hbm [shape: f32[1,64,128], index: 9, kind: output, shape index: {}]  }
   0x1   :  { %15 = vsyncpa [#allocation10], 0 }
   0x2   :  { %16 = vsyncpa [#allocation13], 0 }
   0x3   :  { %17 = vsyncpa [#allocation16], 0 }
   0x4   :  { %18 = vsyncpa [#allocation8], 0  ;;  %s4144_s30 = smov [#allocation9]   ;;  %s3980_s13 = scalar_lea.hbm %s5388_s1, 4096 }
   0x5   :  { %s36_s10 = sshll.u32 %s4144_s30, 4  ;;  %p3981_p0 = scmp.ne.s32.totalorder %s5388_s1, %s3980_s13  ;;  %s37_s10 = int_to_ptr.vmem [resolvable:$true] %s36_s10 }
   0x6   :  { %p3984_p1 = scmp.lt.u32.totalorder %s3980_s13, %s5388_s1 }
   0x8   :  { %p3986_p2 = pnand %p3984_p1, %p3981_p0 }
   0xa   :  { %3989 = shalt.err (!%p3986_p2)
}
   0xb   :  { %s3990_s18 = scalar_lea.vmem %s37_s10, 4096  ;;  %p3995_p4 = scmp.lt.s32.totalorder %s37_s10, %s37_s10 }
   0xc   :  { %p3991_p3 = scmp.ne.s32.totalorder %s37_s10, %s3990_s18  ;;  %p3996_p5 = scmp.lt.s32.totalorder %s3990_s18, %s3990_s18 }
   0xe   :  { %p3997_p6 = por %p3996_p5, %p3995_p4 }
  0x10   :  { %p3998_p7 = pnand %p3997_p6, %p3991_p3 }
  0x12   :  { %4001 = shalt.err (!%p3998_p7)
}
  0x13   :  { %s4145_s19 = smov 256   ;;  %s4146_s20 = smov 16  }
  0x14   :  { %42 = dma.hbm_to_vmem [thread:$0]  %s5388_s1, 4096, %s37_s10, [#allocation10], %s4145_s19, %s4145_s19, %s4146_s20  }
  0x15   :  { %s4147_s23 = smov [#allocation12]   ;;  %s4148_s25 = smov [#allocation6]  }
  0x16   :  { %s62_s24 = sshll.u32 %s4147_s23, 4  ;;  %s24_s26 = sshll.u32 %s4148_s25, 4  ;;  %s63_s24 = int_to_ptr.vmem [resolvable:$true] %s62_s24  ;;  %s25_s26 = int_to_ptr.vmem [resolvable:$true] %s24_s26 }
  0x17   :  { %s4002_s29 = scalar_lea.hbm %s5391_s4, 4096 }
  0x18   :  { %p4003_p8 = scmp.ne.s32.totalorder %s5391_s4, %s4002_s29  ;;  %p4006_p9 = scmp.lt.u32.totalorder %s4002_s29, %s5391_s4 }
  0x1a   :  { %p4008_p10 = pnand %p4006_p9, %p4003_p8 }
  0x1c   :  { %4011 = shalt.err (!%p4008_p10)
}
  0x1d   :  { %s4012_s1 = scalar_lea.vmem %s63_s24, 4096  ;;  %p4017_p12 = scmp.lt.s32.totalorder %s63_s24, %s63_s24 }
  0x1e   :  { %p4013_p11 = scmp.ne.s32.totalorder %s63_s24, %s4012_s1  ;;  %p4018_p13 = scmp.lt.s32.totalorder %s4012_s1, %s4012_s1 }
  0x20   :  { %p4019_p0 = por %p4018_p13, %p4017_p12 }
  0x22   :  { %p4020_p1 = pnand %p4019_p0, %p4013_p11 }
  0x24   :  { %4023 = shalt.err (!%p4020_p1)
}
  0x25   :  { %68 = dma.hbm_to_vmem [thread:$0]  %s5391_s4, 4096, %s63_s24, [#allocation13], %s4145_s19, %s4145_s19, %s4146_s20  }
  0x26   :  { %s4024_s17 = scalar_lea.hbm %s5387_s0, 512 }
  0x27   :  { %p4025_p2 = scmp.ne.s32.totalorder %s5387_s0, %s4024_s17  ;;  %p4028_p3 = scmp.lt.u32.totalorder %s4024_s17, %s5387_s0 }
  0x29   :  { %p4030_p4 = pnand %p4028_p3, %p4025_p2 }
  0x2b   :  { %4033 = shalt.err (!%p4030_p4)
}
  0x2c   :  { %s4034_s25 = scalar_lea.vmem %s25_s26, 512  ;;  %p4039_p6 = scmp.lt.s32.totalorder %s25_s26, %s25_s26 }
  0x2d   :  { %p4035_p5 = scmp.ne.s32.totalorder %s25_s26, %s4034_s25  ;;  %p4040_p7 = scmp.lt.s32.totalorder %s4034_s25, %s4034_s25 }
  0x2f   :  { %p4041_p8 = por %p4040_p7, %p4039_p6 }
  0x31   :  { %p4042_p9 = pnand %p4041_p8, %p4035_p5 }
  0x33   :  { %4045 = shalt.err (!%p4042_p9)
}
  0x34   :  { %s4149_s4 = smov 64   ;;  %s4150_s24 = smov 4  }
  0x35   :  { %30 = dma.hbm_to_vmem [thread:$0]  %s5387_s0, 512, %s25_s26, [#allocation7], %s4149_s4, %s4149_s4, %s4150_s24  }
  0x36   :  { %s4151_s29 = smov [#allocation11]   ;;  %s4152_s11 = smov [#allocation14]  }
  0x37   :  { %s48_s30 = sshll.u32 %s4151_s29, 4  ;;  %s74_s12 = sshll.u32 %s4152_s11, 4  ;;  %s49_s30 = int_to_ptr.vmem [resolvable:$true] %s48_s30  ;;  %s75_s12 = int_to_ptr.vmem [resolvable:$true] %s74_s12 }
  0x38   :  { %s4046_s10 = scalar_lea.hbm %s5389_s2, 4096 }
  0x39   :  { %p4047_p10 = scmp.ne.s32.totalorder %s5389_s2, %s4046_s10  ;;  %p4050_p11 = scmp.lt.u32.totalorder %s4046_s10, %s5389_s2 }
  0x3b   :  { %p4052_p12 = pnand %p4050_p11, %p4047_p10 }
  0x3d   :  { %4055 = shalt.err (!%p4052_p12)
}
  0x3e   :  { %s4056_s0 = scalar_lea.vmem %s49_s30, 4096  ;;  %p4061_p0 = scmp.lt.s32.totalorder %s49_s30, %s49_s30 }
  0x3f   :  { %p4057_p13 = scmp.ne.s32.totalorder %s49_s30, %s4056_s0  ;;  %p4062_p1 = scmp.lt.s32.totalorder %s4056_s0, %s4056_s0 }
  0x41   :  { %p4063_p2 = por %p4062_p1, %p4061_p0 }
  0x43   :  { %p4064_p3 = pnand %p4063_p2, %p4057_p13 }
  0x45   :  { %4067 = shalt.err (!%p4064_p3)
}
  0x46   :  { %54 = dma.hbm_to_vmem [thread:$0]  %s5389_s2, 4096, %s49_s30, [#allocation10], %s4145_s19, %s4145_s19, %s4146_s20  }
  0x47   :  { %s4068_s23 = scalar_lea.hbm %s5392_s5, 4096 }
  0x48   :  { %p4069_p4 = scmp.ne.s32.totalorder %s5392_s5, %s4068_s23  ;;  %p4072_p5 = scmp.lt.u32.totalorder %s4068_s23, %s5392_s5 }
  0x4a   :  { %p4074_p6 = pnand %p4072_p5, %p4069_p4 }
  0x4c   :  { %4077 = shalt.err (!%p4074_p6)
}
  0x4d   :  { %s4078_s11 = scalar_lea.vmem %s75_s12, 4096  ;;  %p4083_p8 = scmp.lt.s32.totalorder %s75_s12, %s75_s12 }
  0x4e   :  { %p4079_p7 = scmp.ne.s32.totalorder %s75_s12, %s4078_s11  ;;  %p4084_p9 = scmp.lt.s32.totalorder %s4078_s11, %s4078_s11 }
  0x50   :  { %p4085_p10 = por %p4084_p9, %p4083_p8 }
  0x52   :  { %p4086_p11 = pnand %p4085_p10, %p4079_p7 }
  0x54   :  { %4089 = shalt.err (!%p4086_p11)
}
  0x55   :  { %80 = dma.hbm_to_vmem [thread:$0]  %s5392_s5, 4096, %s75_s12, [#allocation13], %s4145_s19, %s4145_s19, %s4146_s20  }
  0x56   :  { %s4153_s13 = smov [#allocation15]   ;;  %s4090_s15 = scalar_lea.hbm %s5394_s7, 1024 }
  0x57   :  { %s88_s1 = sshll.u32 %s4153_s13, 4  ;;  %p4091_p12 = scmp.ne.s32.totalorder %s5394_s7, %s4090_s15  ;;  %s89_s1 = int_to_ptr.vmem [resolvable:$true] %s88_s1 }
  0x58   :  { %p4094_p13 = scmp.lt.u32.totalorder %s4090_s15, %s5394_s7 }
  0x5a   :  { %p4096_p0 = pnand %p4094_p13, %p4091_p12 }
  0x5c   :  { %4099 = shalt.err (!%p4096_p0)
}
  0x5d   :  { %s4100_s18 = scalar_lea.vmem %s89_s1, 1024  ;;  %p4105_p2 = scmp.lt.s32.totalorder %s89_s1, %s89_s1 }
  0x5e   :  { %p4101_p1 = scmp.ne.s32.totalorder %s89_s1, %s4100_s18  ;;  %p4106_p3 = scmp.lt.s32.totalorder %s4100_s18, %s4100_s18 }
  0x60   :  { %p4107_p4 = por %p4106_p3, %p4105_p2 }
  0x62   :  { %p4108_p5 = pnand %p4107_p4, %p4101_p1 }
  0x64   :  { %4111 = shalt.err (!%p4108_p5)
}
  0x65   :  { %94 = dma.hbm_to_vmem [thread:$0]  %s5394_s7, 1024, %s89_s1, [#allocation16], %s4149_s4, %s4149_s4, %s4150_s24  }
  0x66   :  { %4134 = dma.done.wait [#allocation7], 512  }
  0x67   :  { %4135 = vsyncadd [#allocation7], 4294966784 }
  0x68   :  { %4136 = dma.done.wait [#allocation10], 8192  }
  0x69   :  { %4137 = vsyncadd [#allocation10], 4294959104 }
  0x6a   :  { %4138 = dma.done.wait [#allocation13], 8192  }
  0x6b   :  { %4139 = vsyncadd [#allocation13], 4294959104 }
  0x6c   :  { %4140 = dma.done.wait [#allocation16], 1024  }
  0x6d   :  { %4141 = vsyncadd [#allocation16], 4294966272  ;;  %v5399_v0 = vmov 0   ;;  %v3548_v1 = vld [vmem:[#allocation9 + $0x4] ss:$16 sps:$4 sm:$0xff]   ;;  %v4155_v38 = vmov 0.0|0.0  }
  0x6e   :  { %460 = vmatprep.mubr.bf16.mxu1 %v5399_v0  ;;  %807 = vmatprep.mubr.bf16.mxu0 %v5399_v0  ;;  %v3550_v2 = vld [vmem:[#allocation9] ss:$16 sps:$4 sm:$0xff]   ;;  %v4301_v3 = vld [vmem:[#allocation11 + $0x4] ss:$16 sps:$4 sm:$0xff]   ;;  %v3599_v32 = vld [vmem:[#allocation9 + $0xc] ss:$16 sps:$4 sm:$0xff]  }
  0x6f   :  { %428 = vmatprep.subr.bf16.mxu1 %v3548_v1  ;;  %v4303_v4 = vld [vmem:[#allocation11] ss:$16 sps:$4 sm:$0xff]   ;;  %v3554_v5 = vld [vmem:[#allocation9 + $0x24] ss:$16 sps:$4 sm:$0xff]   ;;  %775 = vmatprep.subr.bf16.mxu0 %v4301_v3  ;;  %v3597_v35 = vld [vmem:[#allocation9 + $0x8] ss:$16 sps:$4 sm:$0xff]  }
  0x70   :  { %429 = vmatpush1.bf16.msra.mxu1 %v3550_v2  ;;  %v3556_v6 = vld [vmem:[#allocation9 + $0x20] ss:$16 sps:$4 sm:$0xff]   ;;  %v4306_v7 = vld [vmem:[#allocation11 + $0x24] ss:$16 sps:$4 sm:$0xff]   ;;  %776 = vmatpush1.bf16.msra.mxu0 %v4303_v4  ;;  %v3602_v36 = vld [vmem:[#allocation9 + $0x2c] ss:$16 sps:$4 sm:$0xff]  }
  0x71   :  { %430 = vmatprep.subr.bf16.mxu1 %v3554_v5  ;;  %v4309_v8 = vld [vmem:[#allocation11 + $0x20] ss:$16 sps:$4 sm:$0xff]   ;;  %777 = vmatprep.subr.bf16.mxu0 %v4306_v7  ;;  %v3560_v9 = vld [vmem:[#allocation9 + $0x44] ss:$16 sps:$4 sm:$0xff]   ;;  %v3600_v37 = vld [vmem:[#allocation9 + $0x28] ss:$16 sps:$4 sm:$0xff]  }
  0x72   :  { %v3562_v10 = vld [vmem:[#allocation9 + $0x40] ss:$16 sps:$4 sm:$0xff]   ;;  %v4312_v11 = vld [vmem:[#allocation11 + $0x44] ss:$16 sps:$4 sm:$0xff]   ;;  %v3606_v39 = vld [vmem:[#allocation9 + $0x4c] ss:$16 sps:$4 sm:$0xff]  }
  0x73   :  { %v3566_v12 = vld [vmem:[#allocation9 + $0x64] ss:$16 sps:$4 sm:$0xff]   ;;  %v4315_v13 = vld [vmem:[#allocation11 + $0x40] ss:$16 sps:$4 sm:$0xff]   ;;  %v3603_v40 = vld [vmem:[#allocation6 + $0x8] sm:$0xff]  }
  0x74   :  { %431 = vmatpush1.bf16.msra.mxu1 %v3556_v6  ;;  %778 = vmatpush1.bf16.msra.mxu0 %v4309_v8  ;;  %v4318_v14 = vld [vmem:[#allocation11 + $0x64] ss:$16 sps:$4 sm:$0xff]   ;;  %v3568_v15 = vld [vmem:[#allocation9 + $0x60] ss:$16 sps:$4 sm:$0xff]   ;;  %v3604_v41 = vld [vmem:[#allocation9 + $0x48] ss:$16 sps:$4 sm:$0xff]  }
  0x75   :  { %432 = vmatprep.subr.bf16.mxu1 %v3560_v9  ;;  %779 = vmatprep.subr.bf16.mxu0 %v4312_v11  ;;  %v3572_v16 = vld [vmem:[#allocation9 + $0x84] ss:$16 sps:$4 sm:$0xff]   ;;  %v4321_v17 = vld [vmem:[#allocation11 + $0x60] ss:$16 sps:$4 sm:$0xff]   ;;  %v3609_v42 = vld [vmem:[#allocation9 + $0x6c] ss:$16 sps:$4 sm:$0xff]  }
  0x76   :  { %v4324_v18 = vld [vmem:[#allocation11 + $0x84] ss:$16 sps:$4 sm:$0xff]   ;;  %v3574_v19 = vld [vmem:[#allocation9 + $0x80] ss:$16 sps:$4 sm:$0xff]   ;;  %v3607_v43 = vld [vmem:[#allocation9 + $0x68] ss:$16 sps:$4 sm:$0xff]  }
  0x77   :  { %v3578_v20 = vld [vmem:[#allocation9 + $0xa4] ss:$16 sps:$4 sm:$0xff]   ;;  %v4327_v21 = vld [vmem:[#allocation11 + $0x80] ss:$16 sps:$4 sm:$0xff]   ;;  %v3613_v44 = vld [vmem:[#allocation9 + $0x8c] ss:$16 sps:$4 sm:$0xff]  }
  0x78   :  { %433 = vmatpush1.bf16.msra.mxu1 %v3562_v10  ;;  %780 = vmatpush1.bf16.msra.mxu0 %v4315_v13  ;;  %v4330_v22 = vld [vmem:[#allocation11 + $0xa4] ss:$16 sps:$4 sm:$0xff]   ;;  %v3580_v23 = vld [vmem:[#allocation9 + $0xa0] ss:$16 sps:$4 sm:$0xff]   ;;  %v3611_v46 = vld [vmem:[#allocation9 + $0x88] ss:$16 sps:$4 sm:$0xff]  }
  0x79   :  { %434 = vmatprep.subr.bf16.mxu1 %v3566_v12  ;;  %781 = vmatprep.subr.bf16.mxu0 %v4318_v14  ;;  %v3584_v24 = vld [vmem:[#allocation9 + $0xc4] ss:$16 sps:$4 sm:$0xff]   ;;  %v4333_v25 = vld [vmem:[#allocation11 + $0xa0] ss:$16 sps:$4 sm:$0xff]   ;;  %v3616_v47 = vld [vmem:[#allocation9 + $0xac] ss:$16 sps:$4 sm:$0xff]   ;;  %v224_v12 = vlaneseq }
  0x7a   :  { %v4336_v26 = vld [vmem:[#allocation11 + $0xc4] ss:$16 sps:$4 sm:$0xff]   ;;  %v3586_v27 = vld [vmem:[#allocation9 + $0xc0] ss:$16 sps:$4 sm:$0xff]   ;;  %v3614_v48 = vld [vmem:[#allocation9 + $0xa8] ss:$16 sps:$4 sm:$0xff]  }
  0x7b   :  { %v3590_v28 = vld [vmem:[#allocation9 + $0xe4] ss:$16 sps:$4 sm:$0xff]   ;;  %v4339_v29 = vld [vmem:[#allocation11 + $0xc0] ss:$16 sps:$4 sm:$0xff]   ;;  %v3620_v49 = vld [vmem:[#allocation9 + $0xcc] ss:$16 sps:$4 sm:$0xff]  }
  0x7c   :  { %435 = vmatpush1.bf16.msra.mxu1 %v3568_v15  ;;  %782 = vmatpush1.bf16.msra.mxu0 %v4321_v17  ;;  %v4342_v30 = vld [vmem:[#allocation11 + $0xe4] ss:$16 sps:$4 sm:$0xff]   ;;  %v3592_v31 = vld [vmem:[#allocation9 + $0xe0] ss:$16 sps:$4 sm:$0xff]   ;;  %v3617_v50 = vld [vmem:[#allocation6 + $0x18] sm:$0xff]   ;;  %v4447_v15 = vshrl.u32 %v224_v12, 7 }
  0x7d   :  { %436 = vmatprep.subr.bf16.mxu1 %v3572_v16  ;;  %783 = vmatprep.subr.bf16.mxu0 %v4324_v18  ;;  %v4345_v33 = vld [vmem:[#allocation11 + $0xe0] ss:$16 sps:$4 sm:$0xff]   ;;  %v3618_v51 = vld [vmem:[#allocation9 + $0xc8] ss:$16 sps:$4 sm:$0xff]   ;;  %v3623_v52 = vld [vmem:[#allocation9 + $0xec] ss:$16 sps:$4 sm:$0xff]  }
  0x7e   :  { %v4348_v34 = vld [vmem:[#allocation6] sm:$0xff]   ;;  %v3610_v45 = vld [vmem:[#allocation6 + $0x10] sm:$0xff]   ;;  %v3621_v53 = vld [vmem:[#allocation9 + $0xe8] ss:$16 sps:$4 sm:$0xff]   ;;  %5405 = vst [vmem:[#allocation23_spill] sm:$0xff] %v4447_v15  ;;  %v5398_v16 = vsub.s32 0, %v4447_v15 }
  0x7f   :  { %v4369_v54 = vld [vmem:[#allocation11 + $0xc] ss:$16 sps:$4 sm:$0xff]   ;;  %v4373_v55 = vld [vmem:[#allocation11 + $0x8] ss:$16 sps:$4 sm:$0xff]  }
  0x80   :  { %437 = vmatpush1.bf16.msra.mxu1 %v3574_v19  ;;  %784 = vmatpush1.bf16.msra.mxu0 %v4327_v21  ;;  %v4376_v56 = vld [vmem:[#allocation11 + $0x2c] ss:$16 sps:$4 sm:$0xff]   ;;  %v4380_v57 = vld [vmem:[#allocation11 + $0x28] ss:$16 sps:$4 sm:$0xff]   ;;  %v222_v19 = vld [vmem:[%s5390_s3] sm:$0xf] }
  0x81   :  { %438 = vmatprep.subr.bf16.mxu1 %v3578_v20  ;;  %785 = vmatprep.subr.bf16.mxu0 %v4330_v22  ;;  %v4384_v58 = vld [vmem:[#allocation11 + $0x4c] ss:$16 sps:$4 sm:$0xff]   ;;  %v4390_v59 = vld [vmem:[#allocation11 + $0x48] ss:$16 sps:$4 sm:$0xff]   ;;  %v5397_v20 = vsub.s32 1, %v4447_v15 }
  0x82   :  { %v4392_v60 = vld [vmem:[#allocation11 + $0x6c] ss:$16 sps:$4 sm:$0xff]   ;;  %v4397_v61 = vld [vmem:[#allocation11 + $0x68] ss:$16 sps:$4 sm:$0xff]  }
  0x83   :  { %v4401_v62 = vld [vmem:[#allocation11 + $0x8c] ss:$16 sps:$4 sm:$0xff]   ;;  %v4404_v63 = vld [vmem:[#allocation11 + $0x88] ss:$16 sps:$4 sm:$0xff]  }
  0x84   :  { %439 = vmatpush1.bf16.msra.mxu1 %v3580_v23  ;;  %786 = vmatpush1.bf16.msra.mxu0 %v4333_v25  ;;  %v4407_v1 = vld [vmem:[#allocation11 + $0xac] ss:$16 sps:$4 sm:$0xff]   ;;  %v4410_v2 = vld [vmem:[#allocation11 + $0xa8] ss:$16 sps:$4 sm:$0xff]   ;;  %v227_v23 = vrot.slane %v222_v19, %v5398_v16 }
  0x85   :  { %440 = vmatprep.subr.bf16.mxu1 %v3584_v24  ;;  %787 = vmatprep.subr.bf16.mxu0 %v4336_v26  ;;  %v4414_v5 = vld [vmem:[#allocation11 + $0xcc] ss:$16 sps:$4 sm:$0xff]   ;;  %v4417_v6 = vld [vmem:[#allocation11 + $0xc8] ss:$16 sps:$4 sm:$0xff]   ;;  %v231_v24 = vrot.slane %v222_v19, %v5397_v20 }
  0x86   :  { %v4420_v9 = vld [vmem:[#allocation11 + $0xec] ss:$16 sps:$4 sm:$0xff]   ;;  %v4423_v10 = vld [vmem:[#allocation11 + $0xe8] ss:$16 sps:$4 sm:$0xff]  }
  0x88   :  { %441 = vmatpush1.bf16.msra.mxu1 %v3586_v27  ;;  %788 = vmatpush1.bf16.msra.mxu0 %v4339_v29 }
  0x89   :  { %442 = vmatprep.subr.bf16.mxu1 %v3590_v28  ;;  %789 = vmatprep.subr.bf16.mxu0 %v4342_v30 }
  0x8c   :  { %443 = vmatpush1.bf16.msra.mxu1 %v3592_v31  ;;  %790 = vmatpush1.bf16.msra.mxu0 %v4345_v33 }
  0x8d   :  { %501 = vmatprep.subr.bf16.mxu1 %v3599_v32  ;;  %892 = vmatprep.subr.bf16.mxu0 %v4301_v3 }
  0x8f   :  { %461 = vmatmul.mubr.bf16.vlgmr.msra.gmra.mrb[0].mxu1 %v4348_v34  ;;  %808 = vmatmul.mubr.bf16.vlgmr.msra.gmra.mrb[0].mxu0 %v4155_v38 }
  0x90   :  { %502 = vmatpush1.bf16.msra.mxu1 %v3597_v35  ;;  %470 = vmatprep.mubr.bf16.mxu1 %v5399_v0 }
  0x91   :  { %503 = vmatprep.subr.bf16.mxu1 %v3602_v36  ;;  %893 = vmatpush1.bf16.msra.mxu0 %v4303_v4 }
  0x92   :  { %924 = vmatprep.mubr.bf16.mxu0 %v5399_v0  ;;  %894 = vmatprep.subr.bf16.mxu0 %v4306_v7 }
  0x94   :  { %504 = vmatpush1.bf16.msra.mxu1 %v3600_v37 }
  0x95   :  { %505 = vmatprep.subr.bf16.mxu1 %v3606_v39  ;;  %895 = vmatpush1.bf16.msra.mxu0 %v4309_v8 }
  0x96   :  { %896 = vmatprep.subr.bf16.mxu0 %v4312_v11 }
  0x97   :  { %471 = vmatmul.mubr.bf16.gmra.mrb[4].mxu1 %v3603_v40 }
  0x98   :  { %506 = vmatpush1.bf16.msra.mxu1 %v3604_v41  ;;  %480 = vmatprep.mubr.bf16.mxu1 %v5399_v0 }
  0x99   :  { %507 = vmatprep.subr.bf16.mxu1 %v3609_v42  ;;  %897 = vmatpush1.bf16.msra.mxu0 %v4315_v13 }
  0x9a   :  { %898 = vmatprep.subr.bf16.mxu0 %v4318_v14 }
  0x9c   :  { %508 = vmatpush1.bf16.msra.mxu1 %v3607_v43 }
  0x9d   :  { %509 = vmatprep.subr.bf16.mxu1 %v3613_v44  ;;  %899 = vmatpush1.bf16.msra.mxu0 %v4321_v17 }
  0x9e   :  { %900 = vmatprep.subr.bf16.mxu0 %v4324_v18 }
  0x9f   :  { %481 = vmatmul.mubr.bf16.gmra.mrb[8].mxu1 %v3610_v45 }
  0xa0   :  { %510 = vmatpush1.bf16.msra.mxu1 %v3611_v46  ;;  %490 = vmatprep.mubr.bf16.mxu1 %v5399_v0 }
  0xa1   :  { %511 = vmatprep.subr.bf16.mxu1 %v3616_v47  ;;  %901 = vmatpush1.bf16.msra.mxu0 %v4327_v21 }
  0xa2   :  { %902 = vmatprep.subr.bf16.mxu0 %v4330_v22 }
  0xa4   :  { %512 = vmatpush1.bf16.msra.mxu1 %v3614_v48 }
  0xa5   :  { %513 = vmatprep.subr.bf16.mxu1 %v3620_v49  ;;  %903 = vmatpush1.bf16.msra.mxu0 %v4333_v25 }
  0xa6   :  { %904 = vmatprep.subr.bf16.mxu0 %v4336_v26 }
  0xa7   :  { %491 = vmatmul.mubr.bf16.gmra.mrb[12].mxu1 %v3617_v50 }
  0xa8   :  { %514 = vmatpush1.bf16.msra.mxu1 %v3618_v51  ;;  %533 = vmatprep.mubr.bf16.mxu1 %v5399_v0 }
  0xa9   :  { %515 = vmatprep.subr.bf16.mxu1 %v3623_v52  ;;  %905 = vmatpush1.bf16.msra.mxu0 %v4339_v29 }
  0xaa   :  { %906 = vmatprep.subr.bf16.mxu0 %v4342_v30 }
  0xac   :  { %516 = vmatpush1.bf16.msra.mxu1 %v3621_v53 }
  0xad   :  { %816 = vmatprep.subr.bf16.mxu1 %v4369_v54  ;;  %907 = vmatpush1.bf16.msra.mxu0 %v4345_v33 }
  0xae   :  { %1010 = vmatprep.subr.bf16.mxu0 %v4301_v3 }
  0xaf   :  { %534 = vmatmul.mubr.bf16.vlgmr.msra.gmra.mrb[16].mxu1 %v4348_v34 }
  0xb0   :  { %817 = vmatpush1.bf16.msra.mxu1 %v4373_v55  ;;  %543 = vmatprep.mubr.bf16.mxu1 %v5399_v0 }
  0xb1   :  { %818 = vmatprep.subr.bf16.mxu1 %v4376_v56 }
  0xb4   :  { %819 = vmatpush1.bf16.msra.mxu1 %v4380_v57 }
  0xb5   :  { %820 = vmatprep.subr.bf16.mxu1 %v4384_v58 }
  0xb7   :  { %544 = vmatmul.mubr.bf16.gmra.mrb[20].mxu1 %v3603_v40 }
  0xb8   :  { %821 = vmatpush1.bf16.msra.mxu1 %v4390_v59  ;;  %553 = vmatprep.mubr.bf16.mxu1 %v5399_v0 }
  0xb9   :  { %822 = vmatprep.subr.bf16.mxu1 %v4392_v60 }
  0xbc   :  { %823 = vmatpush1.bf16.msra.mxu1 %v4397_v61 }
  0xbd   :  { %824 = vmatprep.subr.bf16.mxu1 %v4401_v62 }
  0xbf   :  { %554 = vmatmul.mubr.bf16.gmra.mrb[24].mxu1 %v3610_v45 }
  0xc0   :  { %825 = vmatpush1.bf16.msra.mxu1 %v4404_v63  ;;  %563 = vmatprep.mubr.bf16.mxu1 %v5399_v0 }
  0xc1   :  { %826 = vmatprep.subr.bf16.mxu1 %v4407_v1 }
  0xc4   :  { %827 = vmatpush1.bf16.msra.mxu1 %v4410_v2 }
  0xc5   :  { %828 = vmatprep.subr.bf16.mxu1 %v4414_v5 }
  0xc7   :  { %564 = vmatmul.mubr.bf16.gmra.mrb[28].mxu1 %v3617_v50 }
  0xc8   :  { %829 = vmatpush1.bf16.msra.mxu1 %v4417_v6  ;;  %848 = vmatprep.mubr.bf16.mxu1 %v5399_v0 }
  0xc9   :  { %830 = vmatprep.subr.bf16.mxu1 %v4420_v9 }
  0xcc   :  { %831 = vmatpush1.bf16.msra.mxu1 %v4423_v10 }
  0xcd   :  { %933 = vmatprep.subr.bf16.mxu1 %v4369_v54 }
  0xcf   :  { %849 = vmatmul.mubr.bf16.vlgmr.msra.gmra.mrb[32].mxu1 %v4155_v38 }
  0xd0   :  { %934 = vmatpush1.bf16.msra.mxu1 %v4373_v55  ;;  %965 = vmatprep.mubr.bf16.mxu1 %v5399_v0 }
  0xd1   :  { %935 = vmatprep.subr.bf16.mxu1 %v4376_v56 }
  0xd4   :  { %936 = vmatpush1.bf16.msra.mxu1 %v4380_v57 }
  0xd5   :  { %937 = vmatprep.subr.bf16.mxu1 %v4384_v58 }
  0xd8   :  { %938 = vmatpush1.bf16.msra.mxu1 %v4390_v59 }
  0xd9   :  { %939 = vmatprep.subr.bf16.mxu1 %v4392_v60 }
  0xdc   :  { %940 = vmatpush1.bf16.msra.mxu1 %v4397_v61 }
  0xdd   :  { %941 = vmatprep.subr.bf16.mxu1 %v4401_v62 }
  0xe0   :  { %942 = vmatpush1.bf16.msra.mxu1 %v4404_v63 }
  0xe1   :  { %943 = vmatprep.subr.bf16.mxu1 %v4407_v1 }
  0xe4   :  { %944 = vmatpush1.bf16.msra.mxu1 %v4410_v2 }
  0xe5   :  { %945 = vmatprep.subr.bf16.mxu1 %v4414_v5 }
  0xe8   :  { %946 = vmatpush1.bf16.msra.mxu1 %v4417_v6 }
  0xe9   :  { %947 = vmatprep.subr.bf16.mxu1 %v4420_v9 }
  0xec   :  { %948 = vmatpush1.bf16.msra.mxu1 %v4423_v10 }
  0xed   :  { %1051 = vmatprep.subr.bf16.mxu1 %v4369_v54 }
 0x162   :  { %v462_v27 = vpop.f32.mrb[0].mxu1  ;;  %v809_v35 = vpop.f32.mrb[0].mxu0 }
 0x163   :  { %v463_v28 = vadd.f32 %v462_v27, %v227_v23  ;;  %v464_v31 = vpop.f32.mrb[1].mxu1  ;;  %v811_v39 = vpop.f32.mrb[1].mxu0 }
 0x164   :  { %v465_v32 = vadd.f32 %v464_v31, %v231_v24  ;;  %v466_v34 = vpop.f32.mrb[2].mxu1  ;;  %v813_v42 = vpop.f32.mrb[2].mxu0 }
 0x165   :  { %v4458_v36 = vadd.f32 %v466_v34, %v227_v23  ;;  %v857_v37 = vadd.f32 %v809_v35, %v463_v28  ;;  %v468_v38 = vpop.f32.mrb[3].mxu1  ;;  %v814_v43 = vpop.f32.mrb[3].mxu0 }
 0x166   :  { %v4460_v40 = vadd.f32 %v468_v38, %v231_v24  ;;  %v858_v41 = vadd.f32 %v811_v39, %v465_v32 }
 0x16a   :  { %v472_v44 = vpop.f32.mrb[4].mxu1 }
 0x16b   :  { %v4462_v45 = vadd.f32 %v472_v44, %v227_v23  ;;  %v474_v46 = vpop.f32.mrb[5].mxu1 }
 0x16c   :  { %v4464_v47 = vadd.f32 %v474_v46, %v231_v24  ;;  %v476_v48 = vpop.f32.mrb[6].mxu1 }
 0x16d   :  { %v4466_v49 = vadd.f32 %v476_v48, %v227_v23  ;;  %v478_v50 = vpop.f32.mrb[7].mxu1 }
 0x16e   :  { %v4468_v51 = vadd.f32 %v478_v50, %v231_v24  ;;  %v5401_v50 = vsub.s32 2, %v4447_v15 }
 0x170   :  { %5406 = vst [vmem:[#allocation24_spill] sm:$0xff] %v4468_v51 }
 0x172   :  { %v482_v52 = vpop.f32.mrb[8].mxu1 }
 0x173   :  { %v4470_v53 = vadd.f32 %v482_v52, %v227_v23  ;;  %v484_v12 = vpop.f32.mrb[9].mxu1  ;;  %v5404_v52 = vsub.s32 3, %v4447_v15 }
 0x174   :  { %v4472_v27 = vadd.f32 %v484_v12, %v231_v24  ;;  %v486_v28 = vpop.f32.mrb[10].mxu1 }
 0x175   :  { %5407 = vst [vmem:[#allocation25_spill] sm:$0xff] %v4470_v53  ;;  %v4474_v31 = vadd.f32 %v486_v28, %v227_v23  ;;  %v488_v32 = vpop.f32.mrb[11].mxu1  ;;  %v235_v28 = vrot.slane %v222_v19, %v5401_v50 }
 0x176   :  { %5408 = vst [vmem:[#allocation26_spill] sm:$0xff] %v4472_v27  ;;  %v4476_v34 = vadd.f32 %v488_v32, %v231_v24 }
 0x177   :  { %5409 = vst [vmem:[#allocation27_spill] sm:$0xff] %v4474_v31  ;;  %v862_v31 = vmul.f32 0.5, %v857_v37 }
 0x178   :  { %5410 = vst [vmem:[#allocation28_spill] sm:$0xff] %v4476_v34 }
 0x17a   :  { %v492_v35 = vpop.f32.mrb[12].mxu1 }
 0x17b   :  { %v4478_v38 = vadd.f32 %v492_v35, %v227_v23  ;;  %v494_v39 = vpop.f32.mrb[13].mxu1  ;;  %v239_v35 = vrot.slane %v222_v19, %v5404_v52 }
 0x17c   :  { %v4480_v42 = vadd.f32 %v494_v39, %v231_v24  ;;  %v496_v43 = vpop.f32.mrb[14].mxu1 }
 0x17d   :  { %5411 = vst [vmem:[#allocation29_spill] sm:$0xff] %v4478_v38  ;;  %v4482_v44 = vadd.f32 %v496_v43, %v227_v23  ;;  %v498_v46 = vpop.f32.mrb[15].mxu1 }
 0x17e   :  { %5412 = vst [vmem:[#allocation30_spill] sm:$0xff] %v4480_v42  ;;  %v4484_v48 = vadd.f32 %v498_v46, %v231_v24 }
 0x17f   :  { %5413 = vst [vmem:[#allocation31_spill] sm:$0xff] %v4482_v44 }
 0x180   :  { %5414 = vst [vmem:[#allocation32_spill] sm:$0xff] %v4484_v48 }
 0x182   :  { %v535_v12 = vpop.f32.mrb[16].mxu1 }
 0x183   :  { %v537_v32 = vpop.f32.mrb[17].mxu1 }
 0x184   :  { %v539_v39 = vpop.f32.mrb[18].mxu1 }
 0x185   :  { %v4492_v20 = vadd.f32 %v539_v39, %v235_v28  ;;  %v541_v23 = vpop.f32.mrb[19].mxu1 }
 0x186   :  { %v4494_v43 = vadd.f32 %v541_v23, %v239_v35 }
 0x18a   :  { %v545_v24 = vpop.f32.mrb[20].mxu1 }
 0x18b   :  { %v4496_v46 = vadd.f32 %v545_v24, %v235_v28  ;;  %v547_v16 = vpop.f32.mrb[21].mxu1 }
 0x18c   :  { %v4498_v0 = vadd.f32 %v547_v16, %v239_v35  ;;  %v549_v48 = vpop.f32.mrb[22].mxu1  ;;  %v866_v16 = vmul.f32 0.5, %v858_v41 }
 0x18d   :  { %v4500_v44 = vadd.f32 %v549_v48, %v235_v28  ;;  %v551_v50 = vpop.f32.mrb[23].mxu1 }
 0x18e   :  { %v4502_v42 = vadd.f32 %v551_v50, %v239_v35  ;;  %3752 = vtanh.f32 %v866_v16 }
 0x18f   :  { %3754 = vtanh.f32 %v862_v31 }
 0x190   :  { %5415 = vst [vmem:[#allocation33_spill] sm:$0xff] %v4502_v42 }
 0x192   :  { %v555_v15 = vpop.f32.mrb[24].mxu1 }
 0x193   :  { %v4504_v19 = vadd.f32 %v555_v15, %v235_v28  ;;  %v557_v39 = vpop.f32.mrb[25].mxu1 }
 0x194   :  { %v4506_v52 = vadd.f32 %v557_v39, %v239_v35  ;;  %v559_v23 = vpop.f32.mrb[26].mxu1 }
 0x195   :  { %5416 = vst [vmem:[#allocation34_spill] sm:$0xff] %v4504_v19  ;;  %v4508_v38 = vadd.f32 %v559_v23, %v235_v28  ;;  %v561_v24 = vpop.f32.mrb[27].mxu1  ;;  %v536_v23 = vadd.f32 %v535_v12, %v235_v28 }
 0x196   :  { %5417 = vst [vmem:[#allocation35_spill] sm:$0xff] %v4506_v52  ;;  %v4510_v34 = vadd.f32 %v561_v24, %v239_v35 }
 0x197   :  { %5418 = vst [vmem:[#allocation36_spill] sm:$0xff] %v4508_v38  ;;  %v538_v38 = vadd.f32 %v537_v32, %v239_v35 }
 0x198   :  { %5419 = vst [vmem:[#allocation37_spill] sm:$0xff] %v4510_v34  ;;  %v3753_v16 = vpop.eup %3752 }
 0x19a   :  { %v565_v27 = vpop.f32.mrb[28].mxu1 }
 0x19b   :  { %v4512_v48 = vadd.f32 %v565_v27, %v235_v28  ;;  %v567_v50 = vpop.f32.mrb[29].mxu1 }
 0x19c   :  { %v4514_v53 = vadd.f32 %v567_v50, %v239_v35  ;;  %v569_v15 = vpop.f32.mrb[30].mxu1  ;;  %v868_v50 = vadd.f32 1.0, %v3753_v16 }
 0x19d   :  { %5420 = vst [vmem:[#allocation38_spill] sm:$0xff] %v4512_v48  ;;  %v4516_v19 = vadd.f32 %v569_v15, %v235_v28  ;;  %v571_v39 = vpop.f32.mrb[31].mxu1  ;;  %v3755_v48 = vpop.eup %3754 }
 0x19e   :  { %5421 = vst [vmem:[#allocation39_spill] sm:$0xff] %v4514_v53  ;;  %v4518_v52 = vadd.f32 %v571_v39, %v239_v35  ;;  %v864_v51 = vadd.f32 1.0, %v3755_v48  ;;  %v869_v31 = vmul.f32 0.5, %v868_v50 }
 0x19f   :  { %5422 = vst [vmem:[#allocation40_spill] sm:$0xff] %v4516_v19 }
 0x1a0   :  { %5423 = vst [vmem:[#allocation41_spill] sm:$0xff] %v4518_v52  ;;  %v865_v15 = vmul.f32 0.5, %v864_v51  ;;  %v875_v39 = vmul.f32 0.0, %v869_v31  ;;  %v5424_v51 = vmov 0  }
 0x1a2   :  { %v850_v24 = vpop.f32.mrb[32].mxu1 }
 0x1a3   :  { %v859_v34 = vadd.f32 %v850_v24, %v536_v23  ;;  %v852_v41 = vpop.f32.mrb[33].mxu1 }
 0x1a4   :  { %v860_v37 = vadd.f32 %v852_v41, %v538_v38  ;;  %v854_v42 = vpop.f32.mrb[34].mxu1 }
 0x1a5   :  { %3756 = vtanh.f32 %v859_v34  ;;  %v855_v27 = vpop.f32.mrb[35].mxu1 }
 0x1a6   :  { %v871_v53 = vmul.f32 0.5, %v860_v37 }
 0x1a8   :  { %3758 = vtanh.f32 %v871_v53 }
 0x1af   :  { %v3757_v19 = vpop.eup %3756 }
 0x1b0   :  { %v876_v52 = vmul.f32 %v3757_v19, %v865_v15 }
 0x1b2   :  { %v4520_v12 = vadd.f32 %v876_v52, %v875_v39  ;;  %v3759_v28 = vpop.eup %3758 }
 0x1b3   :  { %v873_v38 = vadd.f32 1.0, %v3759_v28 }
 0x1b4   :  { %3760 = vtanh.f32 %v4520_v12 }
 0x1b5   :  { %v874_v42 = vmul.f32 0.5, %v873_v38 }
 0x1be   :  { %v3761_v32 = vpop.eup %3760 }
 0x1bf   :  { %v879_v34 = vmul.f32 %v3761_v32, %v874_v42 }
 0x1c1   :  { %v891_v35 = vpack.c.bf16 %v879_v34, %v879_v34 }
 0x1c3   :  { %925 = vmatmul.mubr.bf16.vlgmr.msra.gmra.mrb[4].mxu0 %v891_v35  ;;  %966 = vmatmul.mubr.bf16.vlgmr.msra.gmra.mrb[36].mxu1 %v891_v35 }
 0x1c4   :  { %1011 = vmatpush1.bf16.msra.mxu0 %v4303_v4  ;;  %1052 = vmatpush1.bf16.msra.mxu1 %v4373_v55 }
 0x1c5   :  { %1012 = vmatprep.subr.bf16.mxu0 %v4306_v7  ;;  %1053 = vmatprep.subr.bf16.mxu1 %v4376_v56 }
 0x1c6   :  { %1042 = vmatprep.mubr.bf16.mxu0 %v5424_v51  ;;  %1083 = vmatprep.mubr.bf16.mxu1 %v5424_v51 }
 0x1c8   :  { %1013 = vmatpush1.bf16.msra.mxu0 %v4309_v8  ;;  %1054 = vmatpush1.bf16.msra.mxu1 %v4380_v57 }
 0x1c9   :  { %1014 = vmatprep.subr.bf16.mxu0 %v4312_v11  ;;  %1055 = vmatprep.subr.bf16.mxu1 %v4384_v58 }
 0x1cc   :  { %1015 = vmatpush1.bf16.msra.mxu0 %v4315_v13  ;;  %1056 = vmatpush1.bf16.msra.mxu1 %v4390_v59 }
 0x1cd   :  { %1016 = vmatprep.subr.bf16.mxu0 %v4318_v14  ;;  %1057 = vmatprep.subr.bf16.mxu1 %v4392_v60 }
 0x1d0   :  { %1017 = vmatpush1.bf16.msra.mxu0 %v4321_v17  ;;  %1058 = vmatpush1.bf16.msra.mxu1 %v4397_v61 }
 0x1d1   :  { %1018 = vmatprep.subr.bf16.mxu0 %v4324_v18  ;;  %1059 = vmatprep.subr.bf16.mxu1 %v4401_v62 }
 0x1d4   :  { %1019 = vmatpush1.bf16.msra.mxu0 %v4327_v21  ;;  %1060 = vmatpush1.bf16.msra.mxu1 %v4404_v63 }
 0x1d5   :  { %1020 = vmatprep.subr.bf16.mxu0 %v4330_v22  ;;  %1061 = vmatprep.subr.bf16.mxu1 %v4407_v1 }
 0x1d8   :  { %1021 = vmatpush1.bf16.msra.mxu0 %v4333_v25  ;;  %1062 = vmatpush1.bf16.msra.mxu1 %v4410_v2 }
 0x1d9   :  { %1022 = vmatprep.subr.bf16.mxu0 %v4336_v26  ;;  %1063 = vmatprep.subr.bf16.mxu1 %v4414_v5 }
 0x1dc   :  { %1023 = vmatpush1.bf16.msra.mxu0 %v4339_v29  ;;  %1064 = vmatpush1.bf16.msra.mxu1 %v4417_v6 }
 0x1dd   :  { %1024 = vmatprep.subr.bf16.mxu0 %v4342_v30  ;;  %1065 = vmatprep.subr.bf16.mxu1 %v4420_v9 }
 0x1e0   :  { %1025 = vmatpush1.bf16.msra.mxu0 %v4345_v33  ;;  %1066 = vmatpush1.bf16.msra.mxu1 %v4423_v10 }
 0x1e1   :  { %1128 = vmatprep.subr.bf16.mxu0 %v4301_v3  ;;  %1169 = vmatprep.subr.bf16.mxu1 %v4369_v54 }
 0x296   :  { %v926_v4 = vpop.f32.mrb[4].mxu0  ;;  %v967_v53 = vpop.f32.mrb[36].mxu1 }
 0x297   :  { %v974_v52 = vadd.f32 %v926_v4, %v4458_v36  ;;  %v976_v19 = vadd.f32 %v967_v53, %v4492_v20  ;;  %v928_v48 = vpop.f32.mrb[5].mxu0  ;;  %v969_v23 = vpop.f32.mrb[37].mxu1 }
 0x298   :  { %v975_v24 = vadd.f32 %v928_v48, %v4460_v40  ;;  %v977_v41 = vadd.f32 %v969_v23, %v4494_v43  ;;  %v930_v37 = vpop.f32.mrb[6].mxu0  ;;  %v971_v16 = vpop.f32.mrb[38].mxu1  ;;  %v4565_v23 = vld [vmem:[#allocation11] ss:$16 sps:$4 sm:$0xff]  }
 0x299   :  { %v979_v27 = vmul.f32 0.5, %v974_v52  ;;  %v931_v50 = vpop.f32.mrb[7].mxu0  ;;  %v972_v31 = vpop.f32.mrb[39].mxu1 }
 0x29a   :  { %v983_v3 = vmul.f32 0.5, %v975_v24  ;;  %v988_v15 = vmul.f32 0.5, %v977_v41 }
 0x29b   :  { %3762 = vtanh.f32 %v979_v27 }
 0x29c   :  { %3764 = vtanh.f32 %v983_v3 }
 0x29d   :  { %3766 = vtanh.f32 %v976_v19 }
 0x29e   :  { %3768 = vtanh.f32 %v988_v15 }
 0x2a5   :  { %v3763_v39 = vpop.eup %3762 }
 0x2a6   :  { %v3765_v36 = vpop.eup %3764  ;;  %v981_v28 = vadd.f32 1.0, %v3763_v39 }
 0x2a7   :  { %v985_v20 = vadd.f32 1.0, %v3765_v36  ;;  %v3767_v42 = vpop.eup %3766 }
 0x2a8   :  { %v982_v38 = vmul.f32 0.5, %v981_v28  ;;  %v3769_v35 = vpop.eup %3768 }
 0x2a9   :  { %v986_v40 = vmul.f32 0.5, %v985_v20  ;;  %v990_v4 = vadd.f32 1.0, %v3769_v35  ;;  %v4639_v35 = vld [vmem:[#allocation11 + $0x84] ss:$16 sps:$4 sm:$0xff]  }
 0x2aa   :  { %v993_v32 = vmul.f32 %v3767_v42, %v982_v38  ;;  %v4613_v38 = vld [vmem:[#allocation11 + $0x24] ss:$16 sps:$4 sm:$0xff]   ;;  %v4619_v42 = vld [vmem:[#allocation11 + $0x20] ss:$16 sps:$4 sm:$0xff]  }
 0x2ab   :  { %v992_v43 = vmul.f32 %v986_v40, %v4520_v12  ;;  %v991_v53 = vmul.f32 0.5, %v990_v4  ;;  %v4623_v40 = vld [vmem:[#allocation11 + $0x44] ss:$16 sps:$4 sm:$0xff]   ;;  %v4643_v4 = vld [vmem:[#allocation11 + $0x80] ss:$16 sps:$4 sm:$0xff]  }
 0x2ad   :  { %v4562_v34 = vadd.f32 %v993_v32, %v992_v43  ;;  %v4627_v32 = vld [vmem:[#allocation11 + $0x40] ss:$16 sps:$4 sm:$0xff]   ;;  %v4631_v43 = vld [vmem:[#allocation11 + $0x64] ss:$16 sps:$4 sm:$0xff]  }
 0x2af   :  { %3770 = vtanh.f32 %v4562_v34 }
 0x2b9   :  { %v3771_v52 = vpop.eup %3770 }
 0x2ba   :  { %v996_v19 = vmul.f32 %v3771_v52, %v991_v53  ;;  %v4647_v53 = vld [vmem:[#allocation11 + $0xa4] ss:$16 sps:$4 sm:$0xff]   ;;  %v4651_v52 = vld [vmem:[#allocation11 + $0xa0] ss:$16 sps:$4 sm:$0xff]  }
 0x2bc   :  { %v1009_v48 = vpack.c.bf16 %v996_v19, %v996_v19  ;;  %v4655_v19 = vld [vmem:[#allocation11 + $0xc4] ss:$16 sps:$4 sm:$0xff]  }
 0x2be   :  { %1043 = vmatmul.mubr.bf16.vlgmr.msra.gmra.mrb[8].mxu0 %v1009_v48  ;;  %1084 = vmatmul.mubr.bf16.vlgmr.msra.gmra.mrb[40].mxu1 %v1009_v48  ;;  %v4659_v48 = vld [vmem:[#allocation11 + $0xc0] ss:$16 sps:$4 sm:$0xff]  }
 0x2bf   :  { %1129 = vmatpush1.bf16.msra.mxu0 %v4565_v23  ;;  %1170 = vmatpush1.bf16.msra.mxu1 %v4373_v55 }
 0x2c0   :  { %1130 = vmatprep.subr.bf16.mxu0 %v4306_v7  ;;  %1171 = vmatprep.subr.bf16.mxu1 %v4376_v56  ;;  %v4599_v7 = vld [vmem:[#allocation11 + $0x4] ss:$16 sps:$4 sm:$0xff]  }
 0x2c1   :  { %1160 = vmatprep.mubr.bf16.mxu0 %v5424_v51  ;;  %1201 = vmatprep.mubr.bf16.mxu1 %v5424_v51 }
 0x2c3   :  { %1131 = vmatpush1.bf16.msra.mxu0 %v4309_v8  ;;  %1172 = vmatpush1.bf16.msra.mxu1 %v4380_v57 }
 0x2c4   :  { %1132 = vmatprep.subr.bf16.mxu0 %v4312_v11  ;;  %1173 = vmatprep.subr.bf16.mxu1 %v4384_v58 }
 0x2c7   :  { %1133 = vmatpush1.bf16.msra.mxu0 %v4315_v13  ;;  %1174 = vmatpush1.bf16.msra.mxu1 %v4390_v59 }
 0x2c8   :  { %1134 = vmatprep.subr.bf16.mxu0 %v4318_v14  ;;  %1175 = vmatprep.subr.bf16.mxu1 %v4392_v60 }
 0x2cb   :  { %1135 = vmatpush1.bf16.msra.mxu0 %v4321_v17  ;;  %1176 = vmatpush1.bf16.msra.mxu1 %v4397_v61 }
 0x2cc   :  { %1136 = vmatprep.subr.bf16.mxu0 %v4324_v18  ;;  %1177 = vmatprep.subr.bf16.mxu1 %v4401_v62 }
 0x2cf   :  { %1137 = vmatpush1.bf16.msra.mxu0 %v4327_v21  ;;  %1178 = vmatpush1.bf16.msra.mxu1 %v4404_v63 }
 0x2d0   :  { %1138 = vmatprep.subr.bf16.mxu0 %v4330_v22  ;;  %1179 = vmatprep.subr.bf16.mxu1 %v4407_v1 }
 0x2d3   :  { %1139 = vmatpush1.bf16.msra.mxu0 %v4333_v25  ;;  %1180 = vmatpush1.bf16.msra.mxu1 %v4410_v2 }
 0x2d4   :  { %1140 = vmatprep.subr.bf16.mxu0 %v4336_v26  ;;  %1181 = vmatprep.subr.bf16.mxu1 %v4414_v5 }
 0x2d7   :  { %1141 = vmatpush1.bf16.msra.mxu0 %v4339_v29  ;;  %1182 = vmatpush1.bf16.msra.mxu1 %v4417_v6 }
 0x2d8   :  { %1142 = vmatprep.subr.bf16.mxu0 %v4342_v30  ;;  %1183 = vmatprep.subr.bf16.mxu1 %v4420_v9 }
 0x2db   :  { %1143 = vmatpush1.bf16.msra.mxu0 %v4345_v33  ;;  %1184 = vmatpush1.bf16.msra.mxu1 %v4423_v10 }
 0x2dc   :  { %1246 = vmatprep.subr.bf16.mxu0 %v4599_v7  ;;  %1287 = vmatprep.subr.bf16.mxu1 %v4369_v54 }
 0x391   :  { %v1044_v8 = vpop.f32.mrb[8].mxu0  ;;  %v1085_v11 = vpop.f32.mrb[40].mxu1 }
 0x392   :  { %v1092_v13 = vadd.f32 %v1044_v8, %v4462_v45  ;;  %v1094_v14 = vadd.f32 %v1085_v11, %v4496_v46  ;;  %v1046_v17 = vpop.f32.mrb[9].mxu0  ;;  %v1087_v18 = vpop.f32.mrb[41].mxu1  ;;  %v4663_v8 = vld [vmem:[#allocation11 + $0xe4] ss:$16 sps:$4 sm:$0xff]   ;;  %v4667_v11 = vld [vmem:[#allocation11 + $0xe0] ss:$16 sps:$4 sm:$0xff]  }
 0x393   :  { %v1093_v21 = vadd.f32 %v1046_v17, %v4464_v47  ;;  %v1095_v22 = vadd.f32 %v1087_v18, %v4498_v0  ;;  %v1048_v25 = vpop.f32.mrb[10].mxu0  ;;  %v1089_v26 = vpop.f32.mrb[42].mxu1 }
 0x394   :  { %v1097_v29 = vmul.f32 0.5, %v1092_v13  ;;  %v1049_v30 = vpop.f32.mrb[11].mxu0  ;;  %v1090_v33 = vpop.f32.mrb[43].mxu1  ;;  %v5425_v25 = vld [vmem:[#allocation24_spill] sm:$0xff] }
 0x395   :  { %v1101_v12 = vmul.f32 0.5, %v1093_v21  ;;  %v1106_v24 = vmul.f32 0.5, %v1095_v22 }
 0x396   :  { %3772 = vtanh.f32 %v1097_v29  ;;  %v5426_v29 = vld [vmem:[#allocation33_spill] sm:$0xff] }
 0x397   :  { %3774 = vtanh.f32 %v1101_v12 }
 0x398   :  { %3776 = vtanh.f32 %v1094_v14 }
 0x399   :  { %3778 = vtanh.f32 %v1106_v24 }
 0x3a0   :  { %v3773_v41 = vpop.eup %3772 }
 0x3a1   :  { %v3775_v45 = vpop.eup %3774  ;;  %v1099_v37 = vadd.f32 1.0, %v3773_v41 }
 0x3a2   :  { %v1103_v46 = vadd.f32 1.0, %v3775_v45  ;;  %v3777_v27 = vpop.eup %3776 }
 0x3a3   :  { %v1100_v16 = vmul.f32 0.5, %v1099_v37  ;;  %v3779_v3 = vpop.eup %3778 }
 0x3a4   :  { %v1104_v47 = vmul.f32 0.5, %v1103_v46  ;;  %v1108_v15 = vadd.f32 1.0, %v3779_v3 }
 0x3a5   :  { %v1111_v50 = vmul.f32 %v3777_v27, %v1100_v16 }
 0x3a6   :  { %v1110_v0 = vmul.f32 %v1104_v47, %v4562_v34  ;;  %v1109_v39 = vmul.f32 0.5, %v1108_v15  ;;  %v4635_v34 = vld [vmem:[#allocation11 + $0x60] ss:$16 sps:$4 sm:$0xff]  }
 0x3a8   :  { %v4608_v31 = vadd.f32 %v1111_v50, %v1110_v0 }
 0x3aa   :  { %3780 = vtanh.f32 %v4608_v31 }
 0x3b4   :  { %v3781_v36 = vpop.eup %3780 }
 0x3b5   :  { %v1114_v28 = vmul.f32 %v3781_v36, %v1109_v39 }
 0x3b7   :  { %v1127_v20 = vpack.c.bf16 %v1114_v28, %v1114_v28 }
 0x3b9   :  { %1161 = vmatmul.mubr.bf16.vlgmr.msra.gmra.mrb[12].mxu0 %v1127_v20  ;;  %1202 = vmatmul.mubr.bf16.vlgmr.msra.gmra.mrb[44].mxu1 %v1127_v20 }
 0x3ba   :  { %1247 = vmatpush1.bf16.msra.mxu0 %v4565_v23  ;;  %1288 = vmatpush1.bf16.msra.mxu1 %v4373_v55 }
 0x3bb   :  { %1248 = vmatprep.subr.bf16.mxu0 %v4613_v38  ;;  %1289 = vmatprep.subr.bf16.mxu1 %v4376_v56 }
 0x3bc   :  { %1278 = vmatprep.mubr.bf16.mxu0 %v5424_v51  ;;  %1319 = vmatprep.mubr.bf16.mxu1 %v5424_v51 }
 0x3be   :  { %1249 = vmatpush1.bf16.msra.mxu0 %v4619_v42  ;;  %1290 = vmatpush1.bf16.msra.mxu1 %v4380_v57 }
 0x3bf   :  { %1250 = vmatprep.subr.bf16.mxu0 %v4623_v40  ;;  %1291 = vmatprep.subr.bf16.mxu1 %v4384_v58 }
 0x3c2   :  { %1251 = vmatpush1.bf16.msra.mxu0 %v4627_v32  ;;  %1292 = vmatpush1.bf16.msra.mxu1 %v4390_v59 }
 0x3c3   :  { %1252 = vmatprep.subr.bf16.mxu0 %v4631_v43  ;;  %1293 = vmatprep.subr.bf16.mxu1 %v4392_v60 }
 0x3c6   :  { %1253 = vmatpush1.bf16.msra.mxu0 %v4635_v34  ;;  %1294 = vmatpush1.bf16.msra.mxu1 %v4397_v61 }
 0x3c7   :  { %1254 = vmatprep.subr.bf16.mxu0 %v4639_v35  ;;  %1295 = vmatprep.subr.bf16.mxu1 %v4401_v62 }
 0x3ca   :  { %1255 = vmatpush1.bf16.msra.mxu0 %v4643_v4  ;;  %1296 = vmatpush1.bf16.msra.mxu1 %v4404_v63 }
 0x3cb   :  { %1256 = vmatprep.subr.bf16.mxu0 %v4647_v53  ;;  %1297 = vmatprep.subr.bf16.mxu1 %v4407_v1 }
 0x3ce   :  { %1257 = vmatpush1.bf16.msra.mxu0 %v4651_v52  ;;  %1298 = vmatpush1.bf16.msra.mxu1 %v4410_v2 }
 0x3cf   :  { %1258 = vmatprep.subr.bf16.mxu0 %v4655_v19  ;;  %1299 = vmatprep.subr.bf16.mxu1 %v4414_v5 }
 0x3d2   :  { %1259 = vmatpush1.bf16.msra.mxu0 %v4659_v48  ;;  %1300 = vmatpush1.bf16.msra.mxu1 %v4417_v6 }
 0x3d3   :  { %1260 = vmatprep.subr.bf16.mxu0 %v4663_v8  ;;  %1301 = vmatprep.subr.bf16.mxu1 %v4420_v9 }
 0x3d6   :  { %1261 = vmatpush1.bf16.msra.mxu0 %v4667_v11  ;;  %1302 = vmatpush1.bf16.msra.mxu1 %v4423_v10 }
 0x3d7   :  { %1364 = vmatprep.subr.bf16.mxu0 %v4599_v7  ;;  %1405 = vmatprep.subr.bf16.mxu1 %v4369_v54 }
 0x48c   :  { %v1162_v13 = vpop.f32.mrb[12].mxu0  ;;  %v1203_v14 = vpop.f32.mrb[44].mxu1 }
 0x48d   :  { %v1210_v17 = vadd.f32 %v1162_v13, %v4466_v49  ;;  %v1212_v18 = vadd.f32 %v1203_v14, %v4500_v44  ;;  %v1164_v21 = vpop.f32.mrb[13].mxu0  ;;  %v1205_v22 = vpop.f32.mrb[45].mxu1 }
 0x48e   :  { %v1211_v26 = vadd.f32 %v1164_v21, %v5425_v25  ;;  %v1213_v30 = vadd.f32 %v1205_v22, %v5426_v29  ;;  %v1166_v33 = vpop.f32.mrb[14].mxu0  ;;  %v1207_v12 = vpop.f32.mrb[46].mxu1  ;;  %v5427_v21 = vld [vmem:[#allocation25_spill] sm:$0xff]  ;;  %v5428_v25 = vld [vmem:[#allocation34_spill] sm:$0xff] }
 0x48f   :  { %v1215_v24 = vmul.f32 0.5, %v1210_v17  ;;  %v1167_v41 = vpop.f32.mrb[15].mxu0  ;;  %v1208_v45 = vpop.f32.mrb[47].mxu1  ;;  %v5429_v33 = vld [vmem:[#allocation26_spill] sm:$0xff] }
 0x490   :  { %v1219_v37 = vmul.f32 0.5, %v1211_v26  ;;  %v1224_v46 = vmul.f32 0.5, %v1213_v30 }
 0x491   :  { %3782 = vtanh.f32 %v1215_v24  ;;  %v5430_v24 = vld [vmem:[#allocation35_spill] sm:$0xff] }
 0x492   :  { %3784 = vtanh.f32 %v1219_v37 }
 0x493   :  { %3786 = vtanh.f32 %v1212_v18 }
 0x494   :  { %3788 = vtanh.f32 %v1224_v46 }
 0x49b   :  { %v3783_v16 = vpop.eup %3782 }
 0x49c   :  { %v3785_v49 = vpop.eup %3784  ;;  %v1217_v27 = vadd.f32 1.0, %v3783_v16 }
 0x49d   :  { %v1221_v44 = vadd.f32 1.0, %v3785_v49  ;;  %v3787_v50 = vpop.eup %3786 }
 0x49e   :  { %v1218_v47 = vmul.f32 0.5, %v1217_v27  ;;  %v3789_v36 = vpop.eup %3788 }
 0x49f   :  { %v1222_v0 = vmul.f32 0.5, %v1221_v44  ;;  %v1226_v28 = vadd.f32 1.0, %v3789_v36 }
 0x4a0   :  { %v1229_v3 = vmul.f32 %v3787_v50, %v1218_v47 }
 0x4a1   :  { %v1228_v15 = vmul.f32 %v1222_v0, %v4608_v31  ;;  %v1227_v20 = vmul.f32 0.5, %v1226_v28 }
 0x4a3   :  { %v4678_v39 = vadd.f32 %v1229_v3, %v1228_v15 }
 0x4a5   :  { %3790 = vtanh.f32 %v4678_v39 }
 0x4af   :  { %v3791_v13 = vpop.eup %3790 }
 0x4b0   :  { %v1232_v14 = vmul.f32 %v3791_v13, %v1227_v20 }
 0x4b2   :  { %v1245_v17 = vpack.c.bf16 %v1232_v14, %v1232_v14 }
 0x4b4   :  { %1279 = vmatmul.mubr.bf16.vlgmr.msra.gmra.mrb[16].mxu0 %v1245_v17  ;;  %1320 = vmatmul.mubr.bf16.vlgmr.msra.gmra.mrb[48].mxu1 %v1245_v17 }
 0x4b5   :  { %1365 = vmatpush1.bf16.msra.mxu0 %v4565_v23  ;;  %1406 = vmatpush1.bf16.msra.mxu1 %v4373_v55 }
 0x4b6   :  { %1366 = vmatprep.subr.bf16.mxu0 %v4613_v38  ;;  %1407 = vmatprep.subr.bf16.mxu1 %v4376_v56 }
 0x4b7   :  { %1396 = vmatprep.mubr.bf16.mxu0 %v5424_v51  ;;  %1437 = vmatprep.mubr.bf16.mxu1 %v5424_v51 }
 0x4b9   :  { %1367 = vmatpush1.bf16.msra.mxu0 %v4619_v42  ;;  %1408 = vmatpush1.bf16.msra.mxu1 %v4380_v57 }
 0x4ba   :  { %1368 = vmatprep.subr.bf16.mxu0 %v4623_v40  ;;  %1409 = vmatprep.subr.bf16.mxu1 %v4384_v58 }
 0x4bd   :  { %1369 = vmatpush1.bf16.msra.mxu0 %v4627_v32  ;;  %1410 = vmatpush1.bf16.msra.mxu1 %v4390_v59 }
 0x4be   :  { %1370 = vmatprep.subr.bf16.mxu0 %v4631_v43  ;;  %1411 = vmatprep.subr.bf16.mxu1 %v4392_v60 }
 0x4c1   :  { %1371 = vmatpush1.bf16.msra.mxu0 %v4635_v34  ;;  %1412 = vmatpush1.bf16.msra.mxu1 %v4397_v61 }
 0x4c2   :  { %1372 = vmatprep.subr.bf16.mxu0 %v4639_v35  ;;  %1413 = vmatprep.subr.bf16.mxu1 %v4401_v62 }
 0x4c5   :  { %1373 = vmatpush1.bf16.msra.mxu0 %v4643_v4  ;;  %1414 = vmatpush1.bf16.msra.mxu1 %v4404_v63 }
 0x4c6   :  { %1374 = vmatprep.subr.bf16.mxu0 %v4647_v53  ;;  %1415 = vmatprep.subr.bf16.mxu1 %v4407_v1 }
 0x4c9   :  { %1375 = vmatpush1.bf16.msra.mxu0 %v4651_v52  ;;  %1416 = vmatpush1.bf16.msra.mxu1 %v4410_v2 }
 0x4ca   :  { %1376 = vmatprep.subr.bf16.mxu0 %v4655_v19  ;;  %1417 = vmatprep.subr.bf16.mxu1 %v4414_v5 }
 0x4cd   :  { %1377 = vmatpush1.bf16.msra.mxu0 %v4659_v48  ;;  %1418 = vmatpush1.bf16.msra.mxu1 %v4417_v6 }
 0x4ce   :  { %1378 = vmatprep.subr.bf16.mxu0 %v4663_v8  ;;  %1419 = vmatprep.subr.bf16.mxu1 %v4420_v9 }
 0x4d1   :  { %1379 = vmatpush1.bf16.msra.mxu0 %v4667_v11  ;;  %1420 = vmatpush1.bf16.msra.mxu1 %v4423_v10 }
 0x4d2   :  { %1482 = vmatprep.subr.bf16.mxu0 %v4599_v7  ;;  %1523 = vmatprep.subr.bf16.mxu1 %v4369_v54 }
 0x587   :  { %v1280_v31 = vpop.f32.mrb[16].mxu0  ;;  %v1321_v18 = vpop.f32.mrb[48].mxu1 }
 0x588   :  { %v1328_v22 = vadd.f32 %v1280_v31, %v5427_v21  ;;  %v1330_v26 = vadd.f32 %v1321_v18, %v5428_v25  ;;  %v1282_v29 = vpop.f32.mrb[17].mxu0  ;;  %v1323_v30 = vpop.f32.mrb[49].mxu1 }
 0x589   :  { %v1329_v12 = vadd.f32 %v1282_v29, %v5429_v33  ;;  %v1331_v41 = vadd.f32 %v1323_v30, %v5430_v24  ;;  %v1284_v45 = vpop.f32.mrb[18].mxu0  ;;  %v1325_v37 = vpop.f32.mrb[50].mxu1 }
 0x58a   :  { %v1333_v46 = vmul.f32 0.5, %v1328_v22  ;;  %v1285_v16 = vpop.f32.mrb[19].mxu0  ;;  %v1326_v49 = vpop.f32.mrb[51].mxu1 }
 0x58b   :  { %v1337_v27 = vmul.f32 0.5, %v1329_v12  ;;  %v1342_v54 = vmul.f32 0.5, %v1331_v41 }
 0x58c   :  { %3792 = vtanh.f32 %v1333_v46 }
 0x58d   :  { %3794 = vtanh.f32 %v1337_v27 }
 0x58e   :  { %3796 = vtanh.f32 %v1330_v26 }
 0x58f   :  { %3798 = vtanh.f32 %v1342_v54 }
 0x596   :  { %v3793_v44 = vpop.eup %3792 }
 0x597   :  { %v3795_v47 = vpop.eup %3794  ;;  %v1335_v50 = vadd.f32 1.0, %v3793_v44 }
 0x598   :  { %v1339_v0 = vadd.f32 1.0, %v3795_v47  ;;  %v3797_v15 = vpop.eup %3796 }
 0x599   :  { %v1336_v3 = vmul.f32 0.5, %v1335_v50  ;;  %v3799_v14 = vpop.eup %3798 }
 0x59a   :  { %v1340_v36 = vmul.f32 0.5, %v1339_v0  ;;  %v1344_v17 = vadd.f32 1.0, %v3799_v14 }
 0x59b   :  { %v1347_v28 = vmul.f32 %v3797_v15, %v1336_v3  ;;  %v3929_v3 = vld [vmem:[#allocation11 + $0x8] ss:$16 sps:$4 sm:$0xff]   ;;  %v3930_v15 = vld [vmem:[#allocation11 + $0x2c] ss:$16 sps:$4 sm:$0xff]  }
 0x59c   :  { %v1346_v20 = vmul.f32 %v1340_v36, %v4678_v39  ;;  %v1345_v31 = vmul.f32 0.5, %v1344_v17  ;;  %v3931_v36 = vld [vmem:[#allocation11 + $0x28] ss:$16 sps:$4 sm:$0xff]   ;;  %v5435_v17 = vld [vmem:[#allocation29_spill] sm:$0xff] }
 0x59e   :  { %v4720_v13 = vadd.f32 %v1347_v28, %v1346_v20  ;;  %v3932_v28 = vld [vmem:[#allocation11 + $0x4c] ss:$16 sps:$4 sm:$0xff]   ;;  %v3935_v20 = vld [vmem:[#allocation11 + $0x68] ss:$16 sps:$4 sm:$0xff]  }
 0x5a0   :  { %3800 = vtanh.f32 %v4720_v13 }
 0x5aa   :  { %v3801_v18 = vpop.eup %3800 }
 0x5ab   :  { %v1350_v21 = vmul.f32 %v3801_v18, %v1345_v31  ;;  %v5436_v18 = vld [vmem:[#allocation38_spill] sm:$0xff] }
 0x5ad   :  { %v1363_v22 = vpack.c.bf16 %v1350_v21, %v1350_v21 }
 0x5af   :  { %1397 = vmatmul.mubr.bf16.vlgmr.msra.gmra.mrb[20].mxu0 %v1363_v22  ;;  %1438 = vmatmul.mubr.bf16.vlgmr.msra.gmra.mrb[52].mxu1 %v1363_v22 }
 0x5b0   :  { %1483 = vmatpush1.bf16.msra.mxu0 %v4565_v23  ;;  %1524 = vmatpush1.bf16.msra.mxu1 %v4373_v55  ;;  %v3928_v55 = vld [vmem:[#allocation11 + $0xc] ss:$16 sps:$4 sm:$0xff]  }
 0x5b1   :  { %1484 = vmatprep.subr.bf16.mxu0 %v4613_v38  ;;  %1525 = vmatprep.subr.bf16.mxu1 %v4376_v56 }
 0x5b2   :  { %1514 = vmatprep.mubr.bf16.mxu0 %v5424_v51  ;;  %1555 = vmatprep.mubr.bf16.mxu1 %v5424_v51 }
 0x5b4   :  { %1485 = vmatpush1.bf16.msra.mxu0 %v4619_v42  ;;  %1526 = vmatpush1.bf16.msra.mxu1 %v4380_v57 }
 0x5b5   :  { %1486 = vmatprep.subr.bf16.mxu0 %v4623_v40  ;;  %1527 = vmatprep.subr.bf16.mxu1 %v4384_v58  ;;  %v5431_v58 = vld [vmem:[#allocation27_spill] sm:$0xff] }
 0x5b8   :  { %1487 = vmatpush1.bf16.msra.mxu0 %v4627_v32  ;;  %1528 = vmatpush1.bf16.msra.mxu1 %v4390_v59 }
 0x5b9   :  { %1488 = vmatprep.subr.bf16.mxu0 %v4631_v43  ;;  %1529 = vmatprep.subr.bf16.mxu1 %v4392_v60  ;;  %v5432_v60 = vld [vmem:[#allocation36_spill] sm:$0xff] }
 0x5bc   :  { %1489 = vmatpush1.bf16.msra.mxu0 %v4635_v34  ;;  %1530 = vmatpush1.bf16.msra.mxu1 %v4397_v61 }
 0x5bd   :  { %1490 = vmatprep.subr.bf16.mxu0 %v4639_v35  ;;  %1531 = vmatprep.subr.bf16.mxu1 %v4401_v62 }
 0x5c0   :  { %1491 = vmatpush1.bf16.msra.mxu0 %v4643_v4  ;;  %1532 = vmatpush1.bf16.msra.mxu1 %v4404_v63 }
 0x5c1   :  { %1492 = vmatprep.subr.bf16.mxu0 %v4647_v53  ;;  %1533 = vmatprep.subr.bf16.mxu1 %v4407_v1  ;;  %v5433_v1 = vld [vmem:[#allocation28_spill] sm:$0xff] }
 0x5c4   :  { %1493 = vmatpush1.bf16.msra.mxu0 %v4651_v52  ;;  %1534 = vmatpush1.bf16.msra.mxu1 %v4410_v2 }
 0x5c5   :  { %1494 = vmatprep.subr.bf16.mxu0 %v4655_v19  ;;  %1535 = vmatprep.subr.bf16.mxu1 %v4414_v5  ;;  %v5434_v5 = vld [vmem:[#allocation37_spill] sm:$0xff] }
 0x5c8   :  { %1495 = vmatpush1.bf16.msra.mxu0 %v4659_v48  ;;  %1536 = vmatpush1.bf16.msra.mxu1 %v4417_v6 }
 0x5c9   :  { %1496 = vmatprep.subr.bf16.mxu0 %v4663_v8  ;;  %1537 = vmatprep.subr.bf16.mxu1 %v4420_v9 }
 0x5cc   :  { %1497 = vmatpush1.bf16.msra.mxu0 %v4667_v11  ;;  %1538 = vmatpush1.bf16.msra.mxu1 %v4423_v10 }
 0x5cd   :  { %1600 = vmatprep.subr.bf16.mxu0 %v4599_v7  ;;  %1641 = vmatprep.subr.bf16.mxu1 %v3928_v55  ;;  %v5437_v55 = vld [vmem:[#allocation30_spill] sm:$0xff] }
 0x682   :  { %v1398_v56 = vpop.f32.mrb[20].mxu0  ;;  %v1439_v57 = vpop.f32.mrb[52].mxu1 }
 0x683   :  { %v1446_v59 = vadd.f32 %v1398_v56, %v5431_v58  ;;  %v1448_v61 = vadd.f32 %v1439_v57, %v5432_v60  ;;  %v1400_v62 = vpop.f32.mrb[21].mxu0  ;;  %v1441_v63 = vpop.f32.mrb[53].mxu1  ;;  %v5438_v56 = vld [vmem:[#allocation39_spill] sm:$0xff] }
 0x684   :  { %v1447_v2 = vadd.f32 %v1400_v62, %v5433_v1  ;;  %v1449_v6 = vadd.f32 %v1441_v63, %v5434_v5  ;;  %v1402_v9 = vpop.f32.mrb[22].mxu0  ;;  %v1443_v39 = vpop.f32.mrb[54].mxu1 }
 0x685   :  { %v1451_v25 = vmul.f32 0.5, %v1446_v59  ;;  %v1403_v10 = vpop.f32.mrb[23].mxu0  ;;  %v1444_v26 = vpop.f32.mrb[55].mxu1 }
 0x686   :  { %v1455_v7 = vmul.f32 0.5, %v1447_v2  ;;  %v1460_v29 = vmul.f32 0.5, %v1449_v6 }
 0x687   :  { %3802 = vtanh.f32 %v1451_v25 }
 0x688   :  { %3804 = vtanh.f32 %v1455_v7 }
 0x689   :  { %3806 = vtanh.f32 %v1448_v61 }
 0x68a   :  { %3808 = vtanh.f32 %v1460_v29 }
 0x691   :  { %v3803_v30 = vpop.eup %3802 }
 0x692   :  { %v3805_v33 = vpop.eup %3804  ;;  %v1453_v12 = vadd.f32 1.0, %v3803_v30 }
 0x693   :  { %v1457_v24 = vadd.f32 1.0, %v3805_v33  ;;  %v3807_v45 = vpop.eup %3806 }
 0x694   :  { %v1454_v41 = vmul.f32 0.5, %v1453_v12  ;;  %v3809_v27 = vpop.eup %3808 }
 0x695   :  { %v1458_v37 = vmul.f32 0.5, %v1457_v24  ;;  %v1462_v54 = vadd.f32 1.0, %v3809_v27  ;;  %v3654_v27 = vld [vmem:[#allocation12 + $0x20] ss:$16 sps:$4 sm:$0xff]  }
 0x696   :  { %v1465_v46 = vmul.f32 %v3807_v45, %v1454_v41  ;;  %v3648_v41 = vld [vmem:[#allocation12] ss:$16 sps:$4 sm:$0xff]   ;;  %v3651_v45 = vld [vmem:[#allocation12 + $0x8] ss:$16 sps:$4 sm:$0xff]  }
 0x697   :  { %v1464_v16 = vmul.f32 %v1458_v37, %v4720_v13  ;;  %v1463_v44 = vmul.f32 0.5, %v1462_v54  ;;  %v3650_v13 = vld [vmem:[#allocation12 + $0x4] ss:$16 sps:$4 sm:$0xff]  }
 0x698   :  { %v3662_v54 = vld [vmem:[#allocation12 + $0x44] ss:$16 sps:$4 sm:$0xff]  }
 0x699   :  { %v4761_v49 = vadd.f32 %v1465_v46, %v1464_v16  ;;  %v3656_v46 = vld [vmem:[#allocation12 + $0x24] ss:$16 sps:$4 sm:$0xff]   ;;  %v3659_v16 = vld [vmem:[#allocation12 + $0x2c] ss:$16 sps:$4 sm:$0xff]  }
 0x69b   :  { %3810 = vtanh.f32 %v4761_v49 }
 0x6a5   :  { %v3811_v47 = vpop.eup %3810 }
 0x6a6   :  { %v1468_v50 = vmul.f32 %v3811_v47, %v1463_v44  ;;  %v3665_v44 = vld [vmem:[#allocation12 + $0x4c] ss:$16 sps:$4 sm:$0xff]   ;;  %v3660_v47 = vld [vmem:[#allocation12 + $0x40] ss:$16 sps:$4 sm:$0xff]  }
 0x6a8   :  { %v1481_v0 = vpack.c.bf16 %v1468_v50, %v1468_v50  ;;  %v3663_v50 = vld [vmem:[#allocation12 + $0x48] ss:$16 sps:$4 sm:$0xff]  }
 0x6aa   :  { %1515 = vmatmul.mubr.bf16.vlgmr.msra.gmra.mrb[24].mxu0 %v1481_v0  ;;  %1556 = vmatmul.mubr.bf16.vlgmr.msra.gmra.mrb[56].mxu1 %v1481_v0  ;;  %v3668_v0 = vld [vmem:[#allocation12 + $0x64] ss:$16 sps:$4 sm:$0xff]  }
 0x6ab   :  { %1601 = vmatpush1.bf16.msra.mxu0 %v4565_v23  ;;  %1642 = vmatpush1.bf16.msra.mxu1 %v3929_v3  ;;  %v3933_v23 = vld [vmem:[#allocation11 + $0x48] ss:$16 sps:$4 sm:$0xff]   ;;  %v3671_v3 = vld [vmem:[#allocation12 + $0x6c] ss:$16 sps:$4 sm:$0xff]  }
 0x6ac   :  { %1602 = vmatprep.subr.bf16.mxu0 %v4613_v38  ;;  %1643 = vmatprep.subr.bf16.mxu1 %v3930_v15  ;;  %v3934_v38 = vld [vmem:[#allocation11 + $0x6c] ss:$16 sps:$4 sm:$0xff]   ;;  %v3666_v15 = vld [vmem:[#allocation12 + $0x60] ss:$16 sps:$4 sm:$0xff]  }
 0x6ad   :  { %1632 = vmatprep.mubr.bf16.mxu0 %v5424_v51  ;;  %1673 = vmatprep.mubr.bf16.mxu1 %v5424_v51 }
 0x6af   :  { %1603 = vmatpush1.bf16.msra.mxu0 %v4619_v42  ;;  %1644 = vmatpush1.bf16.msra.mxu1 %v3931_v36  ;;  %v3936_v42 = vld [vmem:[#allocation11 + $0x8c] ss:$16 sps:$4 sm:$0xff]   ;;  %v3669_v36 = vld [vmem:[#allocation12 + $0x68] ss:$16 sps:$4 sm:$0xff]  }
 0x6b0   :  { %1604 = vmatprep.subr.bf16.mxu0 %v4623_v40  ;;  %1645 = vmatprep.subr.bf16.mxu1 %v3932_v28  ;;  %v3937_v40 = vld [vmem:[#allocation11 + $0x88] ss:$16 sps:$4 sm:$0xff]   ;;  %v3674_v28 = vld [vmem:[#allocation12 + $0x84] ss:$16 sps:$4 sm:$0xff]  }
 0x6b3   :  { %1605 = vmatpush1.bf16.msra.mxu0 %v4627_v32  ;;  %1646 = vmatpush1.bf16.msra.mxu1 %v3933_v23  ;;  %v3938_v32 = vld [vmem:[#allocation11 + $0xac] ss:$16 sps:$4 sm:$0xff]  }
 0x6b4   :  { %1606 = vmatprep.subr.bf16.mxu0 %v4631_v43  ;;  %1647 = vmatprep.subr.bf16.mxu1 %v3934_v38  ;;  %v3939_v43 = vld [vmem:[#allocation11 + $0xa8] ss:$16 sps:$4 sm:$0xff]   ;;  %v3677_v23 = vld [vmem:[#allocation12 + $0x8c] ss:$16 sps:$4 sm:$0xff]   ;;  %v3672_v38 = vld [vmem:[#allocation12 + $0x80] ss:$16 sps:$4 sm:$0xff]  }
 0x6b7   :  { %1607 = vmatpush1.bf16.msra.mxu0 %v4635_v34  ;;  %1648 = vmatpush1.bf16.msra.mxu1 %v3935_v20  ;;  %v3940_v34 = vld [vmem:[#allocation11 + $0xcc] ss:$16 sps:$4 sm:$0xff]   ;;  %v3675_v20 = vld [vmem:[#allocation12 + $0x88] ss:$16 sps:$4 sm:$0xff]  }
 0x6b8   :  { %1608 = vmatprep.subr.bf16.mxu0 %v4639_v35  ;;  %1649 = vmatprep.subr.bf16.mxu1 %v3936_v42  ;;  %v3941_v35 = vld [vmem:[#allocation11 + $0xc8] ss:$16 sps:$4 sm:$0xff]   ;;  %v3680_v42 = vld [vmem:[#allocation12 + $0xa4] ss:$16 sps:$4 sm:$0xff]  }
 0x6bb   :  { %1609 = vmatpush1.bf16.msra.mxu0 %v4643_v4  ;;  %1650 = vmatpush1.bf16.msra.mxu1 %v3937_v40  ;;  %v3942_v4 = vld [vmem:[#allocation11 + $0xec] ss:$16 sps:$4 sm:$0xff]  }
 0x6bc   :  { %1610 = vmatprep.subr.bf16.mxu0 %v4647_v53  ;;  %1651 = vmatprep.subr.bf16.mxu1 %v3938_v32  ;;  %v3943_v53 = vld [vmem:[#allocation11 + $0xe8] ss:$16 sps:$4 sm:$0xff]   ;;  %v3683_v40 = vld [vmem:[#allocation12 + $0xac] ss:$16 sps:$4 sm:$0xff]   ;;  %v3678_v32 = vld [vmem:[#allocation12 + $0xa0] ss:$16 sps:$4 sm:$0xff]  }
 0x6bf   :  { %1611 = vmatpush1.bf16.msra.mxu0 %v4651_v52  ;;  %1652 = vmatpush1.bf16.msra.mxu1 %v3939_v43  ;;  %v3653_v52 = vld [vmem:[#allocation12 + $0xc] ss:$16 sps:$4 sm:$0xff]   ;;  %v3681_v43 = vld [vmem:[#allocation12 + $0xa8] ss:$16 sps:$4 sm:$0xff]  }
 0x6c0   :  { %1612 = vmatprep.subr.bf16.mxu0 %v4655_v19  ;;  %1653 = vmatprep.subr.bf16.mxu1 %v3940_v34  ;;  %v3686_v34 = vld [vmem:[#allocation12 + $0xc4] ss:$16 sps:$4 sm:$0xff]  }
 0x6c3   :  { %1613 = vmatpush1.bf16.msra.mxu0 %v4659_v48  ;;  %1654 = vmatpush1.bf16.msra.mxu1 %v3941_v35  ;;  %v3684_v35 = vld [vmem:[#allocation12 + $0xc0] ss:$16 sps:$4 sm:$0xff]  }
 0x6c4   :  { %1614 = vmatprep.subr.bf16.mxu0 %v4663_v8  ;;  %1655 = vmatprep.subr.bf16.mxu1 %v3942_v4  ;;  %v3689_v4 = vld [vmem:[#allocation12 + $0xcc] ss:$16 sps:$4 sm:$0xff]  }
 0x6c7   :  { %1615 = vmatpush1.bf16.msra.mxu0 %v4667_v11  ;;  %1656 = vmatpush1.bf16.msra.mxu1 %v3943_v53  ;;  %v3687_v53 = vld [vmem:[#allocation12 + $0xc8] ss:$16 sps:$4 sm:$0xff]  }
 0x6c8   :  { %1923 = vmatprep.subr.bf16.mxu0 %v3650_v13  ;;  %1996 = vmatprep.subr.bf16.mxu1 %v3653_v52  ;;  %v3692_v13 = vld [vmem:[#allocation12 + $0xe4] ss:$16 sps:$4 sm:$0xff]   ;;  %v3690_v52 = vld [vmem:[#allocation12 + $0xe0] ss:$16 sps:$4 sm:$0xff]  }
 0x77d   :  { %v1516_v14 = vpop.f32.mrb[24].mxu0  ;;  %v1557_v19 = vpop.f32.mrb[56].mxu1 }
 0x77e   :  { %v1564_v31 = vadd.f32 %v1516_v14, %v5435_v17  ;;  %v1566_v48 = vadd.f32 %v1557_v19, %v5436_v18  ;;  %v1518_v21 = vpop.f32.mrb[25].mxu0  ;;  %v1559_v22 = vpop.f32.mrb[57].mxu1  ;;  %v3695_v14 = vld [vmem:[#allocation12 + $0xec] ss:$16 sps:$4 sm:$0xff]   ;;  %v3693_v19 = vld [vmem:[#allocation12 + $0xe8] ss:$16 sps:$4 sm:$0xff]  }
 0x77f   :  { %v1565_v8 = vadd.f32 %v1518_v21, %v5437_v55  ;;  %v1567_v57 = vadd.f32 %v1559_v22, %v5438_v56  ;;  %v1520_v58 = vpop.f32.mrb[26].mxu0  ;;  %v1561_v11 = vpop.f32.mrb[58].mxu1  ;;  %v3944_v17 = vld [vmem:[#allocation6] sm:$0xff]   ;;  %v4793_v18 = vld [vmem:[#allocation14 + $0xc] ss:$16 sps:$4 sm:$0xff]  }
 0x780   :  { %v1569_v59 = vmul.f32 0.5, %v1564_v31  ;;  %v1521_v60 = vpop.f32.mrb[27].mxu0  ;;  %v1562_v61 = vpop.f32.mrb[59].mxu1  ;;  %v4791_v31 = vld [vmem:[#allocation14 + $0x4] ss:$16 sps:$4 sm:$0xff]  }
 0x781   :  { %v1573_v62 = vmul.f32 0.5, %v1565_v8  ;;  %v1578_v63 = vmul.f32 0.5, %v1567_v57  ;;  %v4798_v21 = vld [vmem:[#allocation14 + $0x8] ss:$16 sps:$4 sm:$0xff]   ;;  %v4804_v22 = vld [vmem:[#allocation14 + $0x24] ss:$16 sps:$4 sm:$0xff]  }
 0x782   :  { %3812 = vtanh.f32 %v1569_v59  ;;  %v4806_v55 = vld [vmem:[#allocation14 + $0x2c] ss:$16 sps:$4 sm:$0xff]   ;;  %v4809_v8 = vld [vmem:[#allocation14 + $0x20] ss:$16 sps:$4 sm:$0xff]   ;;  %v4811_v56 = vld [vmem:[#allocation14 + $0x28] ss:$16 sps:$4 sm:$0xff]  }
 0x783   :  { %3814 = vtanh.f32 %v1573_v62  ;;  %v3945_v57 = vld [vmem:[#allocation6 + $0x8] sm:$0xff]   ;;  %v4817_v58 = vld [vmem:[#allocation14 + $0x44] ss:$16 sps:$4 sm:$0xff]   ;;  %v4821_v59 = vld [vmem:[#allocation14 + $0x40] ss:$16 sps:$4 sm:$0xff]  }
 0x784   :  { %3816 = vtanh.f32 %v1566_v48  ;;  %v4796_v48 = vld [vmem:[#allocation14] ss:$16 sps:$4 sm:$0xff]   ;;  %v4819_v11 = vld [vmem:[#allocation14 + $0x4c] ss:$16 sps:$4 sm:$0xff]   ;;  %v4823_v60 = vld [vmem:[#allocation14 + $0x48] ss:$16 sps:$4 sm:$0xff]  }
 0x785   :  { %3818 = vtanh.f32 %v1578_v63  ;;  %v4830_v61 = vld [vmem:[#allocation14 + $0x64] ss:$16 sps:$4 sm:$0xff]   ;;  %v4832_v62 = vld [vmem:[#allocation14 + $0x6c] ss:$16 sps:$4 sm:$0xff]   ;;  %v4835_v63 = vld [vmem:[#allocation14 + $0x60] ss:$16 sps:$4 sm:$0xff]  }
 0x78c   :  { %v3813_v1 = vpop.eup %3812 }
 0x78d   :  { %v3815_v2 = vpop.eup %3814  ;;  %v1571_v5 = vadd.f32 1.0, %v3813_v1  ;;  %v4837_v1 = vld [vmem:[#allocation14 + $0x68] ss:$16 sps:$4 sm:$0xff]  }
 0x78e   :  { %v1575_v6 = vadd.f32 1.0, %v3815_v2  ;;  %v3817_v39 = vpop.eup %3816  ;;  %v3946_v2 = vld [vmem:[#allocation6 + $0x10] sm:$0xff]  }
 0x78f   :  { %v1572_v9 = vmul.f32 0.5, %v1571_v5  ;;  %v3819_v29 = vpop.eup %3818  ;;  %v4843_v5 = vld [vmem:[#allocation14 + $0x84] ss:$16 sps:$4 sm:$0xff]  }
 0x790   :  { %v1576_v25 = vmul.f32 0.5, %v1575_v6  ;;  %v1580_v30 = vadd.f32 1.0, %v3819_v29  ;;  %v4845_v6 = vld [vmem:[#allocation14 + $0x8c] ss:$16 sps:$4 sm:$0xff]   ;;  %v4863_v29 = vld [vmem:[#allocation14 + $0xa8] ss:$16 sps:$4 sm:$0xff]  }
 0x791   :  { %v1583_v10 = vmul.f32 %v3817_v39, %v1572_v9  ;;  %v4847_v9 = vld [vmem:[#allocation14 + $0x80] ss:$16 sps:$4 sm:$0xff]   ;;  %v4849_v39 = vld [vmem:[#allocation14 + $0x88] ss:$16 sps:$4 sm:$0xff]  }
 0x792   :  { %v1582_v26 = vmul.f32 %v1576_v25, %v4761_v49  ;;  %v1581_v33 = vmul.f32 0.5, %v1580_v30  ;;  %v3657_v49 = vld [vmem:[#allocation12 + $0x28] ss:$16 sps:$4 sm:$0xff]   ;;  %v4856_v25 = vld [vmem:[#allocation14 + $0xa4] ss:$16 sps:$4 sm:$0xff]  }
 0x793   :  { %v3947_v30 = vld [vmem:[#allocation6 + $0x18] sm:$0xff]  }
 0x794   :  { %v4786_v7 = vadd.f32 %v1583_v10, %v1582_v26  ;;  %v4858_v10 = vld [vmem:[#allocation14 + $0xac] ss:$16 sps:$4 sm:$0xff]   ;;  %v4861_v26 = vld [vmem:[#allocation14 + $0xa0] ss:$16 sps:$4 sm:$0xff]  }
 0x796   :  { %3820 = vtanh.f32 %v4786_v7 }
 0x7a0   :  { %v3821_v12 = vpop.eup %3820 }
 0x7a1   :  { %v1586_v24 = vmul.f32 %v3821_v12, %v1581_v33  ;;  %v4869_v33 = vld [vmem:[#allocation14 + $0xc4] ss:$16 sps:$4 sm:$0xff]   ;;  %v4871_v12 = vld [vmem:[#allocation14 + $0xcc] ss:$16 sps:$4 sm:$0xff]  }
 0x7a3   :  { %v1599_v37 = vpack.c.bf16 %v1586_v24, %v1586_v24  ;;  %v4873_v24 = vld [vmem:[#allocation14 + $0xc0] ss:$16 sps:$4 sm:$0xff]  }
 0x7a5   :  { %1633 = vmatmul.mubr.bf16.vlgmr.msra.gmra.mrb[28].mxu0 %v1599_v37  ;;  %1674 = vmatmul.mubr.bf16.vlgmr.msra.gmra.mrb[60].mxu1 %v1599_v37  ;;  %v4884_v37 = vld [vmem:[#allocation14 + $0xec] ss:$16 sps:$4 sm:$0xff]  }
 0x7a6   :  { %1924 = vmatpush1.bf16.msra.mxu0 %v3648_v41  ;;  %1997 = vmatpush1.bf16.msra.mxu1 %v3651_v45  ;;  %v4875_v41 = vld [vmem:[#allocation14 + $0xc8] ss:$16 sps:$4 sm:$0xff]   ;;  %v4882_v45 = vld [vmem:[#allocation14 + $0xe4] ss:$16 sps:$4 sm:$0xff]  }
 0x7a7   :  { %1925 = vmatprep.subr.bf16.mxu0 %v3656_v46  ;;  %1998 = vmatprep.subr.bf16.mxu1 %v3659_v16  ;;  %v4887_v46 = vld [vmem:[#allocation14 + $0xe0] ss:$16 sps:$4 sm:$0xff]   ;;  %v4889_v16 = vld [vmem:[#allocation14 + $0xe8] ss:$16 sps:$4 sm:$0xff]  }
 0x7a8   :  { %1955 = vmatprep.mubr.bf16.mxu0 %v5424_v51  ;;  %2028 = vmatprep.mubr.bf16.mxu1 %v5424_v51 }
 0x7aa   :  { %1926 = vmatpush1.bf16.msra.mxu0 %v3654_v27  ;;  %1999 = vmatpush1.bf16.msra.mxu1 %v3657_v49 }
 0x7ab   :  { %1927 = vmatprep.subr.bf16.mxu0 %v3662_v54  ;;  %2000 = vmatprep.subr.bf16.mxu1 %v3665_v44  ;;  %v5439_v54 = vld [vmem:[#allocation31_spill] sm:$0xff] }
 0x7ae   :  { %1928 = vmatpush1.bf16.msra.mxu0 %v3660_v47  ;;  %2001 = vmatpush1.bf16.msra.mxu1 %v3663_v50  ;;  %v5440_v47 = vld [vmem:[#allocation40_spill] sm:$0xff] }
 0x7af   :  { %1929 = vmatprep.subr.bf16.mxu0 %v3668_v0  ;;  %2002 = vmatprep.subr.bf16.mxu1 %v3671_v3 }
 0x7b2   :  { %1930 = vmatpush1.bf16.msra.mxu0 %v3666_v15  ;;  %2003 = vmatpush1.bf16.msra.mxu1 %v3669_v36  ;;  %v5441_v15 = vld [vmem:[#allocation32_spill] sm:$0xff] }
 0x7b3   :  { %1931 = vmatprep.subr.bf16.mxu0 %v3674_v28  ;;  %2004 = vmatprep.subr.bf16.mxu1 %v3677_v23  ;;  %v5442_v28 = vld [vmem:[#allocation41_spill] sm:$0xff] }
 0x7b6   :  { %1932 = vmatpush1.bf16.msra.mxu0 %v3672_v38  ;;  %2005 = vmatpush1.bf16.msra.mxu1 %v3675_v20 }
 0x7b7   :  { %1933 = vmatprep.subr.bf16.mxu0 %v3680_v42  ;;  %2006 = vmatprep.subr.bf16.mxu1 %v3683_v40 }
 0x7ba   :  { %1934 = vmatpush1.bf16.msra.mxu0 %v3678_v32  ;;  %2007 = vmatpush1.bf16.msra.mxu1 %v3681_v43 }
 0x7bb   :  { %1935 = vmatprep.subr.bf16.mxu0 %v3686_v34  ;;  %2008 = vmatprep.subr.bf16.mxu1 %v3689_v4 }
 0x7be   :  { %1936 = vmatpush1.bf16.msra.mxu0 %v3684_v35  ;;  %2009 = vmatpush1.bf16.msra.mxu1 %v3687_v53 }
 0x7bf   :  { %1937 = vmatprep.subr.bf16.mxu0 %v3692_v13  ;;  %2010 = vmatprep.subr.bf16.mxu1 %v3695_v14 }
 0x7c2   :  { %1938 = vmatpush1.bf16.msra.mxu0 %v3690_v52  ;;  %2011 = vmatpush1.bf16.msra.mxu1 %v3693_v19 }
 0x7c3   :  { %2267 = vmatprep.subr.bf16.mxu0 %v4791_v31  ;;  %2308 = vmatprep.subr.bf16.mxu1 %v4793_v18 }
 0x7c5   :  { %1956 = vmatmul.mubr.bf16.vlgmr.msra.gmra.mrb[32].mxu0 %v3944_v17  ;;  %2029 = vmatmul.mubr.bf16.vlgmr.msra.gmra.mrb[64].mxu1 %v3944_v17 }
 0x7c6   :  { %1965 = vmatprep.mubr.bf16.mxu0 %v5424_v51  ;;  %2268 = vmatpush1.bf16.msra.mxu0 %v4796_v48 }
 0x7c7   :  { %2309 = vmatpush1.bf16.msra.mxu1 %v4798_v21  ;;  %2038 = vmatprep.mubr.bf16.mxu1 %v5424_v51 }
 0x7c8   :  { %2269 = vmatprep.subr.bf16.mxu0 %v4804_v22  ;;  %2310 = vmatprep.subr.bf16.mxu1 %v4806_v55 }
 0x7ca   :  { %2270 = vmatpush1.bf16.msra.mxu0 %v4809_v8 }
 0x7cb   :  { %2311 = vmatpush1.bf16.msra.mxu1 %v4811_v56  ;;  %2271 = vmatprep.subr.bf16.mxu0 %v4817_v58 }
 0x7cc   :  { %2312 = vmatprep.subr.bf16.mxu1 %v4819_v11 }
 0x7cd   :  { %1966 = vmatmul.mubr.bf16.gmra.mrb[36].mxu0 %v3945_v57  ;;  %2039 = vmatmul.mubr.bf16.gmra.mrb[68].mxu1 %v3945_v57 }
 0x7ce   :  { %1975 = vmatprep.mubr.bf16.mxu0 %v5424_v51  ;;  %2272 = vmatpush1.bf16.msra.mxu0 %v4821_v59 }
 0x7cf   :  { %2313 = vmatpush1.bf16.msra.mxu1 %v4823_v60  ;;  %2048 = vmatprep.mubr.bf16.mxu1 %v5424_v51 }
 0x7d0   :  { %2273 = vmatprep.subr.bf16.mxu0 %v4830_v61  ;;  %2314 = vmatprep.subr.bf16.mxu1 %v4832_v62 }
 0x7d2   :  { %2274 = vmatpush1.bf16.msra.mxu0 %v4835_v63 }
 0x7d3   :  { %2315 = vmatpush1.bf16.msra.mxu1 %v4837_v1  ;;  %2275 = vmatprep.subr.bf16.mxu0 %v4843_v5 }
 0x7d4   :  { %2316 = vmatprep.subr.bf16.mxu1 %v4845_v6 }
 0x7d5   :  { %1976 = vmatmul.mubr.bf16.gmra.mrb[40].mxu0 %v3946_v2  ;;  %2049 = vmatmul.mubr.bf16.gmra.mrb[72].mxu1 %v3946_v2 }
 0x7d6   :  { %1985 = vmatprep.mubr.bf16.mxu0 %v5424_v51  ;;  %2276 = vmatpush1.bf16.msra.mxu0 %v4847_v9 }
 0x7d7   :  { %2317 = vmatpush1.bf16.msra.mxu1 %v4849_v39  ;;  %2058 = vmatprep.mubr.bf16.mxu1 %v5424_v51 }
 0x7d8   :  { %2277 = vmatprep.subr.bf16.mxu0 %v4856_v25  ;;  %2318 = vmatprep.subr.bf16.mxu1 %v4858_v10 }
 0x7da   :  { %2278 = vmatpush1.bf16.msra.mxu0 %v4861_v26 }
 0x7db   :  { %2319 = vmatpush1.bf16.msra.mxu1 %v4863_v29  ;;  %2279 = vmatprep.subr.bf16.mxu0 %v4869_v33 }
 0x7dc   :  { %2320 = vmatprep.subr.bf16.mxu1 %v4871_v12 }
 0x7dd   :  { %1986 = vmatmul.mubr.bf16.gmra.mrb[44].mxu0 %v3947_v30  ;;  %2059 = vmatmul.mubr.bf16.gmra.mrb[76].mxu1 %v3947_v30 }
 0x7de   :  { %2299 = vmatprep.mubr.bf16.mxu0 %v5424_v51  ;;  %2280 = vmatpush1.bf16.msra.mxu0 %v4873_v24 }
 0x7df   :  { %2321 = vmatpush1.bf16.msra.mxu1 %v4875_v41  ;;  %2340 = vmatprep.mubr.bf16.mxu1 %v5424_v51 }
 0x7e0   :  { %2281 = vmatprep.subr.bf16.mxu0 %v4882_v45  ;;  %2322 = vmatprep.subr.bf16.mxu1 %v4884_v37 }
 0x7e2   :  { %2282 = vmatpush1.bf16.msra.mxu0 %v4887_v46 }
 0x7e3   :  { %2323 = vmatpush1.bf16.msra.mxu1 %v4889_v16  ;;  %2381 = vmatprep.subr.bf16.mxu0 %v4791_v31 }
 0x7e4   :  { %2422 = vmatprep.subr.bf16.mxu1 %v4793_v18 }
 0x878   :  { %v1634_v27 = vpop.f32.mrb[28].mxu0  ;;  %v1675_v49 = vpop.f32.mrb[60].mxu1 }
 0x879   :  { %v1682_v44 = vadd.f32 %v1634_v27, %v5439_v54  ;;  %v1684_v50 = vadd.f32 %v1675_v49, %v5440_v47  ;;  %v1636_v0 = vpop.f32.mrb[29].mxu0  ;;  %v1677_v3 = vpop.f32.mrb[61].mxu1 }
 0x87a   :  { %v1683_v36 = vadd.f32 %v1636_v0, %v5441_v15  ;;  %v1685_v23 = vadd.f32 %v1677_v3, %v5442_v28  ;;  %v1638_v38 = vpop.f32.mrb[30].mxu0  ;;  %v1679_v20 = vpop.f32.mrb[62].mxu1 }
 0x87b   :  { %v1687_v42 = vmul.f32 0.5, %v1682_v44  ;;  %v1639_v40 = vpop.f32.mrb[31].mxu0  ;;  %v1680_v32 = vpop.f32.mrb[63].mxu1 }
 0x87c   :  { %v1691_v43 = vmul.f32 0.5, %v1683_v36  ;;  %v1696_v34 = vmul.f32 0.5, %v1685_v23 }
 0x87d   :  { %3822 = vtanh.f32 %v1687_v42 }
 0x87e   :  { %3824 = vtanh.f32 %v1691_v43 }
 0x87f   :  { %3826 = vtanh.f32 %v1684_v50  ;;  %v5443_v50 = vld [vmem:[#allocation23_spill] sm:$0xff] }
 0x880   :  { %3828 = vtanh.f32 %v1696_v34  ;;  %v5444_v0 = vsub.s32 0, %v5443_v50  ;;  %v5445_v36 = vsub.s32 1, %v5443_v50  ;;  %v5446_v20 = vsub.s32 2, %v5443_v50 }
 0x881   :  { %v5447_v34 = vsub.s32 3, %v5443_v50 }
 0x887   :  { %v3823_v35 = vpop.eup %3822 }
 0x888   :  { %v3825_v4 = vpop.eup %3824  ;;  %v1689_v53 = vadd.f32 1.0, %v3823_v35 }
 0x889   :  { %v1693_v13 = vadd.f32 1.0, %v3825_v4  ;;  %v3827_v14 = vpop.eup %3826 }
 0x88a   :  { %v1690_v52 = vmul.f32 0.5, %v1689_v53  ;;  %v3829_v30 = vpop.eup %3828 }
 0x88b   :  { %v1694_v19 = vmul.f32 0.5, %v1693_v13  ;;  %v1698_v27 = vadd.f32 1.0, %v3829_v30 }
 0x88c   :  { %v1701_v17 = vmul.f32 %v3827_v14, %v1690_v52 }
 0x88d   :  { %v1700_v57 = vmul.f32 %v1694_v19, %v4786_v7  ;;  %v1699_v49 = vmul.f32 0.5, %v1698_v27  ;;  %v1741_v7 = vld [vmem:[%s5393_s6] sm:$0xf] }
 0x88e   :  { %v4944_v3 = vrot.slane %v1741_v7, %v5444_v0  ;;  %v4950_v28 = vrot.slane %v1741_v7, %v5445_v36  ;;  %v1754_v42 = vrot.slane %v1741_v7, %v5446_v20  ;;  %v1758_v35 = vrot.slane %v1741_v7, %v5447_v34 }
 0x88f   :  { %v4902_v2 = vadd.f32 %v1701_v17, %v1700_v57 }
 0x891   :  { %3830 = vtanh.f32 %v4902_v2 }
 0x898   :  { %v4946_v15 = vpop.f32.mrb[32].mxu0  ;;  %v2030_v43 = vpop.f32.mrb[64].mxu1 }
 0x899   :  { %v4952_v23 = vpop.f32.mrb[33].mxu0  ;;  %v2032_v53 = vpop.f32.mrb[65].mxu1 }
 0x89a   :  { %v1961_v38 = vpop.f32.mrb[34].mxu0  ;;  %v2034_v13 = vpop.f32.mrb[66].mxu1 }
 0x89b   :  { %v3831_v54 = vpop.eup %3830  ;;  %v4957_v40 = vadd.f32 %v1961_v38, %v4944_v3  ;;  %v1963_v32 = vpop.f32.mrb[35].mxu0  ;;  %v4964_v52 = vadd.f32 %v2034_v13, %v1754_v42 }
 0x89c   :  { %v1704_v44 = vmul.f32 %v3831_v54, %v1699_v49  ;;  %v4962_v4 = vadd.f32 %v1963_v32, %v4950_v28  ;;  %v2036_v14 = vpop.f32.mrb[67].mxu1 }
 0x89d   :  { %v4966_v19 = vadd.f32 %v2036_v14, %v1758_v35 }
 0x89e   :  { %v2106_v47 = vpack.c.bf16 %v1704_v44, %v1704_v44 }
 0x8a0   :  { %2300 = vmatmul.mubr.bf16.vlgmr.msra.gmra.mrb[48].mxu0 %v2106_v47  ;;  %2341 = vmatmul.mubr.bf16.vlgmr.msra.gmra.mrb[80].mxu1 %v2106_v47  ;;  %v1967_v17 = vpop.f32.mrb[36].mxu0  ;;  %v2040_v54 = vpop.f32.mrb[68].mxu1 }
 0x8a1   :  { %2382 = vmatpush1.bf16.msra.mxu0 %v4796_v48  ;;  %2423 = vmatpush1.bf16.msra.mxu1 %v4798_v21  ;;  %v4969_v57 = vadd.f32 %v1967_v17, %v4944_v3  ;;  %v1969_v30 = vpop.f32.mrb[37].mxu0  ;;  %v4977_v7 = vadd.f32 %v2040_v54, %v1754_v42  ;;  %v2042_v50 = vpop.f32.mrb[69].mxu1 }
 0x8a2   :  { %2383 = vmatprep.subr.bf16.mxu0 %v4804_v22  ;;  %2424 = vmatprep.subr.bf16.mxu1 %v4806_v55  ;;  %v4972_v27 = vadd.f32 %v1969_v30, %v4950_v28  ;;  %v1971_v49 = vpop.f32.mrb[38].mxu0  ;;  %v4982_v36 = vadd.f32 %v2042_v50, %v1758_v35  ;;  %v2044_v38 = vpop.f32.mrb[70].mxu1 }
 0x8a3   :  { %2413 = vmatprep.mubr.bf16.mxu0 %v5424_v51  ;;  %2454 = vmatprep.mubr.bf16.mxu1 %v5424_v51  ;;  %5448 = vst [vmem:[#allocation24_spill] sm:$0xff] %v4969_v57  ;;  %v4975_v44 = vadd.f32 %v1971_v49, %v4944_v3  ;;  %v1973_v47 = vpop.f32.mrb[39].mxu0  ;;  %5451 = vst [vmem:[#allocation34_spill] sm:$0xff] %v4977_v7  ;;  %v4984_v20 = vadd.f32 %v2044_v38, %v1754_v42  ;;  %v2046_v32 = vpop.f32.mrb[71].mxu1 }
 0x8a4   :  { %5449 = vst [vmem:[#allocation33_spill] sm:$0xff] %v4972_v27  ;;  %v4980_v0 = vadd.f32 %v1973_v47, %v4950_v28  ;;  %5453 = vst [vmem:[#allocation35_spill] sm:$0xff] %v4982_v36  ;;  %v4986_v34 = vadd.f32 %v2046_v32, %v1758_v35 }
 0x8a5   :  { %2384 = vmatpush1.bf16.msra.mxu0 %v4809_v8  ;;  %2425 = vmatpush1.bf16.msra.mxu1 %v4811_v56  ;;  %5450 = vst [vmem:[#allocation25_spill] sm:$0xff] %v4975_v44  ;;  %5454 = vst [vmem:[#allocation27_spill] sm:$0xff] %v4984_v20 }
 0x8a6   :  { %2385 = vmatprep.subr.bf16.mxu0 %v4817_v58  ;;  %2426 = vmatprep.subr.bf16.mxu1 %v4819_v11  ;;  %5452 = vst [vmem:[#allocation26_spill] sm:$0xff] %v4980_v0  ;;  %5455 = vst [vmem:[#allocation36_spill] sm:$0xff] %v4986_v34 }
 0x8a8   :  { %v1977_v13 = vpop.f32.mrb[40].mxu0  ;;  %v2050_v54 = vpop.f32.mrb[72].mxu1 }
 0x8a9   :  { %2386 = vmatpush1.bf16.msra.mxu0 %v4821_v59  ;;  %2427 = vmatpush1.bf16.msra.mxu1 %v4823_v60  ;;  %v4989_v14 = vadd.f32 %v1977_v13, %v4944_v3  ;;  %v1979_v17 = vpop.f32.mrb[41].mxu0  ;;  %v4997_v0 = vadd.f32 %v2050_v54, %v1754_v42  ;;  %v2052_v38 = vpop.f32.mrb[73].mxu1 }
 0x8aa   :  { %2387 = vmatprep.subr.bf16.mxu0 %v4830_v61  ;;  %2428 = vmatprep.subr.bf16.mxu1 %v4832_v62  ;;  %v4992_v30 = vadd.f32 %v1979_v17, %v4950_v28  ;;  %v1981_v49 = vpop.f32.mrb[42].mxu0  ;;  %v5002_v34 = vadd.f32 %v2052_v38, %v1758_v35  ;;  %v2054_v13 = vpop.f32.mrb[74].mxu1 }
 0x8ab   :  { %5456 = vst [vmem:[#allocation28_spill] sm:$0xff] %v4989_v14  ;;  %v4995_v47 = vadd.f32 %v1981_v49, %v4944_v3  ;;  %v1983_v50 = vpop.f32.mrb[43].mxu0  ;;  %5459 = vst [vmem:[#allocation38_spill] sm:$0xff] %v4997_v0  ;;  %v5004_v14 = vadd.f32 %v2054_v13, %v1754_v42  ;;  %v2056_v20 = vpop.f32.mrb[75].mxu1 }
 0x8ac   :  { %5457 = vst [vmem:[#allocation37_spill] sm:$0xff] %v4992_v30  ;;  %v5000_v32 = vadd.f32 %v1983_v50, %v4950_v28  ;;  %5461 = vst [vmem:[#allocation39_spill] sm:$0xff] %v5002_v34  ;;  %v5006_v17 = vadd.f32 %v2056_v20, %v1758_v35 }
 0x8ad   :  { %2388 = vmatpush1.bf16.msra.mxu0 %v4835_v63  ;;  %2429 = vmatpush1.bf16.msra.mxu1 %v4837_v1  ;;  %5458 = vst [vmem:[#allocation29_spill] sm:$0xff] %v4995_v47  ;;  %5462 = vst [vmem:[#allocation31_spill] sm:$0xff] %v5004_v14 }
 0x8ae   :  { %2389 = vmatprep.subr.bf16.mxu0 %v4843_v5  ;;  %2430 = vmatprep.subr.bf16.mxu1 %v4845_v6  ;;  %5460 = vst [vmem:[#allocation30_spill] sm:$0xff] %v5000_v32  ;;  %5463 = vst [vmem:[#allocation40_spill] sm:$0xff] %v5006_v17 }
 0x8b0   :  { %v1987_v30 = vpop.f32.mrb[44].mxu0  ;;  %v2060_v0 = vpop.f32.mrb[76].mxu1 }
 0x8b1   :  { %2390 = vmatpush1.bf16.msra.mxu0 %v4847_v9  ;;  %2431 = vmatpush1.bf16.msra.mxu1 %v4849_v39  ;;  %v5009_v44 = vadd.f32 %v1987_v30, %v4944_v3  ;;  %v1989_v49 = vpop.f32.mrb[45].mxu0  ;;  %v5017_v32 = vadd.f32 %v2060_v0, %v1754_v42  ;;  %v2062_v13 = vpop.f32.mrb[77].mxu1  ;;  %v1960_v0 = vadd.f32 %v4952_v23, %v4950_v28 }
 0x8b2   :  { %2391 = vmatprep.subr.bf16.mxu0 %v4856_v25  ;;  %2432 = vmatprep.subr.bf16.mxu1 %v4858_v10  ;;  %v5012_v54 = vadd.f32 %v1989_v49, %v4950_v28  ;;  %v1991_v47 = vpop.f32.mrb[46].mxu0  ;;  %v5022_v17 = vadd.f32 %v2062_v13, %v1758_v35  ;;  %v2064_v30 = vpop.f32.mrb[78].mxu1 }
 0x8b3   :  { %5464 = vst [vmem:[#allocation32_spill] sm:$0xff] %v5009_v44  ;;  %v5015_v50 = vadd.f32 %v1991_v47, %v4944_v3  ;;  %v1993_v38 = vpop.f32.mrb[47].mxu0  ;;  %5467 = vst [vmem:[#allocation42_spill] sm:$0xff] %v5017_v32  ;;  %v5024_v44 = vadd.f32 %v2064_v30, %v1754_v42  ;;  %v2066_v14 = vpop.f32.mrb[79].mxu1  ;;  %v2031_v47 = vadd.f32 %v2030_v43, %v1754_v42 }
 0x8b4   :  { %5465 = vst [vmem:[#allocation41_spill] sm:$0xff] %v5012_v54  ;;  %v5020_v20 = vadd.f32 %v1993_v38, %v4950_v28  ;;  %5469 = vst [vmem:[#allocation44_spill] sm:$0xff] %v5022_v17  ;;  %v5026_v49 = vadd.f32 %v2066_v14, %v1758_v35  ;;  %v1958_v54 = vadd.f32 %v4946_v15, %v4944_v3 }
 0x8b5   :  { %2392 = vmatpush1.bf16.msra.mxu0 %v4861_v26  ;;  %2433 = vmatpush1.bf16.msra.mxu1 %v4863_v29  ;;  %5466 = vst [vmem:[#allocation23_spill] sm:$0xff] %v5015_v50  ;;  %5470 = vst [vmem:[#allocation45_spill] sm:$0xff] %v5024_v44  ;;  %v2033_v50 = vadd.f32 %v2032_v53, %v1758_v35 }
 0x8b6   :  { %2393 = vmatprep.subr.bf16.mxu0 %v4869_v33  ;;  %2434 = vmatprep.subr.bf16.mxu1 %v4871_v12  ;;  %5468 = vst [vmem:[#allocation43_spill] sm:$0xff] %v5020_v20  ;;  %5471 = vst [vmem:[#allocation46_spill] sm:$0xff] %v5026_v49 }
 0x8b9   :  { %2394 = vmatpush1.bf16.msra.mxu0 %v4873_v24  ;;  %2435 = vmatpush1.bf16.msra.mxu1 %v4875_v41 }
 0x8ba   :  { %2395 = vmatprep.subr.bf16.mxu0 %v4882_v45  ;;  %2436 = vmatprep.subr.bf16.mxu1 %v4884_v37 }
 0x8bd   :  { %2396 = vmatpush1.bf16.msra.mxu0 %v4887_v46  ;;  %2437 = vmatpush1.bf16.msra.mxu1 %v4889_v16 }
 0x8be   :  { %2495 = vmatprep.subr.bf16.mxu0 %v4791_v31  ;;  %2536 = vmatprep.subr.bf16.mxu1 %v4793_v18 }
 0x973   :  { %v2301_v32 = vpop.f32.mrb[48].mxu0  ;;  %v2342_v34 = vpop.f32.mrb[80].mxu1 }
 0x974   :  { %v2349_v38 = vadd.f32 %v2301_v32, %v1958_v54  ;;  %v2351_v20 = vadd.f32 %v2342_v34, %v2031_v47  ;;  %v2303_v13 = vpop.f32.mrb[49].mxu0  ;;  %v2344_v17 = vpop.f32.mrb[81].mxu1 }
 0x975   :  { %v2350_v36 = vadd.f32 %v2303_v13, %v1960_v0  ;;  %v2352_v30 = vadd.f32 %v2344_v17, %v2033_v50  ;;  %v2305_v44 = vpop.f32.mrb[50].mxu0  ;;  %v2346_v27 = vpop.f32.mrb[82].mxu1 }
 0x976   :  { %v2354_v14 = vmul.f32 0.5, %v2349_v38  ;;  %v2306_v49 = vpop.f32.mrb[51].mxu0  ;;  %v2347_v7 = vpop.f32.mrb[83].mxu1 }
 0x977   :  { %v2358_v57 = vmul.f32 0.5, %v2350_v36  ;;  %v2363_v3 = vmul.f32 0.5, %v2352_v30 }
 0x978   :  { %3832 = vtanh.f32 %v2354_v14 }
 0x979   :  { %3834 = vtanh.f32 %v2358_v57 }
 0x97a   :  { %3836 = vtanh.f32 %v2351_v20 }
 0x97b   :  { %3838 = vtanh.f32 %v2363_v3 }
 0x982   :  { %v3833_v15 = vpop.eup %3832 }
 0x983   :  { %v3835_v28 = vpop.eup %3834  ;;  %v2356_v23 = vadd.f32 1.0, %v3833_v15 }
 0x984   :  { %v2360_v42 = vadd.f32 1.0, %v3835_v28  ;;  %v3837_v35 = vpop.eup %3836 }
 0x985   :  { %v2357_v43 = vmul.f32 0.5, %v2356_v23  ;;  %v3839_v7 = vpop.eup %3838 }
 0x986   :  { %v2361_v53 = vmul.f32 0.5, %v2360_v42  ;;  %v2365_v36 = vadd.f32 1.0, %v3839_v7 }
 0x987   :  { %v2368_v34 = vmul.f32 %v3837_v35, %v2357_v43 }
 0x988   :  { %v2367_v44 = vmul.f32 %v2361_v53, %v4902_v2  ;;  %v2366_v57 = vmul.f32 0.5, %v2365_v36 }
 0x98a   :  { %v5033_v27 = vadd.f32 %v2368_v34, %v2367_v44 }
 0x98c   :  { %3840 = vtanh.f32 %v5033_v27 }
 0x996   :  { %v3841_v32 = vpop.eup %3840 }
 0x997   :  { %v5036_v17 = vmul.f32 %v3841_v32, %v2366_v57 }
 0x999   :  { %v2380_v54 = vpack.c.bf16 %v5036_v17, %v5036_v17 }
 0x99b   :  { %2414 = vmatmul.mubr.bf16.vlgmr.msra.gmra.mrb[52].mxu0 %v2380_v54  ;;  %2455 = vmatmul.mubr.bf16.vlgmr.msra.gmra.mrb[84].mxu1 %v2380_v54 }
 0x99c   :  { %2496 = vmatpush1.bf16.msra.mxu0 %v4796_v48  ;;  %2537 = vmatpush1.bf16.msra.mxu1 %v4798_v21 }
 0x99d   :  { %2497 = vmatprep.subr.bf16.mxu0 %v4804_v22  ;;  %2538 = vmatprep.subr.bf16.mxu1 %v4806_v55 }
 0x99e   :  { %2527 = vmatprep.mubr.bf16.mxu0 %v5424_v51  ;;  %2568 = vmatprep.mubr.bf16.mxu1 %v5424_v51 }
 0x9a0   :  { %2498 = vmatpush1.bf16.msra.mxu0 %v4809_v8  ;;  %2539 = vmatpush1.bf16.msra.mxu1 %v4811_v56 }
 0x9a1   :  { %2499 = vmatprep.subr.bf16.mxu0 %v4817_v58  ;;  %2540 = vmatprep.subr.bf16.mxu1 %v4819_v11 }
 0x9a4   :  { %2500 = vmatpush1.bf16.msra.mxu0 %v4821_v59  ;;  %2541 = vmatpush1.bf16.msra.mxu1 %v4823_v60 }
 0x9a5   :  { %2501 = vmatprep.subr.bf16.mxu0 %v4830_v61  ;;  %2542 = vmatprep.subr.bf16.mxu1 %v4832_v62 }
 0x9a8   :  { %2502 = vmatpush1.bf16.msra.mxu0 %v4835_v63  ;;  %2543 = vmatpush1.bf16.msra.mxu1 %v4837_v1 }
 0x9a9   :  { %2503 = vmatprep.subr.bf16.mxu0 %v4843_v5  ;;  %2544 = vmatprep.subr.bf16.mxu1 %v4845_v6 }
 0x9ac   :  { %2504 = vmatpush1.bf16.msra.mxu0 %v4847_v9  ;;  %2545 = vmatpush1.bf16.msra.mxu1 %v4849_v39 }
 0x9ad   :  { %2505 = vmatprep.subr.bf16.mxu0 %v4856_v25  ;;  %2546 = vmatprep.subr.bf16.mxu1 %v4858_v10 }
 0x9b0   :  { %2506 = vmatpush1.bf16.msra.mxu0 %v4861_v26  ;;  %2547 = vmatpush1.bf16.msra.mxu1 %v4863_v29 }
 0x9b1   :  { %2507 = vmatprep.subr.bf16.mxu0 %v4869_v33  ;;  %2548 = vmatprep.subr.bf16.mxu1 %v4871_v12 }
 0x9b4   :  { %2508 = vmatpush1.bf16.msra.mxu0 %v4873_v24  ;;  %2549 = vmatpush1.bf16.msra.mxu1 %v4875_v41 }
 0x9b5   :  { %2509 = vmatprep.subr.bf16.mxu0 %v4882_v45  ;;  %2550 = vmatprep.subr.bf16.mxu1 %v4884_v37 }
 0x9b8   :  { %2510 = vmatpush1.bf16.msra.mxu0 %v4887_v46  ;;  %2551 = vmatpush1.bf16.msra.mxu1 %v4889_v16 }
 0x9b9   :  { %2609 = vmatprep.subr.bf16.mxu0 %v4791_v31  ;;  %2650 = vmatprep.subr.bf16.mxu1 %v4793_v18 }
 0xa6e   :  { %v2415_v2 = vpop.f32.mrb[52].mxu0  ;;  %v2456_v50 = vpop.f32.mrb[84].mxu1 }
 0xa6f   :  { %v2463_v20 = vadd.f32 %v2415_v2, %v4957_v40  ;;  %v2465_v49 = vadd.f32 %v2456_v50, %v4964_v52  ;;  %v2417_v47 = vpop.f32.mrb[53].mxu0  ;;  %v2458_v0 = vpop.f32.mrb[85].mxu1 }
 0xa70   :  { %v2464_v38 = vadd.f32 %v2417_v47, %v4962_v4  ;;  %v2466_v13 = vadd.f32 %v2458_v0, %v4966_v19  ;;  %v2419_v30 = vpop.f32.mrb[54].mxu0  ;;  %v2460_v14 = vpop.f32.mrb[86].mxu1  ;;  %v5473_v0 = vld [vmem:[#allocation34_spill] sm:$0xff] }
 0xa71   :  { %v2468_v3 = vmul.f32 0.5, %v2463_v20  ;;  %v2420_v15 = vpop.f32.mrb[55].mxu0  ;;  %v2461_v28 = vpop.f32.mrb[87].mxu1  ;;  %v5474_v14 = vld [vmem:[#allocation33_spill] sm:$0xff] }
 0xa72   :  { %v2472_v23 = vmul.f32 0.5, %v2464_v38  ;;  %v2477_v42 = vmul.f32 0.5, %v2466_v13  ;;  %v5475_v15 = vld [vmem:[#allocation35_spill] sm:$0xff] }
 0xa73   :  { %3842 = vtanh.f32 %v2468_v3 }
 0xa74   :  { %3844 = vtanh.f32 %v2472_v23 }
 0xa75   :  { %3846 = vtanh.f32 %v2465_v49  ;;  %v5472_v49 = vld [vmem:[#allocation24_spill] sm:$0xff] }
 0xa76   :  { %3848 = vtanh.f32 %v2477_v42 }
 0xa7d   :  { %v3843_v43 = vpop.eup %3842 }
 0xa7e   :  { %v3845_v40 = vpop.eup %3844  ;;  %v2470_v35 = vadd.f32 1.0, %v3843_v43 }
 0xa7f   :  { %v2474_v52 = vadd.f32 1.0, %v3845_v40  ;;  %v3847_v34 = vpop.eup %3846 }
 0xa80   :  { %v2471_v53 = vmul.f32 0.5, %v2470_v35  ;;  %v3849_v36 = vpop.eup %3848 }
 0xa81   :  { %v2475_v4 = vmul.f32 0.5, %v2474_v52  ;;  %v2479_v57 = vadd.f32 1.0, %v3849_v36 }
 0xa82   :  { %v2482_v44 = vmul.f32 %v3847_v34, %v2471_v53 }
 0xa83   :  { %v2481_v19 = vmul.f32 %v2475_v4, %v5033_v27  ;;  %v2480_v32 = vmul.f32 0.5, %v2479_v57 }
 0xa85   :  { %v5079_v7 = vadd.f32 %v2482_v44, %v2481_v19 }
 0xa87   :  { %3850 = vtanh.f32 %v5079_v7 }
 0xa91   :  { %v3851_v54 = vpop.eup %3850 }
 0xa92   :  { %v5082_v2 = vmul.f32 %v3851_v54, %v2480_v32 }
 0xa94   :  { %v2494_v50 = vpack.c.bf16 %v5082_v2, %v5082_v2 }
 0xa96   :  { %2528 = vmatmul.mubr.bf16.vlgmr.msra.gmra.mrb[56].mxu0 %v2494_v50  ;;  %2569 = vmatmul.mubr.bf16.vlgmr.msra.gmra.mrb[88].mxu1 %v2494_v50 }
 0xa97   :  { %2610 = vmatpush1.bf16.msra.mxu0 %v4796_v48  ;;  %2651 = vmatpush1.bf16.msra.mxu1 %v4798_v21 }
 0xa98   :  { %2611 = vmatprep.subr.bf16.mxu0 %v4804_v22  ;;  %2652 = vmatprep.subr.bf16.mxu1 %v4806_v55 }
 0xa99   :  { %2641 = vmatprep.mubr.bf16.mxu0 %v5424_v51  ;;  %2682 = vmatprep.mubr.bf16.mxu1 %v5424_v51 }
 0xa9b   :  { %2612 = vmatpush1.bf16.msra.mxu0 %v4809_v8  ;;  %2653 = vmatpush1.bf16.msra.mxu1 %v4811_v56 }
 0xa9c   :  { %2613 = vmatprep.subr.bf16.mxu0 %v4817_v58  ;;  %2654 = vmatprep.subr.bf16.mxu1 %v4819_v11 }
 0xa9f   :  { %2614 = vmatpush1.bf16.msra.mxu0 %v4821_v59  ;;  %2655 = vmatpush1.bf16.msra.mxu1 %v4823_v60 }
 0xaa0   :  { %2615 = vmatprep.subr.bf16.mxu0 %v4830_v61  ;;  %2656 = vmatprep.subr.bf16.mxu1 %v4832_v62 }
 0xaa3   :  { %2616 = vmatpush1.bf16.msra.mxu0 %v4835_v63  ;;  %2657 = vmatpush1.bf16.msra.mxu1 %v4837_v1 }
 0xaa4   :  { %2617 = vmatprep.subr.bf16.mxu0 %v4843_v5  ;;  %2658 = vmatprep.subr.bf16.mxu1 %v4845_v6 }
 0xaa7   :  { %2618 = vmatpush1.bf16.msra.mxu0 %v4847_v9  ;;  %2659 = vmatpush1.bf16.msra.mxu1 %v4849_v39 }
 0xaa8   :  { %2619 = vmatprep.subr.bf16.mxu0 %v4856_v25  ;;  %2660 = vmatprep.subr.bf16.mxu1 %v4858_v10 }
 0xaab   :  { %2620 = vmatpush1.bf16.msra.mxu0 %v4861_v26  ;;  %2661 = vmatpush1.bf16.msra.mxu1 %v4863_v29 }
 0xaac   :  { %2621 = vmatprep.subr.bf16.mxu0 %v4869_v33  ;;  %2662 = vmatprep.subr.bf16.mxu1 %v4871_v12 }
 0xaaf   :  { %2622 = vmatpush1.bf16.msra.mxu0 %v4873_v24  ;;  %2663 = vmatpush1.bf16.msra.mxu1 %v4875_v41 }
 0xab0   :  { %2623 = vmatprep.subr.bf16.mxu0 %v4882_v45  ;;  %2664 = vmatprep.subr.bf16.mxu1 %v4884_v37 }
 0xab3   :  { %2624 = vmatpush1.bf16.msra.mxu0 %v4887_v46  ;;  %2665 = vmatpush1.bf16.msra.mxu1 %v4889_v16 }
 0xab4   :  { %2723 = vmatprep.subr.bf16.mxu0 %v4791_v31  ;;  %2764 = vmatprep.subr.bf16.mxu1 %v4793_v18 }
 0xb69   :  { %v2529_v27 = vpop.f32.mrb[56].mxu0  ;;  %v2570_v20 = vpop.f32.mrb[88].mxu1 }
 0xb6a   :  { %v2577_v47 = vadd.f32 %v2529_v27, %v5472_v49  ;;  %v2579_v38 = vadd.f32 %v2570_v20, %v5473_v0  ;;  %v2531_v13 = vpop.f32.mrb[57].mxu0  ;;  %v2572_v30 = vpop.f32.mrb[89].mxu1 }
 0xb6b   :  { %v2578_v3 = vadd.f32 %v2531_v13, %v5474_v14  ;;  %v2580_v28 = vadd.f32 %v2572_v30, %v5475_v15  ;;  %v2533_v23 = vpop.f32.mrb[58].mxu0  ;;  %v2574_v42 = vpop.f32.mrb[90].mxu1  ;;  %v5476_v14 = vld [vmem:[#allocation25_spill] sm:$0xff]  ;;  %v5477_v15 = vld [vmem:[#allocation27_spill] sm:$0xff] }
 0xb6c   :  { %v2582_v43 = vmul.f32 0.5, %v2577_v47  ;;  %v2534_v40 = vpop.f32.mrb[59].mxu0  ;;  %v2575_v35 = vpop.f32.mrb[91].mxu1 }
 0xb6d   :  { %v2586_v52 = vmul.f32 0.5, %v2578_v3  ;;  %v2591_v53 = vmul.f32 0.5, %v2580_v28  ;;  %v5479_v35 = vld [vmem:[#allocation36_spill] sm:$0xff] }
 0xb6e   :  { %3852 = vtanh.f32 %v2582_v43  ;;  %v5478_v43 = vld [vmem:[#allocation26_spill] sm:$0xff] }
 0xb6f   :  { %3854 = vtanh.f32 %v2586_v52 }
 0xb70   :  { %3856 = vtanh.f32 %v2579_v38 }
 0xb71   :  { %3858 = vtanh.f32 %v2591_v53 }
 0xb78   :  { %v3853_v34 = vpop.eup %3852 }
 0xb79   :  { %v3855_v4 = vpop.eup %3854  ;;  %v2584_v44 = vadd.f32 1.0, %v3853_v34 }
 0xb7a   :  { %v2588_v19 = vadd.f32 1.0, %v3855_v4  ;;  %v3857_v57 = vpop.eup %3856 }
 0xb7b   :  { %v2585_v36 = vmul.f32 0.5, %v2584_v44  ;;  %v3859_v20 = vpop.eup %3858 }
 0xb7c   :  { %v2589_v32 = vmul.f32 0.5, %v2588_v19  ;;  %v2593_v49 = vadd.f32 1.0, %v3859_v20 }
 0xb7d   :  { %v2596_v54 = vmul.f32 %v3857_v57, %v2585_v36 }
 0xb7e   :  { %v2595_v50 = vmul.f32 %v2589_v32, %v5079_v7  ;;  %v2594_v47 = vmul.f32 0.5, %v2593_v49 }
 0xb80   :  { %v5125_v27 = vadd.f32 %v2596_v54, %v2595_v50 }
 0xb82   :  { %3860 = vtanh.f32 %v5125_v27 }
 0xb8c   :  { %v3861_v0 = vpop.eup %3860 }
 0xb8d   :  { %v5128_v38 = vmul.f32 %v3861_v0, %v2594_v47 }
 0xb8f   :  { %v2608_v13 = vpack.c.bf16 %v5128_v38, %v5128_v38 }
 0xb91   :  { %2642 = vmatmul.mubr.bf16.vlgmr.msra.gmra.mrb[60].mxu0 %v2608_v13  ;;  %2683 = vmatmul.mubr.bf16.vlgmr.msra.gmra.mrb[92].mxu1 %v2608_v13 }
 0xb92   :  { %2724 = vmatpush1.bf16.msra.mxu0 %v4796_v48  ;;  %2765 = vmatpush1.bf16.msra.mxu1 %v4798_v21 }
 0xb93   :  { %2725 = vmatprep.subr.bf16.mxu0 %v4804_v22  ;;  %2766 = vmatprep.subr.bf16.mxu1 %v4806_v55 }
 0xb94   :  { %2755 = vmatprep.mubr.bf16.mxu0 %v5424_v51  ;;  %2796 = vmatprep.mubr.bf16.mxu1 %v5424_v51 }
 0xb96   :  { %2726 = vmatpush1.bf16.msra.mxu0 %v4809_v8  ;;  %2767 = vmatpush1.bf16.msra.mxu1 %v4811_v56 }
 0xb97   :  { %2727 = vmatprep.subr.bf16.mxu0 %v4817_v58  ;;  %2768 = vmatprep.subr.bf16.mxu1 %v4819_v11 }
 0xb9a   :  { %2728 = vmatpush1.bf16.msra.mxu0 %v4821_v59  ;;  %2769 = vmatpush1.bf16.msra.mxu1 %v4823_v60 }
 0xb9b   :  { %2729 = vmatprep.subr.bf16.mxu0 %v4830_v61  ;;  %2770 = vmatprep.subr.bf16.mxu1 %v4832_v62 }
 0xb9e   :  { %2730 = vmatpush1.bf16.msra.mxu0 %v4835_v63  ;;  %2771 = vmatpush1.bf16.msra.mxu1 %v4837_v1 }
 0xb9f   :  { %2731 = vmatprep.subr.bf16.mxu0 %v4843_v5  ;;  %2772 = vmatprep.subr.bf16.mxu1 %v4845_v6 }
 0xba2   :  { %2732 = vmatpush1.bf16.msra.mxu0 %v4847_v9  ;;  %2773 = vmatpush1.bf16.msra.mxu1 %v4849_v39 }
 0xba3   :  { %2733 = vmatprep.subr.bf16.mxu0 %v4856_v25  ;;  %2774 = vmatprep.subr.bf16.mxu1 %v4858_v10 }
 0xba6   :  { %2734 = vmatpush1.bf16.msra.mxu0 %v4861_v26  ;;  %2775 = vmatpush1.bf16.msra.mxu1 %v4863_v29 }
 0xba7   :  { %2735 = vmatprep.subr.bf16.mxu0 %v4869_v33  ;;  %2776 = vmatprep.subr.bf16.mxu1 %v4871_v12 }
 0xbaa   :  { %2736 = vmatpush1.bf16.msra.mxu0 %v4873_v24  ;;  %2777 = vmatpush1.bf16.msra.mxu1 %v4875_v41 }
 0xbab   :  { %2737 = vmatprep.subr.bf16.mxu0 %v4882_v45  ;;  %2778 = vmatprep.subr.bf16.mxu1 %v4884_v37 }
 0xbae   :  { %2738 = vmatpush1.bf16.msra.mxu0 %v4887_v46  ;;  %2779 = vmatpush1.bf16.msra.mxu1 %v4889_v16 }
 0xbaf   :  { %2837 = vmatprep.subr.bf16.mxu0 %v4791_v31  ;;  %2878 = vmatprep.subr.bf16.mxu1 %v4793_v18 }
 0xc64   :  { %v2643_v7 = vpop.f32.mrb[60].mxu0  ;;  %v2684_v30 = vpop.f32.mrb[92].mxu1 }
 0xc65   :  { %v2691_v3 = vadd.f32 %v2643_v7, %v5476_v14  ;;  %v2693_v28 = vadd.f32 %v2684_v30, %v5477_v15  ;;  %v2645_v23 = vpop.f32.mrb[61].mxu0  ;;  %v2686_v42 = vpop.f32.mrb[93].mxu1 }
 0xc66   :  { %v2692_v40 = vadd.f32 %v2645_v23, %v5478_v43  ;;  %v2694_v52 = vadd.f32 %v2686_v42, %v5479_v35  ;;  %v2647_v53 = vpop.f32.mrb[62].mxu0  ;;  %v2688_v34 = vpop.f32.mrb[94].mxu1 }
 0xc67   :  { %v2696_v4 = vmul.f32 0.5, %v2691_v3  ;;  %v2648_v44 = vpop.f32.mrb[63].mxu0  ;;  %v2689_v19 = vpop.f32.mrb[95].mxu1 }
 0xc68   :  { %v2700_v36 = vmul.f32 0.5, %v2692_v40  ;;  %v2705_v57 = vmul.f32 0.5, %v2694_v52  ;;  %v5227_v44 = vld [vmem:[#allocation14 + $0x8] ss:$16 sps:$4 sm:$0xff]   ;;  %v5230_v19 = vld [vmem:[#allocation14 + $0x24] ss:$16 sps:$4 sm:$0xff]  }
 0xc69   :  { %3862 = vtanh.f32 %v2696_v4  ;;  %v5224_v4 = vld [vmem:[#allocation14] ss:$16 sps:$4 sm:$0xff]  }
 0xc6a   :  { %3864 = vtanh.f32 %v2700_v36  ;;  %v5233_v36 = vld [vmem:[#allocation14 + $0x2c] ss:$16 sps:$4 sm:$0xff]  }
 0xc6b   :  { %3866 = vtanh.f32 %v2693_v28 }
 0xc6c   :  { %3868 = vtanh.f32 %v2705_v57  ;;  %v5238_v57 = vld [vmem:[#allocation14 + $0x20] ss:$16 sps:$4 sm:$0xff]  }
 0xc73   :  { %v3863_v32 = vpop.eup %3862 }
 0xc74   :  { %v3865_v54 = vpop.eup %3864  ;;  %v2698_v50 = vadd.f32 1.0, %v3863_v32  ;;  %v5241_v32 = vld [vmem:[#allocation14 + $0x28] ss:$16 sps:$4 sm:$0xff]  }
 0xc75   :  { %v2702_v20 = vadd.f32 1.0, %v3865_v54  ;;  %v3867_v47 = vpop.eup %3866  ;;  %v5244_v54 = vld [vmem:[#allocation14 + $0x44] ss:$16 sps:$4 sm:$0xff]  }
 0xc76   :  { %v2699_v49 = vmul.f32 0.5, %v2698_v50  ;;  %v3869_v14 = vpop.eup %3868  ;;  %v5247_v50 = vld [vmem:[#allocation14 + $0x4c] ss:$16 sps:$4 sm:$0xff]  }
 0xc77   :  { %v2703_v0 = vmul.f32 0.5, %v2702_v20  ;;  %v2707_v3 = vadd.f32 1.0, %v3869_v14  ;;  %v5250_v20 = vld [vmem:[#allocation14 + $0x40] ss:$16 sps:$4 sm:$0xff]   ;;  %v5271_v14 = vld [vmem:[#allocation14 + $0x8c] ss:$16 sps:$4 sm:$0xff]  }
 0xc78   :  { %v2710_v13 = vmul.f32 %v3867_v47, %v2699_v49  ;;  %v5253_v49 = vld [vmem:[#allocation14 + $0x48] ss:$16 sps:$4 sm:$0xff]   ;;  %v5256_v47 = vld [vmem:[#allocation14 + $0x64] ss:$16 sps:$4 sm:$0xff]  }
 0xc79   :  { %v2709_v7 = vmul.f32 %v2703_v0, %v5125_v27  ;;  %v2708_v15 = vmul.f32 0.5, %v2707_v3  ;;  %v5259_v0 = vld [vmem:[#allocation14 + $0x6c] ss:$16 sps:$4 sm:$0xff]   ;;  %v5274_v3 = vld [vmem:[#allocation14 + $0x80] ss:$16 sps:$4 sm:$0xff]  }
 0xc7b   :  { %v5171_v30 = vadd.f32 %v2710_v13, %v2709_v7  ;;  %v5262_v13 = vld [vmem:[#allocation14 + $0x60] ss:$16 sps:$4 sm:$0xff]   ;;  %v5265_v7 = vld [vmem:[#allocation14 + $0x68] ss:$16 sps:$4 sm:$0xff]  }
 0xc7d   :  { %3870 = vtanh.f32 %v5171_v30 }
 0xc87   :  { %v3871_v28 = vpop.eup %3870 }
 0xc88   :  { %v5174_v23 = vmul.f32 %v3871_v28, %v2708_v15  ;;  %v5277_v15 = vld [vmem:[#allocation14 + $0x88] ss:$16 sps:$4 sm:$0xff]   ;;  %v5280_v28 = vld [vmem:[#allocation14 + $0xa4] ss:$16 sps:$4 sm:$0xff]  }
 0xc8a   :  { %v2722_v42 = vpack.c.bf16 %v5174_v23, %v5174_v23 }
 0xc8c   :  { %2756 = vmatmul.mubr.bf16.vlgmr.msra.gmra.mrb[64].mxu0 %v2722_v42  ;;  %2797 = vmatmul.mubr.bf16.vlgmr.msra.gmra.mrb[96].mxu1 %v2722_v42  ;;  %v5283_v42 = vld [vmem:[#allocation14 + $0xac] ss:$16 sps:$4 sm:$0xff]  }
 0xc8d   :  { %2838 = vmatpush1.bf16.msra.mxu0 %v4796_v48  ;;  %2879 = vmatpush1.bf16.msra.mxu1 %v4798_v21 }
 0xc8e   :  { %2839 = vmatprep.subr.bf16.mxu0 %v4804_v22  ;;  %2880 = vmatprep.subr.bf16.mxu1 %v4806_v55  ;;  %v5480_v22 = vld [vmem:[#allocation28_spill] sm:$0xff] }
 0xc8f   :  { %2869 = vmatprep.mubr.bf16.mxu0 %v5424_v51  ;;  %2910 = vmatprep.mubr.bf16.mxu1 %v5424_v51 }
 0xc91   :  { %2840 = vmatpush1.bf16.msra.mxu0 %v4809_v8  ;;  %2881 = vmatpush1.bf16.msra.mxu1 %v4811_v56  ;;  %v5481_v8 = vld [vmem:[#allocation38_spill] sm:$0xff] }
 0xc92   :  { %2841 = vmatprep.subr.bf16.mxu0 %v4817_v58  ;;  %2882 = vmatprep.subr.bf16.mxu1 %v4819_v11 }
 0xc95   :  { %2842 = vmatpush1.bf16.msra.mxu0 %v4821_v59  ;;  %2883 = vmatpush1.bf16.msra.mxu1 %v4823_v60  ;;  %v5482_v59 = vld [vmem:[#allocation37_spill] sm:$0xff] }
 0xc96   :  { %2843 = vmatprep.subr.bf16.mxu0 %v4830_v61  ;;  %2884 = vmatprep.subr.bf16.mxu1 %v4832_v62  ;;  %v5483_v61 = vld [vmem:[#allocation39_spill] sm:$0xff] }
 0xc99   :  { %2844 = vmatpush1.bf16.msra.mxu0 %v4835_v63  ;;  %2885 = vmatpush1.bf16.msra.mxu1 %v4837_v1 }
 0xc9a   :  { %2845 = vmatprep.subr.bf16.mxu0 %v4843_v5  ;;  %2886 = vmatprep.subr.bf16.mxu1 %v4845_v6 }
 0xc9d   :  { %2846 = vmatpush1.bf16.msra.mxu0 %v4847_v9  ;;  %2887 = vmatpush1.bf16.msra.mxu1 %v4849_v39 }
 0xc9e   :  { %2847 = vmatprep.subr.bf16.mxu0 %v4856_v25  ;;  %2888 = vmatprep.subr.bf16.mxu1 %v4858_v10 }
 0xca1   :  { %2848 = vmatpush1.bf16.msra.mxu0 %v4861_v26  ;;  %2889 = vmatpush1.bf16.msra.mxu1 %v4863_v29 }
 0xca2   :  { %2849 = vmatprep.subr.bf16.mxu0 %v4869_v33  ;;  %2890 = vmatprep.subr.bf16.mxu1 %v4871_v12 }
 0xca5   :  { %2850 = vmatpush1.bf16.msra.mxu0 %v4873_v24  ;;  %2891 = vmatpush1.bf16.msra.mxu1 %v4875_v41 }
 0xca6   :  { %2851 = vmatprep.subr.bf16.mxu0 %v4882_v45  ;;  %2892 = vmatprep.subr.bf16.mxu1 %v4884_v37 }
 0xca9   :  { %2852 = vmatpush1.bf16.msra.mxu0 %v4887_v46  ;;  %2893 = vmatpush1.bf16.msra.mxu1 %v4889_v16 }
 0xcaa   :  { %2951 = vmatprep.subr.bf16.mxu0 %v4791_v31  ;;  %2992 = vmatprep.subr.bf16.mxu1 %v4793_v18 }
 0xd5f   :  { %v2757_v48 = vpop.f32.mrb[64].mxu0  ;;  %v2798_v21 = vpop.f32.mrb[96].mxu1 }
 0xd60   :  { %v2805_v55 = vadd.f32 %v2757_v48, %v5480_v22  ;;  %v2807_v56 = vadd.f32 %v2798_v21, %v5481_v8  ;;  %v2759_v58 = vpop.f32.mrb[65].mxu0  ;;  %v2800_v11 = vpop.f32.mrb[97].mxu1  ;;  %v5286_v48 = vld [vmem:[#allocation14 + $0xa0] ss:$16 sps:$4 sm:$0xff]   ;;  %v5289_v21 = vld [vmem:[#allocation14 + $0xa8] ss:$16 sps:$4 sm:$0xff]  }
 0xd61   :  { %v2806_v60 = vadd.f32 %v2759_v58, %v5482_v59  ;;  %v2808_v62 = vadd.f32 %v2800_v11, %v5483_v61  ;;  %v2761_v63 = vpop.f32.mrb[66].mxu0  ;;  %v2802_v1 = vpop.f32.mrb[98].mxu1  ;;  %v5292_v22 = vld [vmem:[#allocation14 + $0xc4] ss:$16 sps:$4 sm:$0xff]   ;;  %v5298_v8 = vld [vmem:[#allocation14 + $0xc0] ss:$16 sps:$4 sm:$0xff]  }
 0xd62   :  { %v2810_v5 = vmul.f32 0.5, %v2805_v55  ;;  %v2762_v6 = vpop.f32.mrb[67].mxu0  ;;  %v2803_v9 = vpop.f32.mrb[99].mxu1  ;;  %v5295_v55 = vld [vmem:[#allocation14 + $0xcc] ss:$16 sps:$4 sm:$0xff]   ;;  %v5484_v61 = vld [vmem:[#allocation29_spill] sm:$0xff] }
 0xd63   :  { %v2814_v31 = vmul.f32 0.5, %v2806_v60  ;;  %v2819_v18 = vmul.f32 0.5, %v2808_v62  ;;  %v3974_v58 = vld [vmem:[#allocation14 + $0x4] ss:$16 sps:$4 sm:$0xff]   ;;  %v3975_v11 = vld [vmem:[#allocation14 + $0xc] ss:$16 sps:$4 sm:$0xff]  }
 0xd64   :  { %3872 = vtanh.f32 %v2810_v5  ;;  %v5485_v63 = vld [vmem:[#allocation31_spill] sm:$0xff]  ;;  %v5486_v9 = vld [vmem:[#allocation30_spill] sm:$0xff] }
 0xd65   :  { %3874 = vtanh.f32 %v2814_v31  ;;  %v5487_v31 = vld [vmem:[#allocation40_spill] sm:$0xff] }
 0xd66   :  { %3876 = vtanh.f32 %v2807_v56  ;;  %v5301_v56 = vld [vmem:[#allocation14 + $0xc8] ss:$16 sps:$4 sm:$0xff]  }
 0xd67   :  { %3878 = vtanh.f32 %v2819_v18 }
 0xd6e   :  { %v3873_v39 = vpop.eup %3872 }
 0xd6f   :  { %v3875_v25 = vpop.eup %3874  ;;  %v2812_v10 = vadd.f32 1.0, %v3873_v39 }
 0xd70   :  { %v2816_v26 = vadd.f32 1.0, %v3875_v25  ;;  %v3877_v33 = vpop.eup %3876 }
 0xd71   :  { %v2813_v29 = vmul.f32 0.5, %v2812_v10  ;;  %v3879_v43 = vpop.eup %3878 }
 0xd72   :  { %v2817_v12 = vmul.f32 0.5, %v2816_v26  ;;  %v2821_v40 = vadd.f32 1.0, %v3879_v43 }
 0xd73   :  { %v2824_v24 = vmul.f32 %v3877_v33, %v2813_v29 }
 0xd74   :  { %v2823_v41 = vmul.f32 %v2817_v12, %v5171_v30  ;;  %v2822_v35 = vmul.f32 0.5, %v2821_v40  ;;  %v5268_v30 = vld [vmem:[#allocation14 + $0x84] ss:$16 sps:$4 sm:$0xff]  }
 0xd76   :  { %v5217_v27 = vadd.f32 %v2824_v24, %v2823_v41 }
 0xd78   :  { %3880 = vtanh.f32 %v5217_v27 }
 0xd82   :  { %v3881_v52 = vpop.eup %3880 }
 0xd83   :  { %v5220_v53 = vmul.f32 %v3881_v52, %v2822_v35 }
 0xd85   :  { %v2836_v34 = vpack.c.bf16 %v5220_v53, %v5220_v53 }
 0xd87   :  { %2870 = vmatmul.mubr.bf16.vlgmr.msra.gmra.mrb[68].mxu0 %v2836_v34  ;;  %2911 = vmatmul.mubr.bf16.vlgmr.msra.gmra.mrb[100].mxu1 %v2836_v34 }
 0xd88   :  { %2952 = vmatpush1.bf16.msra.mxu0 %v5224_v4  ;;  %2993 = vmatpush1.bf16.msra.mxu1 %v5227_v44 }
 0xd89   :  { %2953 = vmatprep.subr.bf16.mxu0 %v5230_v19  ;;  %2994 = vmatprep.subr.bf16.mxu1 %v5233_v36 }
 0xd8a   :  { %2983 = vmatprep.mubr.bf16.mxu0 %v5424_v51  ;;  %3024 = vmatprep.mubr.bf16.mxu1 %v5424_v51 }
 0xd8c   :  { %2954 = vmatpush1.bf16.msra.mxu0 %v5238_v57  ;;  %2995 = vmatpush1.bf16.msra.mxu1 %v5241_v32 }
 0xd8d   :  { %2955 = vmatprep.subr.bf16.mxu0 %v5244_v54  ;;  %2996 = vmatprep.subr.bf16.mxu1 %v5247_v50 }
 0xd90   :  { %2956 = vmatpush1.bf16.msra.mxu0 %v5250_v20  ;;  %2997 = vmatpush1.bf16.msra.mxu1 %v5253_v49 }
 0xd91   :  { %2957 = vmatprep.subr.bf16.mxu0 %v5256_v47  ;;  %2998 = vmatprep.subr.bf16.mxu1 %v5259_v0 }
 0xd94   :  { %2958 = vmatpush1.bf16.msra.mxu0 %v5262_v13  ;;  %2999 = vmatpush1.bf16.msra.mxu1 %v5265_v7 }
 0xd95   :  { %2959 = vmatprep.subr.bf16.mxu0 %v5268_v30  ;;  %3000 = vmatprep.subr.bf16.mxu1 %v5271_v14 }
 0xd98   :  { %2960 = vmatpush1.bf16.msra.mxu0 %v5274_v3  ;;  %3001 = vmatpush1.bf16.msra.mxu1 %v5277_v15 }
 0xd99   :  { %2961 = vmatprep.subr.bf16.mxu0 %v5280_v28  ;;  %3002 = vmatprep.subr.bf16.mxu1 %v5283_v42 }
 0xd9c   :  { %2962 = vmatpush1.bf16.msra.mxu0 %v5286_v48  ;;  %3003 = vmatpush1.bf16.msra.mxu1 %v5289_v21 }
 0xd9d   :  { %2963 = vmatprep.subr.bf16.mxu0 %v5292_v22  ;;  %3004 = vmatprep.subr.bf16.mxu1 %v5295_v55 }
 0xda0   :  { %2964 = vmatpush1.bf16.msra.mxu0 %v5298_v8  ;;  %3005 = vmatpush1.bf16.msra.mxu1 %v5301_v56 }
 0xda1   :  { %2965 = vmatprep.subr.bf16.mxu0 %v4882_v45  ;;  %3006 = vmatprep.subr.bf16.mxu1 %v4884_v37 }
 0xda4   :  { %2966 = vmatpush1.bf16.msra.mxu0 %v4887_v46  ;;  %3007 = vmatpush1.bf16.msra.mxu1 %v4889_v16 }
 0xda5   :  { %3065 = vmatprep.subr.bf16.mxu0 %v3974_v58  ;;  %3106 = vmatprep.subr.bf16.mxu1 %v3975_v11 }
 0xe5a   :  { %v2871_v59 = vpop.f32.mrb[68].mxu0  ;;  %v2912_v60 = vpop.f32.mrb[100].mxu1 }
 0xe5b   :  { %v2919_v62 = vadd.f32 %v2871_v59, %v5484_v61  ;;  %v2921_v1 = vadd.f32 %v2912_v60, %v5485_v63  ;;  %v2873_v5 = vpop.f32.mrb[69].mxu0  ;;  %v2914_v6 = vpop.f32.mrb[101].mxu1 }
 0xe5c   :  { %v2920_v45 = vadd.f32 %v2873_v5, %v5486_v9  ;;  %v2922_v37 = vadd.f32 %v2914_v6, %v5487_v31  ;;  %v2875_v18 = vpop.f32.mrb[70].mxu0  ;;  %v2916_v46 = vpop.f32.mrb[102].mxu1 }
 0xe5d   :  { %v2924_v39 = vmul.f32 0.5, %v2919_v62  ;;  %v2876_v16 = vpop.f32.mrb[71].mxu0  ;;  %v2917_v25 = vpop.f32.mrb[103].mxu1 }
 0xe5e   :  { %v2928_v10 = vmul.f32 0.5, %v2920_v45  ;;  %v2933_v26 = vmul.f32 0.5, %v2922_v37  ;;  %v3745_v25 = vld [vmem:[#allocation15 + $0x8] sm:$0xff]  }
 0xe5f   :  { %3882 = vtanh.f32 %v2924_v39 }
 0xe60   :  { %3884 = vtanh.f32 %v2928_v10  ;;  %v3181_v10 = vpack.c.bf16 %v5082_v2, %v5036_v17  ;;  %v3751_v17 = vld [vmem:[#allocation15 + $0x38] sm:$0xff]   ;;  %v3182_v2 = vpack.c.bf16 %v5174_v23, %v5128_v38 }
 0xe61   :  { %3886 = vtanh.f32 %v2921_v1 }
 0xe62   :  { %3888 = vtanh.f32 %v2933_v26  ;;  %v3746_v26 = vld [vmem:[#allocation15 + $0x10] sm:$0xff]  }
 0xe69   :  { %v3883_v29 = vpop.eup %3882 }
 0xe6a   :  { %v3885_v33 = vpop.eup %3884  ;;  %v2926_v12 = vadd.f32 1.0, %v3883_v29  ;;  %v3747_v29 = vld [vmem:[#allocation15 + $0x18] sm:$0xff]  }
 0xe6b   :  { %v2930_v24 = vadd.f32 1.0, %v3885_v33  ;;  %v3887_v43 = vpop.eup %3886  ;;  %v3748_v33 = vld [vmem:[#allocation15 + $0x20] sm:$0xff]  }
 0xe6c   :  { %v2927_v41 = vmul.f32 0.5, %v2926_v12  ;;  %v3889_v58 = vpop.eup %3888  ;;  %v3749_v12 = vld [vmem:[#allocation15 + $0x28] sm:$0xff]  }
 0xe6d   :  { %v2931_v40 = vmul.f32 0.5, %v2930_v24  ;;  %v2935_v11 = vadd.f32 1.0, %v3889_v58  ;;  %v3750_v24 = vld [vmem:[#allocation15 + $0x30] sm:$0xff]  }
 0xe6e   :  { %v2938_v35 = vmul.f32 %v3887_v43, %v2927_v41 }
 0xe6f   :  { %v2937_v52 = vmul.f32 %v2931_v40, %v5217_v27  ;;  %v2936_v59 = vmul.f32 0.5, %v2935_v11  ;;  %v3977_v27 = vld [vmem:[#allocation14 + $0xec] ss:$16 sps:$4 sm:$0xff]  }
 0xe71   :  { %v5313_v34 = vadd.f32 %v2938_v35, %v2937_v52  ;;  %v5492_v35 = vld [vmem:[#allocation23_spill] sm:$0xff] }
 0xe73   :  { %3890 = vtanh.f32 %v5313_v34 }
 0xe7d   :  { %v3891_v60 = vpop.eup %3890 }
 0xe7e   :  { %v5316_v61 = vmul.f32 %v3891_v60, %v2936_v59  ;;  %v5494_v60 = vld [vmem:[#allocation43_spill] sm:$0xff] }
 0xe80   :  { %v2950_v62 = vpack.c.bf16 %v5316_v61, %v5316_v61  ;;  %v3183_v41 = vpack.c.bf16 %v5316_v61, %v5220_v53 }
 0xe82   :  { %2984 = vmatmul.mubr.bf16.vlgmr.msra.gmra.mrb[72].mxu0 %v2950_v62  ;;  %3025 = vmatmul.mubr.bf16.vlgmr.msra.gmra.mrb[104].mxu1 %v2950_v62 }
 0xe83   :  { %3066 = vmatpush1.bf16.msra.mxu0 %v5224_v4  ;;  %3107 = vmatpush1.bf16.msra.mxu1 %v5227_v44  ;;  %v3978_v4 = vld [vmem:[#allocation14 + $0xe0] ss:$16 sps:$4 sm:$0xff]   ;;  %v3979_v44 = vld [vmem:[#allocation14 + $0xe8] ss:$16 sps:$4 sm:$0xff]  }
 0xe84   :  { %3067 = vmatprep.subr.bf16.mxu0 %v5230_v19  ;;  %3108 = vmatprep.subr.bf16.mxu1 %v5233_v36  ;;  %v3744_v19 = vld [vmem:[#allocation15] sm:$0xff]  }
 0xe85   :  { %3097 = vmatprep.mubr.bf16.mxu0 %v5424_v51  ;;  %3138 = vmatprep.mubr.bf16.mxu1 %v5424_v51  ;;  %v3976_v51 = vld [vmem:[#allocation14 + $0xe4] ss:$16 sps:$4 sm:$0xff]  }
 0xe87   :  { %3068 = vmatpush1.bf16.msra.mxu0 %v5238_v57  ;;  %3109 = vmatpush1.bf16.msra.mxu1 %v5241_v32  ;;  %v5488_v32 = vld [vmem:[#allocation32_spill] sm:$0xff] }
 0xe88   :  { %3069 = vmatprep.subr.bf16.mxu0 %v5244_v54  ;;  %3110 = vmatprep.subr.bf16.mxu1 %v5247_v50  ;;  %v5489_v50 = vld [vmem:[#allocation42_spill] sm:$0xff] }
 0xe8b   :  { %3070 = vmatpush1.bf16.msra.mxu0 %v5250_v20  ;;  %3111 = vmatpush1.bf16.msra.mxu1 %v5253_v49 }
 0xe8c   :  { %3071 = vmatprep.subr.bf16.mxu0 %v5256_v47  ;;  %3112 = vmatprep.subr.bf16.mxu1 %v5259_v0  ;;  %v5490_v0 = vld [vmem:[#allocation41_spill] sm:$0xff] }
 0xe8f   :  { %3072 = vmatpush1.bf16.msra.mxu0 %v5262_v13  ;;  %3113 = vmatpush1.bf16.msra.mxu1 %v5265_v7  ;;  %v5491_v7 = vld [vmem:[#allocation44_spill] sm:$0xff] }
 0xe90   :  { %3073 = vmatprep.subr.bf16.mxu0 %v5268_v30  ;;  %3114 = vmatprep.subr.bf16.mxu1 %v5271_v14 }
 0xe93   :  { %3074 = vmatpush1.bf16.msra.mxu0 %v5274_v3  ;;  %3115 = vmatpush1.bf16.msra.mxu1 %v5277_v15 }
 0xe94   :  { %3075 = vmatprep.subr.bf16.mxu0 %v5280_v28  ;;  %3116 = vmatprep.subr.bf16.mxu1 %v5283_v42 }
 0xe97   :  { %3076 = vmatpush1.bf16.msra.mxu0 %v5286_v48  ;;  %3117 = vmatpush1.bf16.msra.mxu1 %v5289_v21 }
 0xe98   :  { %3077 = vmatprep.subr.bf16.mxu0 %v5292_v22  ;;  %3118 = vmatprep.subr.bf16.mxu1 %v5295_v55 }
 0xe9b   :  { %3078 = vmatpush1.bf16.msra.mxu0 %v5298_v8  ;;  %3119 = vmatpush1.bf16.msra.mxu1 %v5301_v56 }
 0xe9c   :  { %3079 = vmatprep.subr.bf16.mxu0 %v3976_v51  ;;  %3120 = vmatprep.subr.bf16.mxu1 %v3977_v27  ;;  %v5495_v51 = vld [vmem:[#allocation46_spill] sm:$0xff] }
 0xe9f   :  { %3080 = vmatpush1.bf16.msra.mxu0 %v3978_v4  ;;  %3121 = vmatpush1.bf16.msra.mxu1 %v3979_v44 }
 0xea0   :  { %3509 = vmatprep.subr.bf16.mxu0 %v3744_v19 }
 0xf55   :  { %v2985_v36 = vpop.f32.mrb[72].mxu0  ;;  %v3026_v57 = vpop.f32.mrb[104].mxu1 }
 0xf56   :  { %v3033_v54 = vadd.f32 %v2985_v36, %v5488_v32  ;;  %v3035_v20 = vadd.f32 %v3026_v57, %v5489_v50  ;;  %v2987_v49 = vpop.f32.mrb[73].mxu0  ;;  %v3028_v47 = vpop.f32.mrb[105].mxu1 }
 0xf57   :  { %v3034_v13 = vadd.f32 %v2987_v49, %v5490_v0  ;;  %v3036_v30 = vadd.f32 %v3028_v47, %v5491_v7  ;;  %v2989_v14 = vpop.f32.mrb[74].mxu0  ;;  %v3030_v3 = vpop.f32.mrb[106].mxu1 }
 0xf58   :  { %v3038_v15 = vmul.f32 0.5, %v3033_v54  ;;  %v2990_v28 = vpop.f32.mrb[75].mxu0  ;;  %v3031_v42 = vpop.f32.mrb[107].mxu1  ;;  %v3488_v14 = vld [vmem:[%s5395_s8] ss:$0 sm:$0xff]  ;;  %s4156_s8 = smov [#allocation17]  }
 0xf59   :  { %v3042_v48 = vmul.f32 0.5, %v3034_v13  ;;  %v3047_v21 = vmul.f32 0.5, %v3036_v30  ;;  %s3334_s12 = sshll.u32 %s4156_s8, 4  ;;  %s3335_s12 = int_to_ptr.vmem [resolvable:$true] %s3334_s12 }
 0xf5a   :  { %3892 = vtanh.f32 %v3038_v15  ;;  %s4112_s21 = scalar_lea.vmem %s3335_s12, 1024  ;;  %p4117_p7 = scmp.lt.s32.totalorder %s3335_s12, %s3335_s12 }
 0xf5b   :  { %3894 = vtanh.f32 %v3042_v48  ;;  %p4113_p6 = scmp.ne.s32.totalorder %s3335_s12, %s4112_s21  ;;  %p4118_p8 = scmp.lt.s32.totalorder %s4112_s21, %s4112_s21 }
 0xf5c   :  { %3896 = vtanh.f32 %v3035_v20 }
 0xf5d   :  { %3898 = vtanh.f32 %v3047_v21  ;;  %p4119_p9 = por %p4118_p8, %p4117_p7 }
 0xf5f   :  { %p4120_p10 = pnand %p4119_p9, %p4113_p6 }
 0xf64   :  { %v3893_v22 = vpop.eup %3892 }
 0xf65   :  { %v3895_v55 = vpop.eup %3894  ;;  %v3040_v8 = vadd.f32 1.0, %v3893_v22 }
 0xf66   :  { %v3044_v56 = vadd.f32 1.0, %v3895_v55  ;;  %v3897_v1 = vpop.eup %3896 }
 0xf67   :  { %v3041_v63 = vmul.f32 0.5, %v3040_v8  ;;  %v3899_v31 = vpop.eup %3898 }
 0xf68   :  { %v3045_v5 = vmul.f32 0.5, %v3044_v56  ;;  %v3049_v37 = vadd.f32 1.0, %v3899_v31 }
 0xf69   :  { %v3052_v6 = vmul.f32 %v3897_v1, %v3041_v63 }
 0xf6a   :  { %v3051_v9 = vmul.f32 %v3045_v5, %v5313_v34  ;;  %v3050_v18 = vmul.f32 0.5, %v3049_v37  ;;  %v5493_v34 = vld [vmem:[#allocation45_spill] sm:$0xff] }
 0xf6c   :  { %v5353_v45 = vadd.f32 %v3052_v6, %v3051_v9 }
 0xf6e   :  { %3900 = vtanh.f32 %v5353_v45 }
 0xf78   :  { %v3901_v46 = vpop.eup %3900 }
 0xf79   :  { %v5356_v39 = vmul.f32 %v3901_v46, %v3050_v18 }
 0xf7b   :  { %v3064_v16 = vpack.c.bf16 %v5356_v39, %v5356_v39 }
 0xf7d   :  { %3098 = vmatmul.mubr.bf16.vlgmr.msra.gmra.mrb[76].mxu0 %v3064_v16  ;;  %3139 = vmatmul.mubr.bf16.vlgmr.msra.gmra.mrb[108].mxu1 %v3064_v16 }
 0xf7e   :  { %3510 = vmatpush3.bf16.msra.mxu0 %v3744_v19  ;;  %3525 = vmatprep.mubr.bf16.mxu0 %v3181_v10 }
 0xf7f   :  { %3511 = vmatprep.subr.bf16.mxu0 %v3745_v25 }
 0xf82   :  { %3512 = vmatpush3.bf16.msra.mxu0 %v3745_v25 }
 0xf83   :  { %3513 = vmatprep.subr.bf16.mxu0 %v3746_v26 }
 0xf86   :  { %3514 = vmatpush3.bf16.msra.mxu0 %v3746_v26 }
 0xf87   :  { %3515 = vmatprep.subr.bf16.mxu0 %v3747_v29 }
 0xf8a   :  { %3516 = vmatpush3.bf16.msra.mxu0 %v3747_v29 }
 0xf8b   :  { %3517 = vmatprep.subr.bf16.mxu0 %v3748_v33 }
 0xf8e   :  { %3518 = vmatpush3.bf16.msra.mxu0 %v3748_v33 }
 0xf8f   :  { %3519 = vmatprep.subr.bf16.mxu0 %v3749_v12 }
 0xf92   :  { %3520 = vmatpush3.bf16.msra.mxu0 %v3749_v12 }
 0xf93   :  { %3521 = vmatprep.subr.bf16.mxu0 %v3750_v24 }
 0xf96   :  { %3522 = vmatpush3.bf16.msra.mxu0 %v3750_v24 }
 0xf97   :  { %3523 = vmatprep.subr.bf16.mxu0 %v3751_v17 }
 0xf9a   :  { %3524 = vmatpush3.bf16.msra.mxu0 %v3751_v17 }
 0xf9d   :  { %3526 = vmatmul.mubr.bf16.vlgmr.msra.gmra.mrb[80].mxu0 %v3182_v2 }
 0xf9e   :  { %3529 = vmatprep.mubr.bf16.mxu0 %v3183_v41 }
0x1050   :  { %v3099_v43 = vpop.f32.mrb[76].mxu0  ;;  %v3140_v40 = vpop.f32.mrb[108].mxu1 }
0x1051   :  { %v3147_v52 = vadd.f32 %v3099_v43, %v5492_v35  ;;  %v3149_v58 = vadd.f32 %v3140_v40, %v5493_v34  ;;  %v3101_v11 = vpop.f32.mrb[77].mxu0  ;;  %v3142_v59 = vpop.f32.mrb[109].mxu1 }
0x1052   :  { %v3148_v62 = vadd.f32 %v3101_v11, %v5494_v60  ;;  %v3150_v27 = vadd.f32 %v3142_v59, %v5495_v51  ;;  %v3103_v4 = vpop.f32.mrb[78].mxu0  ;;  %v3144_v44 = vpop.f32.mrb[110].mxu1 }
0x1053   :  { %v3152_v38 = vmul.f32 0.5, %v3147_v52  ;;  %v3104_v23 = vpop.f32.mrb[79].mxu0  ;;  %v3145_v19 = vpop.f32.mrb[111].mxu1 }
0x1054   :  { %v3156_v53 = vmul.f32 0.5, %v3148_v62  ;;  %v3161_v61 = vmul.f32 0.5, %v3150_v27 }
0x1055   :  { %3902 = vtanh.f32 %v3152_v38 }
0x1056   :  { %3904 = vtanh.f32 %v3156_v53 }
0x1057   :  { %3906 = vtanh.f32 %v3149_v58 }
0x1058   :  { %3908 = vtanh.f32 %v3161_v61 }
0x105f   :  { %v3903_v36 = vpop.eup %3902 }
0x1060   :  { %v3905_v57 = vpop.eup %3904  ;;  %v3154_v32 = vadd.f32 1.0, %v3903_v36 }
0x1061   :  { %v3158_v54 = vadd.f32 1.0, %v3905_v57  ;;  %v3907_v20 = vpop.eup %3906 }
0x1062   :  { %v3155_v50 = vmul.f32 0.5, %v3154_v32  ;;  %v3909_v7 = vpop.eup %3908 }
0x1063   :  { %v3159_v49 = vmul.f32 0.5, %v3158_v54  ;;  %v3163_v30 = vadd.f32 1.0, %v3909_v7 }
0x1064   :  { %v3166_v47 = vmul.f32 %v3907_v20, %v3155_v50 }
0x1065   :  { %v3165_v0 = vmul.f32 %v3159_v49, %v5353_v45  ;;  %v3164_v42 = vmul.f32 0.5, %v3163_v30 }
0x1067   :  { %v3167_v13 = vadd.f32 %v3166_v47, %v3165_v0 }
0x1069   :  { %3910 = vtanh.f32 %v3167_v13 }
0x1070   :  { %v3527_v3 = vpop.f32.mrb[80].mxu0 }
0x1071   :  { %v3299_v15 = vadd.f32 %v3527_v3, %v3488_v14  ;;  %v3290_v28 = vpop.f32.mrb[81].mxu0 }
0x1072   :  { %v3291_v48 = vadd.f32 %v3488_v14, %v3290_v28  ;;  %v3528_v21 = vpop.f32.mrb[82].mxu0 }
0x1073   :  { %v3911_v22 = vpop.eup %3910  ;;  %3323 = vst [vmem:[#allocation17 + $0x10] sm:$0xff] %v3299_v15  ;;  %v3302_v55 = vadd.f32 %v3528_v21, %v3488_v14  ;;  %v3293_v8 = vpop.f32.mrb[83].mxu0 }
0x1074   :  { %3321 = vst [vmem:[#allocation17] sm:$0xff] %v3291_v48  ;;  %v3294_v56 = vadd.f32 %v3488_v14, %v3293_v8  ;;  %v3169_v63 = vmul.f32 %v3911_v22, %v3164_v42 }
0x1075   :  { %3324 = vst [vmem:[#allocation17 + $0x18] sm:$0xff] %v3302_v55 }
0x1076   :  { %3322 = vst [vmem:[#allocation17 + $0x8] sm:$0xff] %v3294_v56  ;;  %v3184_v1 = vpack.c.bf16 %v3169_v63, %v5356_v39 }
0x1078   :  { %3530 = vmatmul.mubr.bf16.gmra.mrb[84].mxu0 %v3184_v1 }
0x114b   :  { %v3531_v5 = vpop.f32.mrb[84].mxu0 }
0x114c   :  { %v3315_v6 = vadd.f32 %v3531_v5, %v3488_v14  ;;  %v3306_v9 = vpop.f32.mrb[85].mxu0 }
0x114d   :  { %v3307_v45 = vadd.f32 %v3488_v14, %v3306_v9  ;;  %v3532_v31 = vpop.f32.mrb[86].mxu0 }
0x114e   :  { %3327 = vst [vmem:[#allocation17 + $0x30] sm:$0xff] %v3315_v6  ;;  %v3318_v37 = vadd.f32 %v3532_v31, %v3488_v14  ;;  %v3309_v18 = vpop.f32.mrb[87].mxu0 }
0x114f   :  { %3325 = vst [vmem:[#allocation17 + $0x20] sm:$0xff] %v3307_v45  ;;  %v3310_v46 = vadd.f32 %v3488_v14, %v3309_v18 }
0x1150   :  { %3328 = vst [vmem:[#allocation17 + $0x38] sm:$0xff] %v3318_v37 }
0x1151   :  { %3326 = vst [vmem:[#allocation17 + $0x28] sm:$0xff] %v3310_v46 }
0x1152   :  { %4123 = shalt.err (!%p4120_p10)
}
0x1153   :  { %s4124_s25 = scalar_lea.hbm %s5396_s9, 1024 }
0x1154   :  { %p4125_p11 = scmp.ne.s32.totalorder %s5396_s9, %s4124_s25  ;;  %p4128_p12 = scmp.lt.u32.totalorder %s4124_s25, %s5396_s9 }
0x1156   :  { %p4130_p13 = pnand %p4128_p12, %p4125_p11 }
0x1158   :  { %4133 = shalt.err (!%p4130_p13)
}
0x1159   :  { %s4157_s2 = smov 128   ;;  %s4158_s30 = smov 8  }
0x115a   :  { %3340 = dma.vmem_to_hbm [thread:$0]  %s3335_s12, 1024, %s5396_s9, [#allocation8], %s4157_s2, %s4157_s2, %s4158_s30  }
0x115b   :  { %4142 = dma.done.wait [#allocation8], 1024  }
0x115c   :  { %4143 = vsyncadd [#allocation8], 4294966272 }
0x115d   :  { %3344 = vsyncpa [#allocation7], 1 }
0x115e   :  { %3345 = vsyncpa [#allocation10], 1 }
0x115f   :  { %3346 = vsyncpa [#allocation13], 1 }
0x1160   :  { %3347 = vsyncpa [#allocation16], 1 }
0x1161   :  { %3348 = vsyncpa [#allocation8], 1 }

</bundles_post_ra>
